<compile_context>
chip_gen: v5e
topology: v5e:2x2
jax: 0.10.0
libtpu: 0.0.40
codegen_flags: <defaults>
</compile_context>

<pallas_src>
import functools

import jax
import jax.numpy as jnp
from jax.experimental import pallas as pl
from jax.experimental.pallas import tpu as pltpu

HEAD_SLAB = 128  # lane-dense output width of the fused head kernel


# ----------------------------------------------------------------------------
# Pallas kernels
# ----------------------------------------------------------------------------

def _vmem_spec():
    # Whole-array block resident in VMEM, no grid.
    return pl.BlockSpec(memory_space=pltpu.MemorySpace.VMEM)


def _conv_gemm_kernel(p_ref, w_ref, b_ref, o_ref, *, fuse_bn, bn_eps):
    # patches (M, K) bf16 @ weight (K, Cout) bf16 -> f32 accumulate.
    acc = jnp.dot(p_ref[...], w_ref[...], preferred_element_type=jnp.float32)
    y = jnp.maximum(acc + b_ref[...], 0.0)
    if fuse_bn:
        # Training-mode BatchNorm2d (gamma=1, beta=0 defaults): per-channel
        # stats over all N*H*W rows, which are exactly this single block.
        mean = jnp.mean(y, axis=0, keepdims=True)
        var = jnp.mean((y - mean) ** 2, axis=0, keepdims=True)
        y = (y - mean) * jax.lax.rsqrt(var + bn_eps)
    o_ref[...] = y.astype(o_ref.dtype)


def _mlp_heads_kernel(x_ref, w1_ref, b1_ref, w2_ref, b2_ref,
                      wh1_ref, bh1_ref, wh2_ref, bh2_ref, o_ref,
                      *, ln_eps, action_dim):
    def dense(h, w_ref, b_ref):
        return jnp.dot(h.astype(w_ref.dtype), w_ref[...],
                       preferred_element_type=jnp.float32) + b_ref[...]

    def layernorm(y):  # gamma=1, beta=0 (fresh-module defaults)
        mean = jnp.mean(y, axis=-1, keepdims=True)
        var = jnp.mean((y - mean) ** 2, axis=-1, keepdims=True)
        return (y - mean) * jax.lax.rsqrt(var + ln_eps)

    y = layernorm(jnp.maximum(dense(x_ref[...], w1_ref, b1_ref), 0.0))  # (B, 512)
    y = layernorm(jnp.maximum(dense(y, w2_ref, b2_ref), 0.0))           # (B, 256)
    h = jnp.maximum(dense(y, wh1_ref, bh1_ref), 0.0)                    # (B, 256)
    z = dense(h, wh2_ref, bh2_ref)                                      # (B, 128)

    logits = z[:, :action_dim]
    logits = logits - jnp.max(logits, axis=-1, keepdims=True)
    e = jnp.exp(logits)
    probs = e * pl.reciprocal(jnp.sum(e, axis=-1, keepdims=True), approx=False)

    # cols [0:action_dim) = actor probs, col action_dim = critic value,
    # remaining cols are exact zeros (zero-padded weight/bias), so this is a
    # single unmasked 128-lane-wide store.
    o_ref[...] = jnp.concatenate([probs, z[:, action_dim:]], axis=-1)


# ----------------------------------------------------------------------------
# Pallas-call wrappers
# ----------------------------------------------------------------------------

def pallas_conv_gemm(patches, w, b, fuse_bn=False):
    m = patches.shape[0]
    nout = w.shape[1]
    return pl.pallas_call(
        functools.partial(_conv_gemm_kernel, fuse_bn=fuse_bn, bn_eps=1e-5),
        out_shape=jax.ShapeDtypeStruct((m, nout), jnp.bfloat16),
        in_specs=[_vmem_spec()] * 3,
        out_specs=_vmem_spec(),
    )(patches, w, b)


def pallas_mlp_heads(feat, params, action_dim):
    b = feat.shape[0]
    return pl.pallas_call(
        functools.partial(_mlp_heads_kernel, ln_eps=1e-5, action_dim=action_dim),
        out_shape=jax.ShapeDtypeStruct((b, HEAD_SLAB), jnp.float32),
        in_specs=[_vmem_spec()] * 9,
        out_specs=_vmem_spec(),
    )(feat, params["fc1_w"], params["fc1_b"], params["fc2_w"], params["fc2_b"],
      params["head1_w"], params["head1_b"], params["head2_w"], params["head2_b"])


# ----------------------------------------------------------------------------
# im2col glue (NHWC, last axis ordered (kh, kw, cin) to match the weights)
# ----------------------------------------------------------------------------

def im2col_nhwc(x, stride, k=3, padding=1):
    n, h, w, c = x.shape
    xp = jnp.pad(x, ((0, 0), (padding, padding), (padding, padding), (0, 0)))
    ho = (h + 2 * padding - k) // stride + 1
    wo = (w + 2 * padding - k) // stride + 1
    cols = [xp[:, ki:ki + stride * ho:stride, kj:kj + stride * wo:stride, :]
            for ki in range(k) for kj in range(k)]
    patches = jnp.concatenate(cols, axis=-1)            # (N, Ho, Wo, k*k*C)
    return patches.reshape(n * ho * wo, k * k * c), (n, ho, wo)


# ----------------------------------------------------------------------------
# Parameters (deterministic; shapes taken from the module __init__)
# ----------------------------------------------------------------------------

def init_params(key, state_h, state_w, action_dim):
    assert action_dim + 1 <= HEAD_SLAB
    h1, w1 = (state_h + 1) // 2, (state_w + 1) // 2     # conv1, stride 2
    h2, w2 = (h1 + 1) // 2, (w1 + 1) // 2               # conv2, stride 2
    to_linear = 32 * h2 * w2                            # conv3/conv4 keep H, W

    keys = jax.random.split(key, 20)

    def rnd(k, shape, fan_in):
        return jax.random.normal(k, shape, jnp.float32) * (1.0 / jnp.sqrt(fan_in))

    def conv_w(k, cout, cin):
        # PyTorch layout (Cout, Cin, kh, kw) -> im2col GEMM layout
        # (kh*kw*Cin, Cout); matches patches whose last axis is (ki, kj, cin).
        w = rnd(k, (cout, cin, 3, 3), cin * 9)
        return (jnp.transpose(w, (2, 3, 1, 0))
                .reshape(9 * cin, cout).astype(jnp.bfloat16))

    def bias(k, n, fan_in):
        return rnd(k, (1, n), fan_in)                   # f32 broadcast row

    p = {
        "conv1_w": conv_w(keys[0], 32, 1),  "conv1_b": bias(keys[1], 32, 9),
        "conv2_w": conv_w(keys[2], 64, 32), "conv2_b": bias(keys[3], 64, 32 * 9),
        "conv3_w": conv_w(keys[4], 64, 64), "conv3_b": bias(keys[5], 64, 64 * 9),
        "conv4_w": conv_w(keys[6], 32, 64), "conv4_b": bias(keys[7], 32, 64 * 9),
    }

    # fc1: generated with rows in PyTorch's NCHW flatten order (c, h, w), then
    # permuted ONCE here to our NHWC flatten order (h, w, c) so the runtime
    # never transposes activations.
    fc1_nchw_rows = rnd(keys[8], (to_linear, 512), to_linear)
    c_idx = jnp.arange(32)
    h_idx = jnp.arange(h2)
    w_idx = jnp.arange(w2)
    perm = (c_idx[None, None, :] * (h2 * w2)
            + h_idx[:, None, None] * w2
            + w_idx[None, :, None]).reshape(-1)         # nhwc row -> nchw row
    p["fc1_w"] = fc1_nchw_rows[perm].astype(jnp.bfloat16)
    p["fc1_b"] = bias(keys[9], 512, to_linear)

    p["fc2_w"] = rnd(keys[10], (512, 256), 512).astype(jnp.bfloat16)
    p["fc2_b"] = bias(keys[11], 256, 512)

    # First head layer: actor1 and critic1 concatenated -> one full-width
    # (256, 256) MXU GEMM.
    actor1_w = rnd(keys[12], (256, 128), 256)
    actor1_b = rnd(keys[13], (128,), 256)
    critic1_w = rnd(keys[16], (256, 128), 256)
    critic1_b = rnd(keys[17], (128,), 256)
    p["head1_w"] = jnp.concatenate([actor1_w, critic1_w], axis=1).astype(jnp.bfloat16)
    p["head1_b"] = jnp.concatenate([actor1_b, critic1_b])[None, :]

    # Second head layer: actor2 (128->action_dim) and critic2 (128->1) packed
    # block-diagonally into one zero-padded (256, HEAD_SLAB) GEMM so the final
    # store is a lane-dense 128-wide slab.
    actor2_w = rnd(keys[14], (128, action_dim), 128)
    actor2_b = rnd(keys[15], (action_dim,), 128)
    critic2_w = rnd(keys[18], (128, 1), 128)
    critic2_b = rnd(keys[19], (1,), 128)
    head2_w = jnp.zeros((256, HEAD_SLAB), jnp.float32)
    head2_w = head2_w.at[:128, :action_dim].set(actor2_w)
    head2_w = head2_w.at[128:, action_dim].set(critic2_w[:, 0])
    head2_b = jnp.zeros((1, HEAD_SLAB), jnp.float32)
    head2_b = head2_b.at[0, :action_dim].set(actor2_b)
    head2_b = head2_b.at[0, action_dim].set(critic2_b[0])
    p["head2_w"] = head2_w.astype(jnp.bfloat16)
    p["head2_b"] = head2_b

    return p, to_linear


# ----------------------------------------------------------------------------
# Forward pass (mirrors ActorCriticNetwork.forward)
# ----------------------------------------------------------------------------

def actor_critic_forward(params, x_nchw, action_dim, mode="both"):
    n, cin, h, w = x_nchw.shape
    # Cin == 1, so NCHW -> NHWC is a pure reshape (no relayout/transpose).
    x = x_nchw.reshape(n, h, w, cin).astype(jnp.bfloat16)

    # conv_layers (+ BatchNorm fused into conv4's epilogue)
    for idx, stride in ((1, 2), (2, 2), (3, 1), (4, 1)):
        patches, (nb, ho, wo) = im2col_nhwc(x, stride=stride)
        y2d = pallas_conv_gemm(patches, params[f"conv{idx}_w"],
                               params[f"conv{idx}_b"], fuse_bn=(idx == 4))
        x = y2d.reshape(nb, ho, wo, y2d.shape[-1])

    # shared_fc + actor_head + critic_head fused into one kernel.
    feat = x.reshape(n, -1)          # NHWC flatten; fc1_w rows permuted to match
    slab = pallas_mlp_heads(feat, params, action_dim)   # (B, 128) f32

    probs = slab[:, :action_dim]
    value = slab[:, action_dim:action_dim + 1]
    if mode == "actor":
        return probs
    if mode == "critic":
        return value
    return probs, value


# ----------------------------------------------------------------------------
# Driver
# ----------------------------------------------------------------------------

if __name__ == "__main__":
    BATCH, STATE_H, STATE_W, ACTION_DIM = 2, 16, 16, 4

    key = jax.random.PRNGKey(0)
    pkey, xkey = jax.random.split(key)
    params, to_linear = init_params(pkey, STATE_H, STATE_W, ACTION_DIM)
    assert to_linear == 512  # 32 * 4 * 4 for a 16x16 input

    x = jax.random.normal(xkey, (BATCH, 1, STATE_H, STATE_W), jnp.float32)  # NCHW

    fwd = jax.jit(functools.partial(actor_critic_forward,
                                    action_dim=ACTION_DIM, mode="both"))
    probs, value = fwd(params, x)
    jax.block_until_ready((probs, value))

    assert probs.shape == (BATCH, ACTION_DIM)
    assert value.shape == (BATCH, 1)
    assert jnp.allclose(jnp.sum(probs, axis=-1), 1.0, atol=1e-5)

    print("KERNEL_OK")
</pallas_src>

<mosaic_0001>
module attributes {stable_mosaic.version = 11 : i64} {
  func.func @_conv_gemm_kernel(%arg0: memref<128x9xbf16, #tpu.memory_space<vmem>>, %arg1: memref<9x32xbf16, #tpu.memory_space<vmem>>, %arg2: memref<1x32xf32, #tpu.memory_space<vmem>>, %arg3: memref<128x32xbf16, #tpu.memory_space<vmem>>) attributes {dimension_semantics = [], scalar_prefetch = 0 : i64, scratch_operands = 0 : i64, tpu.core_type = #tpu.core_type<tc>} {
    %c0 = arith.constant 0 : index
    %c0_0 = arith.constant 0 : index
    %0 = vector.load %arg0[%c0, %c0_0] : memref<128x9xbf16, #tpu.memory_space<vmem>>, vector<128x9xbf16>
    %c0_1 = arith.constant 0 : index
    %c0_2 = arith.constant 0 : index
    %1 = vector.load %arg1[%c0_1, %c0_2] : memref<9x32xbf16, #tpu.memory_space<vmem>>, vector<9x32xbf16>
    %cst = arith.constant dense<0.000000e+00> : vector<128x32xf32>
    %2 = tpu.matmul %0, %1, %cst {dimension_numbers = #tpu.dot_dimension_numbers<[1], [0], [0], [1], [0, 0, 1, 1], [], []>} : vector<128x9xbf16>, vector<9x32xbf16>, vector<128x32xf32> -> vector<128x32xf32>
    %c0_3 = arith.constant 0 : index
    %c0_4 = arith.constant 0 : index
    %3 = vector.load %arg2[%c0_3, %c0_4] : memref<1x32xf32, #tpu.memory_space<vmem>>, vector<1x32xf32>
    %4 = vector.broadcast %3 : vector<1x32xf32> to vector<128x32xf32>
    %5 = arith.addf %2, %4 : vector<128x32xf32>
    %cst_5 = arith.constant 0.000000e+00 : f32
    %6 = vector.broadcast %cst_5 : f32 to vector<128x32xf32>
    %7 = arith.maximumf %5, %6 : vector<128x32xf32>
    %8 = arith.truncf %7 : vector<128x32xf32> to vector<128x32xbf16>
    %c0_6 = arith.constant 0 : index
    %c0_7 = arith.constant 0 : index
    %9 = vector.load %arg3[%c0_6, %c0_7] : memref<128x32xbf16, #tpu.memory_space<vmem>>, vector<128x32xbf16>
    tpu.vector_store %arg3[%c0_6, %c0_7], %8 {strides = array<i32>} : memref<128x32xbf16, #tpu.memory_space<vmem>>, vector<128x32xbf16>,
    return
  }
}

module attributes {stable_mosaic.version = 11 : i64} {
  func.func @_conv_gemm_kernel(%arg0: memref<32x288xbf16, #tpu.memory_space<vmem>>, %arg1: memref<288x64xbf16, #tpu.memory_space<vmem>>, %arg2: memref<1x64xf32, #tpu.memory_space<vmem>>, %arg3: memref<32x64xbf16, #tpu.memory_space<vmem>>) attributes {dimension_semantics = [], scalar_prefetch = 0 : i64, scratch_operands = 0 : i64, tpu.core_type = #tpu.core_type<tc>} {
    %c0 = arith.constant 0 : index
    %c0_0 = arith.constant 0 : index
    %0 = vector.load %arg0[%c0, %c0_0] : memref<32x288xbf16, #tpu.memory_space<vmem>>, vector<32x288xbf16>
    %c0_1 = arith.constant 0 : index
    %c0_2 = arith.constant 0 : index
    %1 = vector.load %arg1[%c0_1, %c0_2] : memref<288x64xbf16, #tpu.memory_space<vmem>>, vector<288x64xbf16>
    %cst = arith.constant dense<0.000000e+00> : vector<32x64xf32>
    %2 = tpu.matmul %0, %1, %cst {dimension_numbers = #tpu.dot_dimension_numbers<[1], [0], [0], [1], [0, 0, 1, 1], [], []>} : vector<32x288xbf16>, vector<288x64xbf16>, vector<32x64xf32> -> vector<32x64xf32>
    %c0_3 = arith.constant 0 : index
    %c0_4 = arith.constant 0 : index
    %3 = vector.load %arg2[%c0_3, %c0_4] : memref<1x64xf32, #tpu.memory_space<vmem>>, vector<1x64xf32>
    %4 = vector.broadcast %3 : vector<1x64xf32> to vector<32x64xf32>
    %5 = arith.addf %2, %4 : vector<32x64xf32>
    %cst_5 = arith.constant 0.000000e+00 : f32
    %6 = vector.broadcast %cst_5 : f32 to vector<32x64xf32>
    %7 = arith.maximumf %5, %6 : vector<32x64xf32>
    %8 = arith.truncf %7 : vector<32x64xf32> to vector<32x64xbf16>
    %c0_6 = arith.constant 0 : index
    %c0_7 = arith.constant 0 : index
    %9 = vector.load %arg3[%c0_6, %c0_7] : memref<32x64xbf16, #tpu.memory_space<vmem>>, vector<32x64xbf16>
    tpu.vector_store %arg3[%c0_6, %c0_7], %8 {strides = array<i32>} : memref<32x64xbf16, #tpu.memory_space<vmem>>, vector<32x64xbf16>,
    return
  }
}

module attributes {stable_mosaic.version = 11 : i64} {
  func.func @_conv_gemm_kernel(%arg0: memref<32x576xbf16, #tpu.memory_space<vmem>>, %arg1: memref<576x32xbf16, #tpu.memory_space<vmem>>, %arg2: memref<1x32xf32, #tpu.memory_space<vmem>>, %arg3: memref<32x32xbf16, #tpu.memory_space<vmem>>) attributes {dimension_semantics = [], scalar_prefetch = 0 : i64, scratch_operands = 0 : i64, tpu.core_type = #tpu.core_type<tc>} {
    %c0 = arith.constant 0 : index
    %c0_0 = arith.constant 0 : index
    %0 = vector.load %arg0[%c0, %c0_0] : memref<32x576xbf16, #tpu.memory_space<vmem>>, vector<32x576xbf16>
    %c0_1 = arith.constant 0 : index
    %c0_2 = arith.constant 0 : index
    %1 = vector.load %arg1[%c0_1, %c0_2] : memref<576x32xbf16, #tpu.memory_space<vmem>>, vector<576x32xbf16>
    %cst = arith.constant dense<0.000000e+00> : vector<32x32xf32>
    %2 = tpu.matmul %0, %1, %cst {dimension_numbers = #tpu.dot_dimension_numbers<[1], [0], [0], [1], [0, 0, 1, 1], [], []>} : vector<32x576xbf16>, vector<576x32xbf16>, vector<32x32xf32> -> vector<32x32xf32>
    %c0_3 = arith.constant 0 : index
    %c0_4 = arith.constant 0 : index
    %3 = vector.load %arg2[%c0_3, %c0_4] : memref<1x32xf32, #tpu.memory_space<vmem>>, vector<1x32xf32>
    %4 = vector.broadcast %3 : vector<1x32xf32> to vector<32x32xf32>
    %5 = arith.addf %2, %4 : vector<32x32xf32>
    %cst_5 = arith.constant 0.000000e+00 : f32
    %6 = vector.broadcast %cst_5 : f32 to vector<32x32xf32>
    %7 = arith.maximumf %5, %6 : vector<32x32xf32>
    %cst_6 = arith.constant dense<0.000000e+00> : vector<32xf32>
    %8 = vector.multi_reduction <add>, %7, %cst_6 [0] : vector<32x32xf32> to vector<32xf32>
    %9 = vector.shape_cast %8 : vector<32xf32> to vector<1x32xf32>
    %cst_7 = arith.constant 3.200000e+01 : f32
    %10 = vector.broadcast %cst_7 : f32 to vector<1x32xf32>
    %11 = arith.divf %9, %10 : vector<1x32xf32>
    %12 = vector.broadcast %11 : vector<1x32xf32> to vector<32x32xf32>
    %13 = arith.subf %7, %12 : vector<32x32xf32>
    %14 = arith.mulf %13, %13 : vector<32x32xf32>
    %cst_8 = arith.constant dense<0.000000e+00> : vector<32xf32>
    %15 = vector.multi_reduction <add>, %14, %cst_8 [0] : vector<32x32xf32> to vector<32xf32>
    %16 = vector.shape_cast %15 : vector<32xf32> to vector<1x32xf32>
    %cst_9 = arith.constant 3.200000e+01 : f32
    %17 = vector.broadcast %cst_9 : f32 to vector<1x32xf32>
    %18 = arith.divf %16, %17 : vector<1x32xf32>
    %19 = vector.broadcast %11 : vector<1x32xf32> to vector<32x32xf32>
    %20 = arith.subf %7, %19 : vector<32x32xf32>
    %cst_10 = arith.constant 9.99999974E-6 : f32
    %21 = vector.broadcast %cst_10 : f32 to vector<1x32xf32>
    %22 = arith.addf %18, %21 : vector<1x32xf32>
    %23 = math.rsqrt %22 : vector<1x32xf32>
    %24 = vector.broadcast %23 : vector<1x32xf32> to vector<32x32xf32>
    %25 = arith.mulf %20, %24 : vector<32x32xf32>
    %26 = arith.truncf %25 : vector<32x32xf32> to vector<32x32xbf16>
    %c0_11 = arith.constant 0 : index
    %c0_12 = arith.constant 0 : index
    %27 = vector.load %arg3[%c0_11, %c0_12] : memref<32x32xbf16, #tpu.memory_space<vmem>>, vector<32x32xbf16>
    tpu.vector_store %arg3[%c0_11, %c0_12], %26 {strides = array<i32>} : memref<32x32xbf16, #tpu.memory_space<vmem>>, vector<32x32xbf16>,
    return
  }
}

module attributes {stable_mosaic.version = 11 : i64} {
  func.func @_conv_gemm_kernel(%arg0: memref<32x576xbf16, #tpu.memory_space<vmem>>, %arg1: memref<576x64xbf16, #tpu.memory_space<vmem>>, %arg2: memref<1x64xf32, #tpu.memory_space<vmem>>, %arg3: memref<32x64xbf16, #tpu.memory_space<vmem>>) attributes {dimension_semantics = [], scalar_prefetch = 0 : i64, scratch_operands = 0 : i64, tpu.core_type = #tpu.core_type<tc>} {
    %c0 = arith.constant 0 : index
    %c0_0 = arith.constant 0 : index
    %0 = vector.load %arg0[%c0, %c0_0] : memref<32x576xbf16, #tpu.memory_space<vmem>>, vector<32x576xbf16>
    %c0_1 = arith.constant 0 : index
    %c0_2 = arith.constant 0 : index
    %1 = vector.load %arg1[%c0_1, %c0_2] : memref<576x64xbf16, #tpu.memory_space<vmem>>, vector<576x64xbf16>
    %cst = arith.constant dense<0.000000e+00> : vector<32x64xf32>
    %2 = tpu.matmul %0, %1, %cst {dimension_numbers = #tpu.dot_dimension_numbers<[1], [0], [0], [1], [0, 0, 1, 1], [], []>} : vector<32x576xbf16>, vector<576x64xbf16>, vector<32x64xf32> -> vector<32x64xf32>
    %c0_3 = arith.constant 0 : index
    %c0_4 = arith.constant 0 : index
    %3 = vector.load %arg2[%c0_3, %c0_4] : memref<1x64xf32, #tpu.memory_space<vmem>>, vector<1x64xf32>
    %4 = vector.broadcast %3 : vector<1x64xf32> to vector<32x64xf32>
    %5 = arith.addf %2, %4 : vector<32x64xf32>
    %cst_5 = arith.constant 0.000000e+00 : f32
    %6 = vector.broadcast %cst_5 : f32 to vector<32x64xf32>
    %7 = arith.maximumf %5, %6 : vector<32x64xf32>
    %8 = arith.truncf %7 : vector<32x64xf32> to vector<32x64xbf16>
    %c0_6 = arith.constant 0 : index
    %c0_7 = arith.constant 0 : index
    %9 = vector.load %arg3[%c0_6, %c0_7] : memref<32x64xbf16, #tpu.memory_space<vmem>>, vector<32x64xbf16>
    tpu.vector_store %arg3[%c0_6, %c0_7], %8 {strides = array<i32>} : memref<32x64xbf16, #tpu.memory_space<vmem>>, vector<32x64xbf16>,
    return
  }
}

module attributes {stable_mosaic.version = 11 : i64} {
  func.func @_mlp_heads_kernel(%arg0: memref<2x512xbf16, #tpu.memory_space<vmem>>, %arg1: memref<512x512xbf16, #tpu.memory_space<vmem>>, %arg2: memref<1x512xf32, #tpu.memory_space<vmem>>, %arg3: memref<512x256xbf16, #tpu.memory_space<vmem>>, %arg4: memref<1x256xf32, #tpu.memory_space<vmem>>, %arg5: memref<256x256xbf16, #tpu.memory_space<vmem>>, %arg6: memref<1x256xf32, #tpu.memory_space<vmem>>, %arg7: memref<256x128xbf16, #tpu.memory_space<vmem>>, %arg8: memref<1x128xf32, #tpu.memory_space<vmem>>, %arg9: memref<2x128xf32, #tpu.memory_space<vmem>>) attributes {dimension_semantics = [], scalar_prefetch = 0 : i64, scratch_operands = 0 : i64, tpu.core_type = #tpu.core_type<tc>} {
    %c0 = arith.constant 0 : index
    %c0_0 = arith.constant 0 : index
    %0 = vector.load %arg0[%c0, %c0_0] : memref<2x512xbf16, #tpu.memory_space<vmem>>, vector<2x512xbf16>
    %c0_1 = arith.constant 0 : index
    %c0_2 = arith.constant 0 : index
    %1 = vector.load %arg1[%c0_1, %c0_2] : memref<512x512xbf16, #tpu.memory_space<vmem>>, vector<512x512xbf16>
    %cst = arith.constant dense<0.000000e+00> : vector<2x512xf32>
    %2 = tpu.matmul %0, %1, %cst {dimension_numbers = #tpu.dot_dimension_numbers<[1], [0], [0], [1], [0, 0, 1, 1], [], []>} : vector<2x512xbf16>, vector<512x512xbf16>, vector<2x512xf32> -> vector<2x512xf32>
    %c0_3 = arith.constant 0 : index
    %c0_4 = arith.constant 0 : index
    %3 = vector.load %arg2[%c0_3, %c0_4] : memref<1x512xf32, #tpu.memory_space<vmem>>, vector<1x512xf32>
    %4 = vector.broadcast %3 : vector<1x512xf32> to vector<2x512xf32>
    %5 = arith.addf %2, %4 : vector<2x512xf32>
    %cst_5 = arith.constant 0.000000e+00 : f32
    %6 = vector.broadcast %cst_5 : f32 to vector<2x512xf32>
    %7 = arith.maximumf %5, %6 : vector<2x512xf32>
    %cst_6 = arith.constant dense<0.000000e+00> : vector<2xf32>
    %8 = vector.multi_reduction <add>, %7, %cst_6 [1] : vector<2x512xf32> to vector<2xf32>
    %9 = vector.shape_cast %8 : vector<2xf32> to vector<2x1xf32>
    %cst_7 = arith.constant 5.120000e+02 : f32
    %10 = vector.broadcast %cst_7 : f32 to vector<2x1xf32>
    %11 = arith.divf %9, %10 : vector<2x1xf32>
    %12 = vector.broadcast %11 : vector<2x1xf32> to vector<2x512xf32>
    %13 = arith.subf %7, %12 : vector<2x512xf32>
    %14 = arith.mulf %13, %13 : vector<2x512xf32>
    %cst_8 = arith.constant dense<0.000000e+00> : vector<2xf32>
    %15 = vector.multi_reduction <add>, %14, %cst_8 [1] : vector<2x512xf32> to vector<2xf32>
    %16 = vector.shape_cast %15 : vector<2xf32> to vector<2x1xf32>
    %cst_9 = arith.constant 5.120000e+02 : f32
    %17 = vector.broadcast %cst_9 : f32 to vector<2x1xf32>
    %18 = arith.divf %16, %17 : vector<2x1xf32>
    %19 = vector.broadcast %11 : vector<2x1xf32> to vector<2x512xf32>
    %20 = arith.subf %7, %19 : vector<2x512xf32>
    %cst_10 = arith.constant 9.99999974E-6 : f32
    %21 = vector.broadcast %cst_10 : f32 to vector<2x1xf32>
    %22 = arith.addf %18, %21 : vector<2x1xf32>
    %23 = math.rsqrt %22 : vector<2x1xf32>
    %24 = vector.broadcast %23 : vector<2x1xf32> to vector<2x512xf32>
    %25 = arith.mulf %20, %24 : vector<2x512xf32>
    %26 = arith.truncf %25 : vector<2x512xf32> to vector<2x512xbf16>
    %c0_11 = arith.constant 0 : index
    %c0_12 = arith.constant 0 : index
    %27 = vector.load %arg3[%c0_11, %c0_12] : memref<512x256xbf16, #tpu.memory_space<vmem>>, vector<512x256xbf16>
    %cst_13 = arith.constant dense<0.000000e+00> : vector<2x256xf32>
    %28 = tpu.matmul %26, %27, %cst_13 {dimension_numbers = #tpu.dot_dimension_numbers<[1], [0], [0], [1], [0, 0, 1, 1], [], []>} : vector<2x512xbf16>, vector<512x256xbf16>, vector<2x256xf32> -> vector<2x256xf32>
    %c0_14 = arith.constant 0 : index
    %c0_15 = arith.constant 0 : index
    %29 = vector.load %arg4[%c0_14, %c0_15] : memref<1x256xf32, #tpu.memory_space<vmem>>, vector<1x256xf32>
    %30 = vector.broadcast %29 : vector<1x256xf32> to vector<2x256xf32>
    %31 = arith.addf %28, %30 : vector<2x256xf32>
    %cst_16 = arith.constant 0.000000e+00 : f32
    %32 = vector.broadcast %cst_16 : f32 to vector<2x256xf32>
    %33 = arith.maximumf %31, %32 : vector<2x256xf32>
    %cst_17 = arith.constant dense<0.000000e+00> : vector<2xf32>
    %34 = vector.multi_reduction <add>, %33, %cst_17 [1] : vector<2x256xf32> to vector<2xf32>
    %35 = vector.shape_cast %34 : vector<2xf32> to vector<2x1xf32>
    %cst_18 = arith.constant 2.560000e+02 : f32
    %36 = vector.broadcast %cst_18 : f32 to vector<2x1xf32>
    %37 = arith.divf %35, %36 : vector<2x1xf32>
    %38 = vector.broadcast %37 : vector<2x1xf32> to vector<2x256xf32>
    %39 = arith.subf %33, %38 : vector<2x256xf32>
    %40 = arith.mulf %39, %39 : vector<2x256xf32>
    %cst_19 = arith.constant dense<0.000000e+00> : vector<2xf32>
    %41 = vector.multi_reduction <add>, %40, %cst_19 [1] : vector<2x256xf32> to vector<2xf32>
    %42 = vector.shape_cast %41 : vector<2xf32> to vector<2x1xf32>
    %cst_20 = arith.constant 2.560000e+02 : f32
    %43 = vector.broadcast %cst_20 : f32 to vector<2x1xf32>
    %44 = arith.divf %42, %43 : vector<2x1xf32>
    %45 = vector.broadcast %37 : vector<2x1xf32> to vector<2x256xf32>
    %46 = arith.subf %33, %45 : vector<2x256xf32>
    %cst_21 = arith.constant 9.99999974E-6 : f32
    %47 = vector.broadcast %cst_21 : f32 to vector<2x1xf32>
    %48 = arith.addf %44, %47 : vector<2x1xf32>
    %49 = math.rsqrt %48 : vector<2x1xf32>
    %50 = vector.broadcast %49 : vector<2x1xf32> to vector<2x256xf32>
    %51 = arith.mulf %46, %50 : vector<2x256xf32>
    %52 = arith.truncf %51 : vector<2x256xf32> to vector<2x256xbf16>
    %c0_22 = arith.constant 0 : index
    %c0_23 = arith.constant 0 : index
    %53 = vector.load %arg5[%c0_22, %c0_23] : memref<256x256xbf16, #tpu.memory_space<vmem>>, vector<256x256xbf16>
    %cst_24 = arith.constant dense<0.000000e+00> : vector<2x256xf32>
    %54 = tpu.matmul %52, %53, %cst_24 {dimension_numbers = #tpu.dot_dimension_numbers<[1], [0], [0], [1], [0, 0, 1, 1], [], []>} : vector<2x256xbf16>, vector<256x256xbf16>, vector<2x256xf32> -> vector<2x256xf32>
    %c0_25 = arith.constant 0 : index
    %c0_26 = arith.constant 0 : index
    %55 = vector.load %arg6[%c0_25, %c0_26] : memref<1x256xf32, #tpu.memory_space<vmem>>, vector<1x256xf32>
    %56 = vector.broadcast %55 : vector<1x256xf32> to vector<2x256xf32>
    %57 = arith.addf %54, %56 : vector<2x256xf32>
    %cst_27 = arith.constant 0.000000e+00 : f32
    %58 = vector.broadcast %cst_27 : f32 to vector<2x256xf32>
    %59 = arith.maximumf %57, %58 : vector<2x256xf32>
    %60 = arith.truncf %59 : vector<2x256xf32> to vector<2x256xbf16>
    %c0_28 = arith.constant 0 : index
    %c0_29 = arith.constant 0 : index
    %61 = vector.load %arg7[%c0_28, %c0_29] : memref<256x128xbf16, #tpu.memory_space<vmem>>, vector<256x128xbf16>
    %cst_30 = arith.constant dense<0.000000e+00> : vector<2x128xf32>
    %62 = tpu.matmul %60, %61, %cst_30 {dimension_numbers = #tpu.dot_dimension_numbers<[1], [0], [0], [1], [0, 0, 1, 1], [], []>} : vector<2x256xbf16>, vector<256x128xbf16>, vector<2x128xf32> -> vector<2x128xf32>
    %c0_31 = arith.constant 0 : index
    %c0_32 = arith.constant 0 : index
    %63 = vector.load %arg8[%c0_31, %c0_32] : memref<1x128xf32, #tpu.memory_space<vmem>>, vector<1x128xf32>
    %64 = vector.broadcast %63 : vector<1x128xf32> to vector<2x128xf32>
    %65 = arith.addf %62, %64 : vector<2x128xf32>
    %66 = vector.extract_strided_slice %65 {offsets = [0, 0], sizes = [2, 4], strides = [1, 1]} : vector<2x128xf32> to vector<2x4xf32>
    %cst_33 = arith.constant dense<0xFF800000> : vector<2xf32>
    %67 = vector.multi_reduction <maximumf>, %66, %cst_33 [1] : vector<2x4xf32> to vector<2xf32>
    %68 = vector.shape_cast %67 : vector<2xf32> to vector<2x1xf32>
    %69 = vector.broadcast %68 : vector<2x1xf32> to vector<2x4xf32>
    %70 = arith.subf %66, %69 : vector<2x4xf32>
    %71 = math.exp %70 : vector<2x4xf32>
    %cst_34 = arith.constant dense<0.000000e+00> : vector<2xf32>
    %72 = vector.multi_reduction <add>, %71, %cst_34 [1] : vector<2x4xf32> to vector<2xf32>
    %73 = vector.shape_cast %72 : vector<2xf32> to vector<2x1xf32>
    %74 = tpu.reciprocal %73 : vector<2x1xf32> -> vector<2x1xf32>
    %75 = vector.broadcast %74 : vector<2x1xf32> to vector<2x4xf32>
    %76 = arith.mulf %71, %75 : vector<2x4xf32>
    %77 = vector.extract_strided_slice %65 {offsets = [0, 4], sizes = [2, 124], strides = [1, 1]} : vector<2x128xf32> to vector<2x124xf32>
    %78 = tpu.concatenate %76, %77 in 1 : vector<2x4xf32>, vector<2x124xf32> -> vector<2x128xf32>
    %c0_35 = arith.constant 0 : index
    %c0_36 = arith.constant 0 : index
    %79 = vector.load %arg9[%c0_35, %c0_36] : memref<2x128xf32, #tpu.memory_space<vmem>>, vector<2x128xf32>
    tpu.vector_store %arg9[%c0_35, %c0_36], %78 {strides = array<i32>} : memref<2x128xf32, #tpu.memory_space<vmem>>, vector<2x128xf32>,
    return
  }
}

</mosaic_0001>

<bundles_post_ra>
// kernel: actor_critic_forward.5
= control target key start
LH: loop header
LB: loop body
LE: loop exit
PB: predicated region body
PF: predicated region fallthrough
CT: control target
= control target key end

     0   :  { %vm107_vm0 = vcmask 1043456   ;;  %vm108_vm1 = vcmask 1044480   ;;  %v274_v2 = vmov 65535   ;;  %vm82_vm2 = vcmask 72704   ;;  %s418_s1 = inlined_call_operand.vmem [shape: bf16[9,32], index: 1, kind: input, shape index: {}]   ;;  %s419_s0 = inlined_call_operand.vmem [shape: bf16[128,9], index: 0, kind: input, shape index: {}]   ;;  %s420_s2 = inlined_call_operand.vmem [shape: f32[1,32], index: 2, kind: input, shape index: {}]   ;;  %s421_s3 = inlined_call_operand.vmem [shape: bf16[128,32], index: 3, kind: output, shape index: {}]  }
   0x1   :  { %v250_v0 = vld [vmem:[%s418_s1] sm:$0xf]  ;;  %v268_v1 = vld [vmem:[%s418_s1] sm:$0x10]  ;;  %v109_v3 = vsel %vm107_vm0, 4294967295, %v274_v2  ;;  %v262_v8 = vld [vmem:[%s419_s0 + $0x10] sm:$0xff] }
   0x2   :  { %v251_v4 = vor.u32 %v268_v1, %v250_v0  ;;  %v110_v5 = vsel %vm108_vm1, %v109_v3, 0  ;;  %v260_v7 = vld [vmem:[%s419_s0] sm:$0xff]  ;;  %v266_v10 = vld [vmem:[%s419_s0 + $0x30] sm:$0xff]  ;;  %v261_v11 = vld [vmem:[%s419_s0 + $0x8] sm:$0xff]  ;;  %vm195_vm3 = vcmask 257024  }
   0x3   :  { %v264_v9 = vld [vmem:[%s419_s0 + $0x20] sm:$0xff]  ;;  %v263_v12 = vld [vmem:[%s419_s0 + $0x18] sm:$0xff]  ;;  %v265_v13 = vld [vmem:[%s419_s0 + $0x28] sm:$0xff] }
   0x4   :  { %v112_v6 = vand.u32 %v251_v4, %v110_v5  ;;  %v267_v14 = vld [vmem:[%s419_s0 + $0x38] sm:$0xff]  ;;  %v336_v15 = vld [vmem:[%s420_s2] ss:$0 sm:$0xff] }
   0x6   :  { %121 = vmatpush.bf16.msra.mxu0 %v112_v6  ;;  %269 = vmatpush.bf16.msra.mxu1 %v112_v6 }
   0x7   :  { %270 = vmatpush.bf16.msra.mxu2 %v112_v6  ;;  %271 = vmatpush.bf16.msra.mxu3 %v112_v6 }
   0x9   :  { %252 = vmatmul.msk.bf16.vlgmr.msra.gmra.mxu0 %vm82_vm2, %v260_v7  ;;  %254 = vmatmul.msk.bf16.vlgmr.msra.gmra.mxu1 %vm82_vm2, %v262_v8 }
   0xa   :  { %256 = vmatmul.msk.bf16.vlgmr.msra.gmra.mxu2 %vm82_vm2, %v264_v9  ;;  %258 = vmatmul.msk.bf16.vlgmr.msra.gmra.mxu3 %vm82_vm2, %v266_v10 }
  0x19   :  { %253 = vmatmul.msk.bf16.gmra.mxu0 %vm82_vm2, %v261_v11  ;;  %255 = vmatmul.msk.bf16.gmra.mxu1 %vm82_vm2, %v263_v12 }
  0x1a   :  { %257 = vmatmul.msk.bf16.gmra.mxu2 %vm82_vm2, %v265_v13  ;;  %259 = vmatmul.msk.bf16.gmra.mxu3 %vm82_vm2, %v267_v14 }
  0x86   :  { %v123_v16 = vpop.f32.mrf.mxu0  ;;  %v133_v17 = vpop.f32.mrf.mxu1 }
  0x87   :  { %v124_v18 = vadd.f32 %v336_v15, %v123_v16  ;;  %v134_v19 = vadd.f32 %v336_v15, %v133_v17 }
  0x89   :  { %v163_v20 = vmax.f32 %v124_v18, 0.0  ;;  %v167_v21 = vmax.f32 %v134_v19, 0.0 }
  0x8b   :  { %v179_v22 = vpack.c.bf16 %v163_v20, %v163_v20  ;;  %v183_v23 = vpack.c.bf16 %v167_v21, %v167_v21 }
  0x8d   :  { %196 = vst.msk [vmem:[%s421_s3] sm:$0xf] %vm195_vm3, %v179_v22  ;;  %v143_v24 = vpop.f32.mrf.mxu2  ;;  %v153_v25 = vpop.f32.mrf.mxu3 }
  0x8e   :  { %200 = vst.msk [vmem:[%s421_s3 + $0x10] sm:$0xf] %vm195_vm3, %v183_v23  ;;  %v144_v26 = vadd.f32 %v336_v15, %v143_v24  ;;  %v154_v27 = vadd.f32 %v336_v15, %v153_v25  ;;  %v125_v28 = vpop.f32.mrf.mxu0  ;;  %v135_v29 = vpop.f32.mrf.mxu1 }
  0x8f   :  { %v126_v30 = vadd.f32 %v336_v15, %v125_v28  ;;  %v136_v31 = vadd.f32 %v336_v15, %v135_v29 }
  0x90   :  { %v171_v32 = vmax.f32 %v144_v26, 0.0  ;;  %v175_v33 = vmax.f32 %v154_v27, 0.0 }
  0x91   :  { %v164_v34 = vmax.f32 %v126_v30, 0.0  ;;  %v168_v35 = vmax.f32 %v136_v31, 0.0 }
  0x92   :  { %v187_v36 = vpack.c.bf16 %v171_v32, %v171_v32  ;;  %v191_v37 = vpack.c.bf16 %v175_v33, %v175_v33 }
  0x93   :  { %v180_v38 = vpack.c.bf16 %v164_v34, %v164_v34  ;;  %v184_v39 = vpack.c.bf16 %v168_v35, %v168_v35 }
  0x94   :  { %204 = vst.msk [vmem:[%s421_s3 + $0x20] sm:$0xf] %vm195_vm3, %v187_v36 }
  0x95   :  { %208 = vst.msk [vmem:[%s421_s3 + $0x30] sm:$0xf] %vm195_vm3, %v191_v37  ;;  %v145_v40 = vpop.f32.mrf.mxu2  ;;  %v155_v41 = vpop.f32.mrf.mxu3 }
  0x96   :  { %197 = vst.msk [vmem:[%s421_s3 + $0x4] sm:$0xf] %vm195_vm3, %v180_v38  ;;  %v146_v42 = vadd.f32 %v336_v15, %v145_v40  ;;  %v156_v43 = vadd.f32 %v336_v15, %v155_v41  ;;  %v128_v44 = vpop.f32.mrf.mxu0  ;;  %v138_v45 = vpop.f32.mrf.mxu1 }
  0x97   :  { %201 = vst.msk [vmem:[%s421_s3 + $0x14] sm:$0xf] %vm195_vm3, %v184_v39  ;;  %v129_v46 = vadd.f32 %v336_v15, %v128_v44  ;;  %v139_v47 = vadd.f32 %v336_v15, %v138_v45 }
  0x98   :  { %v172_v48 = vmax.f32 %v146_v42, 0.0  ;;  %v176_v49 = vmax.f32 %v156_v43, 0.0 }
  0x99   :  { %v165_v50 = vmax.f32 %v129_v46, 0.0  ;;  %v169_v51 = vmax.f32 %v139_v47, 0.0 }
  0x9a   :  { %v188_v52 = vpack.c.bf16 %v172_v48, %v172_v48  ;;  %v192_v53 = vpack.c.bf16 %v176_v49, %v176_v49 }
  0x9b   :  { %v181_v54 = vpack.c.bf16 %v165_v50, %v165_v50  ;;  %v185_v55 = vpack.c.bf16 %v169_v51, %v169_v51 }
  0x9c   :  { %205 = vst.msk [vmem:[%s421_s3 + $0x24] sm:$0xf] %vm195_vm3, %v188_v52 }
  0x9d   :  { %209 = vst.msk [vmem:[%s421_s3 + $0x34] sm:$0xf] %vm195_vm3, %v192_v53  ;;  %v148_v56 = vpop.f32.mrf.mxu2  ;;  %v158_v57 = vpop.f32.mrf.mxu3 }
  0x9e   :  { %198 = vst.msk [vmem:[%s421_s3 + $0x8] sm:$0xf] %vm195_vm3, %v181_v54  ;;  %v149_v58 = vadd.f32 %v336_v15, %v148_v56  ;;  %v159_v59 = vadd.f32 %v336_v15, %v158_v57  ;;  %v130_v60 = vpop.f32.mrf.mxu0  ;;  %v140_v61 = vpop.f32.mrf.mxu1 }
  0x9f   :  { %202 = vst.msk [vmem:[%s421_s3 + $0x18] sm:$0xf] %vm195_vm3, %v185_v55  ;;  %v131_v62 = vadd.f32 %v336_v15, %v130_v60  ;;  %v141_v63 = vadd.f32 %v336_v15, %v140_v61 }
  0xa0   :  { %v173_v0 = vmax.f32 %v149_v58, 0.0  ;;  %v177_v1 = vmax.f32 %v159_v59, 0.0 }
  0xa1   :  { %v166_v2 = vmax.f32 %v131_v62, 0.0  ;;  %v170_v3 = vmax.f32 %v141_v63, 0.0 }
  0xa2   :  { %v189_v4 = vpack.c.bf16 %v173_v0, %v173_v0  ;;  %v193_v5 = vpack.c.bf16 %v177_v1, %v177_v1 }
  0xa3   :  { %v182_v6 = vpack.c.bf16 %v166_v2, %v166_v2  ;;  %v186_v7 = vpack.c.bf16 %v170_v3, %v170_v3 }
  0xa4   :  { %206 = vst.msk [vmem:[%s421_s3 + $0x28] sm:$0xf] %vm195_vm3, %v189_v4 }
  0xa5   :  { %210 = vst.msk [vmem:[%s421_s3 + $0x38] sm:$0xf] %vm195_vm3, %v193_v5  ;;  %v150_v8 = vpop.f32.mrf.mxu2  ;;  %v160_v9 = vpop.f32.mrf.mxu3 }
  0xa6   :  { %199 = vst.msk [vmem:[%s421_s3 + $0xc] sm:$0xf] %vm195_vm3, %v182_v6  ;;  %v151_v10 = vadd.f32 %v336_v15, %v150_v8  ;;  %v161_v11 = vadd.f32 %v336_v15, %v160_v9 }
  0xa7   :  { %203 = vst.msk [vmem:[%s421_s3 + $0x1c] sm:$0xf] %vm195_vm3, %v186_v7 }
  0xa8   :  { %v174_v12 = vmax.f32 %v151_v10, 0.0  ;;  %v178_v13 = vmax.f32 %v161_v11, 0.0 }
  0xaa   :  { %v190_v14 = vpack.c.bf16 %v174_v12, %v174_v12  ;;  %v194_v16 = vpack.c.bf16 %v178_v13, %v178_v13 }
  0xac   :  { %207 = vst.msk [vmem:[%s421_s3 + $0x2c] sm:$0xf] %vm195_vm3, %v190_v14 }
  0xad   :  { %211 = vst.msk [vmem:[%s421_s3 + $0x3c] sm:$0xf] %vm195_vm3, %v194_v16 }

// kernel: actor_critic_forward.6
= control target key start
LH: loop header
LB: loop body
LE: loop exit
PB: predicated region body
PF: predicated region fallthrough
CT: control target
= control target key end

     0   :  { %vm201_vm0 = vcmask 261120   ;;  %vm273_vm1 = vcmask 519168   ;;  %s544_s1 = inlined_call_operand.vmem [shape: bf16[288,64], index: 1, kind: input, shape index: {}]   ;;  %s545_s0 = inlined_call_operand.vmem [shape: bf16[32,288], index: 0, kind: input, shape index: {}]   ;;  %s546_s2 = inlined_call_operand.vmem [shape: f32[1,64], index: 2, kind: input, shape index: {}]   ;;  %s547_s3 = inlined_call_operand.vmem [shape: bf16[32,64], index: 3, kind: output, shape index: {}]  }
   0x1   :  { %v393_v0 = vld [vmem:[%s544_s1 + $0x38] sm:$0xff]  ;;  %v392_v2 = vld [vmem:[%s544_s1 + $0x30] sm:$0xff]  ;;  %v403_v3 = vld [vmem:[%s544_s1 + $0x88] sm:$0xff] }
   0x2   :  { %v401_v1 = vld [vmem:[%s544_s1 + $0x78] sm:$0xff]  ;;  %208 = vmatpush.bf16.msra.mxu0 %v393_v0  ;;  %404 = vmatpush.bf16.msra.mxu3 %v393_v0  ;;  %v400_v4 = vld [vmem:[%s544_s1 + $0x70] sm:$0xff]  ;;  %v402_v5 = vld [vmem:[%s544_s1 + $0x80] sm:$0xff] }
   0x3   :  { %227 = vmatpush.bf16.msra.mxu1 %v401_v1  ;;  %252 = vmatpush.bf16.msra.mxu2 %v403_v3  ;;  %v292_v6 = vld [vmem:[%s545_s0 + $0x8] sm:$0xf]  ;;  %v382_v7 = vld [vmem:[%s545_s0 + $0x10] sm:$0xf0]  ;;  %v390_v11 = vld [vmem:[%s544_s1 + $0x20] sm:$0xff] }
   0x4   :  { %v391_v8 = vld [vmem:[%s544_s1 + $0x28] sm:$0xff]  ;;  %v293_v10 = vor.u32 %v382_v7, %v292_v6  ;;  %v398_v12 = vld [vmem:[%s544_s1 + $0x60] sm:$0xff]  ;;  %v389_v13 = vld [vmem:[%s544_s1 + $0x18] sm:$0xff] }
   0x5   :  { %v399_v9 = vld [vmem:[%s544_s1 + $0x68] sm:$0xff]  ;;  %v397_v14 = vld [vmem:[%s544_s1 + $0x58] sm:$0xff]  ;;  %v388_v15 = vld [vmem:[%s544_s1 + $0x10] sm:$0xff] }
   0x6   :  { %209 = vmatpush.bf16.msra.mxu0 %v392_v2  ;;  %405 = vmatpush.bf16.msra.mxu3 %v392_v2  ;;  %v396_v16 = vld [vmem:[%s544_s1 + $0x50] sm:$0xff]  ;;  %v304_v17 = vld [vmem:[%s545_s0 + $0x20] sm:$0xf]  ;;  %v385_v18 = vld [vmem:[%s545_s0 + $0x28] sm:$0xf0] }
   0x7   :  { %228 = vmatpush.bf16.msra.mxu1 %v400_v4  ;;  %253 = vmatpush.bf16.msra.mxu2 %v402_v5  ;;  %v387_v19 = vld [vmem:[%s544_s1 + $0x8] sm:$0xff]  ;;  %v305_v21 = vor.u32 %v385_v18, %v304_v17  ;;  %v386_v22 = vld [vmem:[%s544_s1] sm:$0xff]  ;;  %v296_v25 = vld [vmem:[%s545_s0 + $0x18] sm:$0xf] }
   0x8   :  { %v395_v20 = vld [vmem:[%s544_s1 + $0x48] sm:$0xff]  ;;  %v284_v23 = vld [vmem:[%s545_s0] sm:$0xf]  ;;  %v384_v26 = vld [vmem:[%s545_s0 + $0x20] sm:$0xf0] }
   0x9   :  { %v381_v24 = vld [vmem:[%s545_s0 + $0x8] sm:$0xf0]  ;;  %v394_v27 = vld [vmem:[%s544_s1 + $0x40] sm:$0xff]  ;;  %v286_v29 = vld [vmem:[%s545_s0 + $0xc] sm:$0xf0]  ;;  %v297_v31 = vor.u32 %v384_v26, %v296_v25 }
   0xa   :  { %210 = vmatpush.bf16.msra.mxu0 %v391_v8  ;;  %406 = vmatpush.bf16.msra.mxu3 %v391_v8  ;;  %v380_v28 = vld [vmem:[%s545_s0 + $0x4] sm:$0xf]  ;;  %v285_v30 = vor.u32 %v381_v24, %v284_v23  ;;  %v383_v33 = vld [vmem:[%s545_s0 + $0x1c] sm:$0xf]  ;;  %v298_v34 = vld [vmem:[%s545_s0 + $0x24] sm:$0xf0] }
   0xb   :  { %229 = vmatpush.bf16.msra.mxu1 %v399_v9  ;;  %378 = vmatmul.msk.bf16.vlgmr.msra.gmra.mxu2 %vm201_vm0, %v293_v10  ;;  %v289_v32 = vor.u32 %v380_v28, %v286_v29  ;;  %v301_v35 = vor.u32 %v383_v33, %v298_v34  ;;  %v412_v37 = vld [vmem:[%s546_s2] ss:$0 sm:$0xff] }
   0xe   :  { %211 = vmatpush.bf16.msra.mxu0 %v390_v11  ;;  %407 = vmatpush.bf16.msra.mxu3 %v390_v11 }
   0xf   :  { %230 = vmatpush.bf16.msra.mxu1 %v398_v12 }
  0x12   :  { %212 = vmatpush.bf16.msra.mxu0 %v389_v13  ;;  %408 = vmatpush.bf16.msra.mxu3 %v389_v13 }
  0x13   :  { %231 = vmatpush.bf16.msra.mxu1 %v397_v14 }
  0x16   :  { %213 = vmatpush.bf16.msra.mxu0 %v388_v15  ;;  %409 = vmatpush.bf16.msra.mxu3 %v388_v15 }
  0x17   :  { %232 = vmatpush.bf16.msra.mxu1 %v396_v16 }
  0x1a   :  { %214 = vmatpush.bf16.msra.mxu0 %v387_v19  ;;  %410 = vmatpush.bf16.msra.mxu3 %v387_v19 }
  0x1b   :  { %233 = vmatpush.bf16.msra.mxu1 %v395_v20  ;;  %379 = vmatmul.msk.bf16.gmra.mxu2 %vm201_vm0, %v305_v21 }
  0x1e   :  { %215 = vmatpush.bf16.msra.mxu0 %v386_v22  ;;  %411 = vmatpush.bf16.msra.mxu3 %v386_v22 }
  0x1f   :  { %234 = vmatpush.bf16.msra.mxu1 %v394_v27 }
  0x21   :  { %216 = vmatmul.bf16.vlgmr.msra.gmra.mxu0 %v285_v30  ;;  %221 = vmatmul.bf16.vlgmr.msra.gmra.mxu3 %v297_v31 }
  0x22   :  { %235 = vmatmul.bf16.vlgmr.msra.gmra.mxu1 %v289_v32 }
  0x32   :  { %240 = vmatmul.bf16.gmra.mxu1 %v301_v35 }
  0x8e   :  { %v255_v36 = vpop.f32.mrf.mxu2 }
  0x96   :  { %v257_v44 = vpop.f32.mrf.mxu2 }
  0x9e   :  { %v217_v38 = vpop.f32.mrf.mxu0  ;;  %v260_v55 = vpop.f32.mrf.mxu2 }
  0x9f   :  { %v218_v39 = vadd.f32 %v412_v37, %v217_v38  ;;  %v236_v40 = vpop.f32.mrf.mxu1 }
  0xa1   :  { %v237_v41 = vadd.f32 %v236_v40, %v218_v39 }
  0xa3   :  { %v256_v42 = vadd.f32 %v255_v36, %v237_v41 }
  0xa4   :  { %v222_v49 = vpop.f32.mrf.mxu3 }
  0xa5   :  { %v265_v43 = vmax.f32 %v256_v42, 0.0  ;;  %v223_v52 = vadd.f32 %v412_v37, %v222_v49 }
  0xa6   :  { %v219_v45 = vpop.f32.mrf.mxu0  ;;  %v262_v1 = vpop.f32.mrf.mxu2 }
  0xa7   :  { %v269_v46 = vpack.c.bf16 %v265_v43, %v265_v43  ;;  %v220_v47 = vadd.f32 %v412_v37, %v219_v45  ;;  %v238_v48 = vpop.f32.mrf.mxu1 }
  0xa9   :  { %274 = vst.msk [vmem:[%s547_s3] sm:$0xf] %vm273_vm1, %v269_v46  ;;  %v239_v50 = vadd.f32 %v238_v48, %v220_v47 }
  0xab   :  { %v258_v51 = vadd.f32 %v257_v44, %v239_v50 }
  0xac   :  { %v224_v59 = vpop.f32.mrf.mxu3 }
  0xad   :  { %v266_v53 = vmax.f32 %v258_v51, 0.0  ;;  %v225_v61 = vadd.f32 %v412_v37, %v224_v59 }
  0xaf   :  { %v270_v54 = vpack.c.bf16 %v266_v53, %v266_v53  ;;  %v241_v56 = vpop.f32.mrf.mxu1 }
  0xb0   :  { %v242_v57 = vadd.f32 %v241_v56, %v223_v52 }
  0xb1   :  { %275 = vst.msk [vmem:[%s547_s3 + $0x4] sm:$0xf] %vm273_vm1, %v270_v54 }
  0xb2   :  { %v261_v58 = vadd.f32 %v260_v55, %v242_v57 }
  0xb4   :  { %v267_v60 = vmax.f32 %v261_v58, 0.0 }
  0xb6   :  { %v271_v62 = vpack.c.bf16 %v267_v60, %v267_v60 }
  0xb7   :  { %v243_v63 = vpop.f32.mrf.mxu1 }
  0xb8   :  { %276 = vst.msk [vmem:[%s547_s3 + $0x8] sm:$0xf] %vm273_vm1, %v271_v62  ;;  %v244_v0 = vadd.f32 %v243_v63, %v225_v61 }
  0xba   :  { %v263_v2 = vadd.f32 %v262_v1, %v244_v0 }
  0xbc   :  { %v268_v3 = vmax.f32 %v263_v2, 0.0 }
  0xbe   :  { %v272_v4 = vpack.c.bf16 %v268_v3, %v268_v3 }
  0xc0   :  { %277 = vst.msk [vmem:[%s547_s3 + $0xc] sm:$0xf] %vm273_vm1, %v272_v4 }

// kernel: actor_critic_forward.7
= control target key start
LH: loop header
LB: loop body
LE: loop exit
PB: predicated region body
PF: predicated region fallthrough
CT: control target
= control target key end

     0   :  { %vm369_vm0 = vcmask 523264   ;;  %vm479_vm1 = vcmask 519168   ;;  %s932_s1 = inlined_call_operand.vmem [shape: bf16[576,64], index: 1, kind: input, shape index: {}]   ;;  %s933_s2 = inlined_call_operand.vmem [shape: f32[1,64], index: 2, kind: input, shape index: {}]   ;;  %s934_s0 = inlined_call_operand.vmem [shape: bf16[32,576], index: 0, kind: input, shape index: {}]   ;;  %s935_s3 = inlined_call_operand.vmem [shape: bf16[32,64], index: 3, kind: output, shape index: {}]  }
   0x1   :  { %v691_v0 = vld [vmem:[%s932_s1 + $0x38] sm:$0xff]  ;;  %v690_v4 = vld [vmem:[%s932_s1 + $0x30] sm:$0xff]  ;;  %v689_v8 = vld [vmem:[%s932_s1 + $0x28] sm:$0xff] }
   0x2   :  { %v699_v1 = vld [vmem:[%s932_s1 + $0x78] sm:$0xff]  ;;  %376 = vmatpush.bf16.msra.mxu0 %v691_v0  ;;  %v698_v5 = vld [vmem:[%s932_s1 + $0x70] sm:$0xff]  ;;  %v697_v9 = vld [vmem:[%s932_s1 + $0x68] sm:$0xff] }
   0x3   :  { %v707_v2 = vld [vmem:[%s932_s1 + $0xb8] sm:$0xff]  ;;  %395 = vmatpush.bf16.msra.mxu1 %v699_v1  ;;  %v706_v6 = vld [vmem:[%s932_s1 + $0xb0] sm:$0xff]  ;;  %v705_v10 = vld [vmem:[%s932_s1 + $0xa8] sm:$0xff] }
   0x4   :  { %v715_v3 = vld [vmem:[%s932_s1 + $0xf8] sm:$0xff]  ;;  %414 = vmatpush.bf16.msra.mxu2 %v707_v2  ;;  %v714_v7 = vld [vmem:[%s932_s1 + $0xf0] sm:$0xff]  ;;  %v713_v11 = vld [vmem:[%s932_s1 + $0xe8] sm:$0xff] }
   0x5   :  { %433 = vmatpush.bf16.msra.mxu3 %v715_v3  ;;  %v688_v12 = vld [vmem:[%s932_s1 + $0x20] sm:$0xff]  ;;  %v687_v16 = vld [vmem:[%s932_s1 + $0x18] sm:$0xff]  ;;  %v686_v20 = vld [vmem:[%s932_s1 + $0x10] sm:$0xff] }
   0x6   :  { %377 = vmatpush.bf16.msra.mxu0 %v690_v4  ;;  %v696_v13 = vld [vmem:[%s932_s1 + $0x60] sm:$0xff]  ;;  %v695_v17 = vld [vmem:[%s932_s1 + $0x58] sm:$0xff]  ;;  %v694_v21 = vld [vmem:[%s932_s1 + $0x50] sm:$0xff] }
   0x7   :  { %396 = vmatpush.bf16.msra.mxu1 %v698_v5  ;;  %v704_v14 = vld [vmem:[%s932_s1 + $0xa0] sm:$0xff]  ;;  %v703_v18 = vld [vmem:[%s932_s1 + $0x98] sm:$0xff]  ;;  %v702_v22 = vld [vmem:[%s932_s1 + $0x90] sm:$0xff] }
   0x8   :  { %415 = vmatpush.bf16.msra.mxu2 %v706_v6  ;;  %v712_v15 = vld [vmem:[%s932_s1 + $0xe0] sm:$0xff]  ;;  %v711_v19 = vld [vmem:[%s932_s1 + $0xd8] sm:$0xff]  ;;  %v710_v23 = vld [vmem:[%s932_s1 + $0xd0] sm:$0xff] }
   0x9   :  { %434 = vmatpush.bf16.msra.mxu3 %v714_v7  ;;  %v685_v24 = vld [vmem:[%s932_s1 + $0x8] sm:$0xff]  ;;  %v684_v28 = vld [vmem:[%s932_s1] sm:$0xff]  ;;  %v676_v33 = vld [vmem:[%s934_s0 + $0x10] sm:$0xf0] }
   0xa   :  { %378 = vmatpush.bf16.msra.mxu0 %v689_v8  ;;  %v693_v25 = vld [vmem:[%s932_s1 + $0x48] sm:$0xff]  ;;  %v692_v29 = vld [vmem:[%s932_s1 + $0x40] sm:$0xff]  ;;  %v492_v35 = vld [vmem:[%s934_s0 + $0x14] sm:$0xf0] }
   0xb   :  { %397 = vmatpush.bf16.msra.mxu1 %v697_v9  ;;  %v701_v26 = vld [vmem:[%s932_s1 + $0x88] sm:$0xff]  ;;  %v700_v30 = vld [vmem:[%s932_s1 + $0x80] sm:$0xff]  ;;  %v677_v37 = vld [vmem:[%s934_s0 + $0x18] sm:$0xf0] }
   0xc   :  { %416 = vmatpush.bf16.msra.mxu2 %v705_v10  ;;  %v709_v27 = vld [vmem:[%s932_s1 + $0xc8] sm:$0xff]  ;;  %v708_v31 = vld [vmem:[%s932_s1 + $0xc0] sm:$0xff]  ;;  %v719_v40 = vld [vmem:[%s932_s1 + $0x118] sm:$0xff] }
   0xd   :  { %435 = vmatpush.bf16.msra.mxu3 %v713_v11  ;;  %v490_v32 = vld [vmem:[%s934_s0] sm:$0xf]  ;;  %v674_v34 = vld [vmem:[%s934_s0 + $0x4] sm:$0xf]  ;;  %v498_v36 = vld [vmem:[%s934_s0 + $0x8] sm:$0xf] }
   0xe   :  { %379 = vmatpush.bf16.msra.mxu0 %v688_v12  ;;  %v675_v38 = vld [vmem:[%s934_s0 + $0xc] sm:$0xf]  ;;  %v500_v39 = vld [vmem:[%s934_s0 + $0x1c] sm:$0xf0]  ;;  %v491_v41 = vor.u32 %v676_v33, %v490_v32  ;;  %v495_v42 = vor.u32 %v674_v34, %v492_v35  ;;  %v499_v43 = vor.u32 %v677_v37, %v498_v36  ;;  %v718_v45 = vld [vmem:[%s932_s1 + $0x110] sm:$0xff] }
   0xf   :  { %398 = vmatpush.bf16.msra.mxu1 %v696_v13  ;;  %v503_v44 = vor.u32 %v675_v38, %v500_v39  ;;  %v717_v46 = vld [vmem:[%s932_s1 + $0x108] sm:$0xff]  ;;  %v716_v47 = vld [vmem:[%s932_s1 + $0x100] sm:$0xff]  ;;  %v681_v49 = vld [vmem:[%s934_s0 + $0x38] sm:$0xf0] }
  0x10   :  { %417 = vmatpush.bf16.msra.mxu2 %v704_v14  ;;  %v510_v48 = vld [vmem:[%s934_s0 + $0x28] sm:$0xf]  ;;  %v679_v50 = vld [vmem:[%s934_s0 + $0x2c] sm:$0xf]  ;;  %v512_v51 = vld [vmem:[%s934_s0 + $0x3c] sm:$0xf0] }
  0x11   :  { %436 = vmatpush.bf16.msra.mxu3 %v712_v15  ;;  %v518_v52 = vld [vmem:[%s934_s0 + $0x30] sm:$0xf]  ;;  %v682_v53 = vld [vmem:[%s934_s0 + $0x40] sm:$0xf0]  ;;  %v680_v54 = vld [vmem:[%s934_s0 + $0x34] sm:$0xf]  ;;  %v511_v56 = vor.u32 %v681_v49, %v510_v48  ;;  %v515_v57 = vor.u32 %v679_v50, %v512_v51 }
  0x12   :  { %380 = vmatpush.bf16.msra.mxu0 %v687_v16  ;;  %v520_v55 = vld [vmem:[%s934_s0 + $0x44] sm:$0xf0]  ;;  %v519_v58 = vor.u32 %v682_v53, %v518_v52  ;;  %v506_v60 = vld [vmem:[%s934_s0 + $0x10] sm:$0xf]  ;;  %v678_v61 = vld [vmem:[%s934_s0 + $0x20] sm:$0xf0] }
  0x13   :  { %399 = vmatpush.bf16.msra.mxu1 %v695_v17  ;;  %v523_v59 = vor.u32 %v680_v54, %v520_v55  ;;  %v526_v62 = vld [vmem:[%s934_s0 + $0x38] sm:$0xf]  ;;  %v683_v63 = vld [vmem:[%s934_s0 + $0x48] sm:$0xf0]  ;;  %v507_v0 = vor.u32 %v678_v61, %v506_v60  ;;  %v724_v11 = vld [vmem:[%s933_s2] ss:$0 sm:$0xff] }
  0x14   :  { %418 = vmatpush.bf16.msra.mxu2 %v703_v18  ;;  %v527_v1 = vor.u32 %v683_v63, %v526_v62 }
  0x15   :  { %437 = vmatpush.bf16.msra.mxu3 %v711_v19 }
  0x16   :  { %381 = vmatpush.bf16.msra.mxu0 %v686_v20 }
  0x17   :  { %400 = vmatpush.bf16.msra.mxu1 %v694_v21 }
  0x18   :  { %419 = vmatpush.bf16.msra.mxu2 %v702_v22 }
  0x19   :  { %438 = vmatpush.bf16.msra.mxu3 %v710_v23 }
  0x1a   :  { %382 = vmatpush.bf16.msra.mxu0 %v685_v24 }
  0x1b   :  { %401 = vmatpush.bf16.msra.mxu1 %v693_v25 }
  0x1c   :  { %420 = vmatpush.bf16.msra.mxu2 %v701_v26 }
  0x1d   :  { %439 = vmatpush.bf16.msra.mxu3 %v709_v27 }
  0x1e   :  { %383 = vmatpush.bf16.msra.mxu0 %v684_v28 }
  0x1f   :  { %402 = vmatpush.bf16.msra.mxu1 %v692_v29 }
  0x20   :  { %421 = vmatpush.bf16.msra.mxu2 %v700_v30 }
  0x21   :  { %440 = vmatpush.bf16.msra.mxu3 %v708_v31  ;;  %384 = vmatmul.bf16.vlgmr.msra.gmra.mxu0 %v491_v41 }
  0x22   :  { %456 = vmatpush.bf16.msrb.mxu0 %v719_v40  ;;  %403 = vmatmul.bf16.vlgmr.msra.gmra.mxu1 %v495_v42 }
  0x23   :  { %720 = vmatpush.bf16.msrb.mxu1 %v719_v40  ;;  %422 = vmatmul.bf16.vlgmr.msra.gmra.mxu2 %v499_v43 }
  0x24   :  { %441 = vmatmul.bf16.vlgmr.msra.gmra.mxu3 %v503_v44 }
  0x26   :  { %457 = vmatpush.bf16.msrb.mxu0 %v718_v45 }
  0x27   :  { %721 = vmatpush.bf16.msrb.mxu1 %v718_v45 }
  0x2a   :  { %458 = vmatpush.bf16.msrb.mxu0 %v717_v46 }
  0x2b   :  { %722 = vmatpush.bf16.msrb.mxu1 %v717_v46 }
  0x2e   :  { %459 = vmatpush.bf16.msrb.mxu0 %v716_v47 }
  0x2f   :  { %723 = vmatpush.bf16.msrb.mxu1 %v716_v47 }
  0x31   :  { %389 = vmatmul.bf16.gmra.mxu0 %v511_v56 }
  0x32   :  { %408 = vmatmul.bf16.gmra.mxu1 %v515_v57 }
  0x33   :  { %427 = vmatmul.bf16.gmra.mxu2 %v519_v58 }
  0x34   :  { %446 = vmatmul.bf16.gmra.mxu3 %v523_v59 }
  0x41   :  { %672 = vmatmul.msk.bf16.vlgmr.msrb.gmra.mxu0 %vm369_vm0, %v507_v0 }
  0x42   :  { %673 = vmatmul.msk.bf16.vlgmr.msrb.gmra.mxu1 %vm369_vm0, %v527_v1 }
  0x9e   :  { %v385_v2 = vpop.f32.mrf.mxu0 }
  0x9f   :  { %v404_v3 = vpop.f32.mrf.mxu1  ;;  %v386_v13 = vadd.f32 %v724_v11, %v385_v2 }
  0xa1   :  { %v405_v18 = vadd.f32 %v404_v3, %v386_v13 }
  0xa6   :  { %v423_v4 = vpop.f32.mrf.mxu2  ;;  %v387_v6 = vpop.f32.mrf.mxu0 }
  0xa7   :  { %v442_v5 = vpop.f32.mrf.mxu3  ;;  %v406_v7 = vpop.f32.mrf.mxu1  ;;  %v424_v20 = vadd.f32 %v423_v4, %v405_v18  ;;  %v388_v23 = vadd.f32 %v724_v11, %v387_v6 }
  0xa9   :  { %v443_v25 = vadd.f32 %v442_v5, %v424_v20  ;;  %v407_v30 = vadd.f32 %v406_v7, %v388_v23 }
  0xae   :  { %v425_v8 = vpop.f32.mrf.mxu2  ;;  %v390_v9 = vpop.f32.mrf.mxu0 }
  0xaf   :  { %v409_v10 = vpop.f32.mrf.mxu1  ;;  %v444_v12 = vpop.f32.mrf.mxu3  ;;  %v391_v14 = vadd.f32 %v724_v11, %v390_v9  ;;  %v426_v34 = vadd.f32 %v425_v8, %v407_v30 }
  0xb1   :  { %v410_v19 = vadd.f32 %v409_v10, %v391_v14  ;;  %v445_v41 = vadd.f32 %v444_v12, %v426_v34 }
  0xb6   :  { %v428_v15 = vpop.f32.mrf.mxu2  ;;  %v392_v16 = vpop.f32.mrf.mxu0 }
  0xb7   :  { %v411_v17 = vpop.f32.mrf.mxu1  ;;  %v429_v21 = vadd.f32 %v428_v15, %v410_v19  ;;  %v447_v22 = vpop.f32.mrf.mxu3  ;;  %v393_v24 = vadd.f32 %v724_v11, %v392_v16 }
  0xb9   :  { %v448_v26 = vadd.f32 %v447_v22, %v429_v21  ;;  %v412_v31 = vadd.f32 %v411_v17, %v393_v24 }
  0xbe   :  { %v430_v27 = vpop.f32.mrf.mxu2  ;;  %v461_v28 = vpop.f32.mrf.mxu0 }
  0xbf   :  { %v466_v29 = vpop.f32.mrf.mxu1  ;;  %v462_v32 = vadd.f32 %v461_v28, %v443_v25  ;;  %v431_v35 = vadd.f32 %v430_v27, %v412_v31  ;;  %v449_v40 = vpop.f32.mrf.mxu3 }
  0xc0   :  { %v467_v33 = vadd.f32 %v466_v29, %v448_v26 }
  0xc1   :  { %v471_v36 = vmax.f32 %v462_v32, 0.0  ;;  %v450_v42 = vadd.f32 %v449_v40, %v431_v35 }
  0xc2   :  { %v473_v37 = vmax.f32 %v467_v33, 0.0 }
  0xc3   :  { %v475_v38 = vpack.c.bf16 %v471_v36, %v471_v36 }
  0xc4   :  { %v477_v39 = vpack.c.bf16 %v473_v37, %v473_v37 }
  0xc5   :  { %480 = vst.msk [vmem:[%s935_s3] sm:$0xf] %vm479_vm1, %v475_v38 }
  0xc6   :  { %482 = vst.msk [vmem:[%s935_s3 + $0x8] sm:$0xf] %vm479_vm1, %v477_v39  ;;  %v463_v43 = vpop.f32.mrf.mxu0 }
  0xc7   :  { %v468_v44 = vpop.f32.mrf.mxu1  ;;  %v464_v45 = vadd.f32 %v463_v43, %v445_v41 }
  0xc8   :  { %v469_v46 = vadd.f32 %v468_v44, %v450_v42 }
  0xc9   :  { %v472_v47 = vmax.f32 %v464_v45, 0.0 }
  0xca   :  { %v474_v48 = vmax.f32 %v469_v46, 0.0 }
  0xcb   :  { %v476_v49 = vpack.c.bf16 %v472_v47, %v472_v47 }
  0xcc   :  { %v478_v50 = vpack.c.bf16 %v474_v48, %v474_v48 }
  0xcd   :  { %481 = vst.msk [vmem:[%s935_s3 + $0x4] sm:$0xf] %vm479_vm1, %v476_v49 }
  0xce   :  { %483 = vst.msk [vmem:[%s935_s3 + $0xc] sm:$0xf] %vm479_vm1, %v478_v50 }

// kernel: actor_critic_forward.8
= control target key start
LH: loop header
LB: loop body
LE: loop exit
PB: predicated region body
PF: predicated region fallthrough
CT: control target
= control target key end

     0   :  { %vm369_vm0 = vcmask 523264   ;;  %vm475_vm1 = vcmask 261120   ;;  %vm538_vm6 = vcmask 257024   ;;  %s1001_s1 = inlined_call_operand.vmem [shape: bf16[576,32], index: 1, kind: input, shape index: {}]   ;;  %s1002_s2 = inlined_call_operand.vmem [shape: f32[1,32], index: 2, kind: input, shape index: {}]   ;;  %s1003_s0 = inlined_call_operand.vmem [shape: bf16[32,576], index: 0, kind: input, shape index: {}]   ;;  %s1004_s3 = inlined_call_operand.vmem [shape: bf16[32,32], index: 3, kind: output, shape index: {}]  }
   0x1   :  { %v750_v0 = vld [vmem:[%s1001_s1 + $0x38] sm:$0xff]  ;;  %v749_v4 = vld [vmem:[%s1001_s1 + $0x30] sm:$0xff]  ;;  %v748_v8 = vld [vmem:[%s1001_s1 + $0x28] sm:$0xff] }
   0x2   :  { %v758_v1 = vld [vmem:[%s1001_s1 + $0x78] sm:$0xff]  ;;  %376 = vmatpush.bf16.msra.mxu0 %v750_v0  ;;  %v757_v5 = vld [vmem:[%s1001_s1 + $0x70] sm:$0xff]  ;;  %v756_v9 = vld [vmem:[%s1001_s1 + $0x68] sm:$0xff] }
   0x3   :  { %v766_v2 = vld [vmem:[%s1001_s1 + $0xb8] sm:$0xff]  ;;  %395 = vmatpush.bf16.msra.mxu1 %v758_v1  ;;  %v765_v6 = vld [vmem:[%s1001_s1 + $0xb0] sm:$0xff]  ;;  %v764_v10 = vld [vmem:[%s1001_s1 + $0xa8] sm:$0xff] }
   0x4   :  { %v774_v3 = vld [vmem:[%s1001_s1 + $0xf8] sm:$0xff]  ;;  %414 = vmatpush.bf16.msra.mxu2 %v766_v2  ;;  %v773_v7 = vld [vmem:[%s1001_s1 + $0xf0] sm:$0xff]  ;;  %v772_v11 = vld [vmem:[%s1001_s1 + $0xe8] sm:$0xff] }
   0x5   :  { %433 = vmatpush.bf16.msra.mxu3 %v774_v3  ;;  %v747_v12 = vld [vmem:[%s1001_s1 + $0x20] sm:$0xff]  ;;  %v746_v16 = vld [vmem:[%s1001_s1 + $0x18] sm:$0xff]  ;;  %v745_v20 = vld [vmem:[%s1001_s1 + $0x10] sm:$0xff] }
   0x6   :  { %377 = vmatpush.bf16.msra.mxu0 %v749_v4  ;;  %v755_v13 = vld [vmem:[%s1001_s1 + $0x60] sm:$0xff]  ;;  %v754_v17 = vld [vmem:[%s1001_s1 + $0x58] sm:$0xff]  ;;  %v753_v21 = vld [vmem:[%s1001_s1 + $0x50] sm:$0xff] }
   0x7   :  { %396 = vmatpush.bf16.msra.mxu1 %v757_v5  ;;  %v763_v14 = vld [vmem:[%s1001_s1 + $0xa0] sm:$0xff]  ;;  %v762_v18 = vld [vmem:[%s1001_s1 + $0x98] sm:$0xff]  ;;  %v761_v22 = vld [vmem:[%s1001_s1 + $0x90] sm:$0xff] }
   0x8   :  { %415 = vmatpush.bf16.msra.mxu2 %v765_v6  ;;  %v771_v15 = vld [vmem:[%s1001_s1 + $0xe0] sm:$0xff]  ;;  %v770_v19 = vld [vmem:[%s1001_s1 + $0xd8] sm:$0xff]  ;;  %v769_v23 = vld [vmem:[%s1001_s1 + $0xd0] sm:$0xff] }
   0x9   :  { %434 = vmatpush.bf16.msra.mxu3 %v773_v7  ;;  %v744_v24 = vld [vmem:[%s1001_s1 + $0x8] sm:$0xff]  ;;  %v743_v28 = vld [vmem:[%s1001_s1] sm:$0xff]  ;;  %v735_v33 = vld [vmem:[%s1003_s0 + $0x10] sm:$0xf0] }
   0xa   :  { %378 = vmatpush.bf16.msra.mxu0 %v748_v8  ;;  %v752_v25 = vld [vmem:[%s1001_s1 + $0x48] sm:$0xff]  ;;  %v751_v29 = vld [vmem:[%s1001_s1 + $0x40] sm:$0xff]  ;;  %v551_v35 = vld [vmem:[%s1003_s0 + $0x14] sm:$0xf0] }
   0xb   :  { %397 = vmatpush.bf16.msra.mxu1 %v756_v9  ;;  %v760_v26 = vld [vmem:[%s1001_s1 + $0x88] sm:$0xff]  ;;  %v759_v30 = vld [vmem:[%s1001_s1 + $0x80] sm:$0xff]  ;;  %v736_v37 = vld [vmem:[%s1003_s0 + $0x18] sm:$0xf0] }
   0xc   :  { %416 = vmatpush.bf16.msra.mxu2 %v764_v10  ;;  %v768_v27 = vld [vmem:[%s1001_s1 + $0xc8] sm:$0xff]  ;;  %v767_v31 = vld [vmem:[%s1001_s1 + $0xc0] sm:$0xff]  ;;  %v778_v40 = vld [vmem:[%s1001_s1 + $0x118] sm:$0xff] }
   0xd   :  { %435 = vmatpush.bf16.msra.mxu3 %v772_v11  ;;  %v549_v32 = vld [vmem:[%s1003_s0] sm:$0xf]  ;;  %v733_v34 = vld [vmem:[%s1003_s0 + $0x4] sm:$0xf]  ;;  %v557_v36 = vld [vmem:[%s1003_s0 + $0x8] sm:$0xf] }
   0xe   :  { %379 = vmatpush.bf16.msra.mxu0 %v747_v12  ;;  %v734_v38 = vld [vmem:[%s1003_s0 + $0xc] sm:$0xf]  ;;  %v559_v39 = vld [vmem:[%s1003_s0 + $0x1c] sm:$0xf0]  ;;  %v550_v41 = vor.u32 %v735_v33, %v549_v32  ;;  %v554_v42 = vor.u32 %v733_v34, %v551_v35  ;;  %v558_v43 = vor.u32 %v736_v37, %v557_v36  ;;  %v777_v45 = vld [vmem:[%s1001_s1 + $0x110] sm:$0xff]  ;;  %v789_v34 = vmov 32.0  }
   0xf   :  { %398 = vmatpush.bf16.msra.mxu1 %v755_v13  ;;  %v562_v44 = vor.u32 %v734_v38, %v559_v39  ;;  %v776_v46 = vld [vmem:[%s1001_s1 + $0x108] sm:$0xff]  ;;  %v775_v47 = vld [vmem:[%s1001_s1 + $0x100] sm:$0xff]  ;;  %v740_v49 = vld [vmem:[%s1003_s0 + $0x38] sm:$0xf0]  ;;  %785 = vrcp.f32 %v789_v34 }
  0x10   :  { %417 = vmatpush.bf16.msra.mxu2 %v763_v14  ;;  %v569_v48 = vld [vmem:[%s1003_s0 + $0x28] sm:$0xf]  ;;  %v738_v50 = vld [vmem:[%s1003_s0 + $0x2c] sm:$0xf]  ;;  %v571_v51 = vld [vmem:[%s1003_s0 + $0x3c] sm:$0xf0] }
  0x11   :  { %436 = vmatpush.bf16.msra.mxu3 %v771_v15  ;;  %v577_v52 = vld [vmem:[%s1003_s0 + $0x30] sm:$0xf]  ;;  %v741_v53 = vld [vmem:[%s1003_s0 + $0x40] sm:$0xf0]  ;;  %v739_v54 = vld [vmem:[%s1003_s0 + $0x34] sm:$0xf]  ;;  %v570_v56 = vor.u32 %v740_v49, %v569_v48  ;;  %v574_v57 = vor.u32 %v738_v50, %v571_v51 }
  0x12   :  { %380 = vmatpush.bf16.msra.mxu0 %v746_v16  ;;  %v579_v55 = vld [vmem:[%s1003_s0 + $0x44] sm:$0xf0]  ;;  %v578_v58 = vor.u32 %v741_v53, %v577_v52  ;;  %v565_v60 = vld [vmem:[%s1003_s0 + $0x10] sm:$0xf]  ;;  %v737_v61 = vld [vmem:[%s1003_s0 + $0x20] sm:$0xf0] }
  0x13   :  { %399 = vmatpush.bf16.msra.mxu1 %v754_v17  ;;  %v582_v59 = vor.u32 %v739_v54, %v579_v55  ;;  %v585_v62 = vld [vmem:[%s1003_s0 + $0x38] sm:$0xf]  ;;  %v742_v63 = vld [vmem:[%s1003_s0 + $0x48] sm:$0xf0]  ;;  %v566_v0 = vor.u32 %v737_v61, %v565_v60  ;;  %v784_v12 = vld [vmem:[%s1002_s2] ss:$0 sm:$0xff] }
  0x14   :  { %418 = vmatpush.bf16.msra.mxu2 %v762_v18  ;;  %v586_v1 = vor.u32 %v742_v63, %v585_v62 }
  0x15   :  { %437 = vmatpush.bf16.msra.mxu3 %v770_v19 }
  0x16   :  { %381 = vmatpush.bf16.msra.mxu0 %v745_v20 }
  0x17   :  { %400 = vmatpush.bf16.msra.mxu1 %v753_v21 }
  0x18   :  { %419 = vmatpush.bf16.msra.mxu2 %v761_v22 }
  0x19   :  { %438 = vmatpush.bf16.msra.mxu3 %v769_v23 }
  0x1a   :  { %382 = vmatpush.bf16.msra.mxu0 %v744_v24 }
  0x1b   :  { %401 = vmatpush.bf16.msra.mxu1 %v752_v25 }
  0x1c   :  { %420 = vmatpush.bf16.msra.mxu2 %v760_v26 }
  0x1d   :  { %439 = vmatpush.bf16.msra.mxu3 %v768_v27 }
  0x1e   :  { %383 = vmatpush.bf16.msra.mxu0 %v743_v28 }
  0x1f   :  { %402 = vmatpush.bf16.msra.mxu1 %v751_v29 }
  0x20   :  { %421 = vmatpush.bf16.msra.mxu2 %v759_v30 }
  0x21   :  { %440 = vmatpush.bf16.msra.mxu3 %v767_v31  ;;  %384 = vmatmul.bf16.vlgmr.msra.gmra.mxu0 %v550_v41 }
  0x22   :  { %456 = vmatpush.bf16.msrb.mxu0 %v778_v40  ;;  %403 = vmatmul.bf16.vlgmr.msra.gmra.mxu1 %v554_v42 }
  0x23   :  { %779 = vmatpush.bf16.msrb.mxu1 %v778_v40  ;;  %422 = vmatmul.bf16.vlgmr.msra.gmra.mxu2 %v558_v43 }
  0x24   :  { %441 = vmatmul.bf16.vlgmr.msra.gmra.mxu3 %v562_v44 }
  0x26   :  { %457 = vmatpush.bf16.msrb.mxu0 %v777_v45 }
  0x27   :  { %780 = vmatpush.bf16.msrb.mxu1 %v777_v45  ;;  %v786_v45 = vpop.eup %785 }
  0x28   :  { %v490_v51 = vmul.f32 32.0, %v786_v45  ;;  %vm494_vm2 = vweird.f32 %v786_v45 }
  0x2a   :  { %458 = vmatpush.bf16.msrb.mxu0 %v776_v46 }
  0x2b   :  { %781 = vmatpush.bf16.msrb.mxu1 %v776_v46 }
  0x2e   :  { %459 = vmatpush.bf16.msrb.mxu0 %v775_v47 }
  0x2f   :  { %782 = vmatpush.bf16.msrb.mxu1 %v775_v47 }
  0x31   :  { %389 = vmatmul.bf16.gmra.mxu0 %v570_v56  ;;  %v491_v56 = vsub.f32 1.0, %v490_v51 }
  0x32   :  { %408 = vmatmul.bf16.gmra.mxu1 %v574_v57 }
  0x33   :  { %427 = vmatmul.bf16.gmra.mxu2 %v578_v58 }
  0x34   :  { %446 = vmatmul.bf16.gmra.mxu3 %v582_v59  ;;  %v492_v59 = vmul.f32 %v786_v45, %v491_v56 }
  0x36   :  { %v493_v62 = vadd.f32 %v786_v45, %v492_v59 }
  0x41   :  { %731 = vmatmul.msk.bf16.vlgmr.msrb.gmra.mxu0 %vm369_vm0, %v566_v0 }
  0x42   :  { %732 = vmatmul.msk.bf16.vlgmr.msrb.gmra.mxu1 %vm369_vm0, %v586_v1  ;;  %v495_v1 = vsel %vm494_vm2, %v786_v45, %v493_v62 }
  0x9e   :  { %v385_v2 = vpop.f32.mrf.mxu0 }
  0x9f   :  { %v404_v3 = vpop.f32.mrf.mxu1  ;;  %v386_v16 = vadd.f32 %v784_v12, %v385_v2 }
  0xa1   :  { %v405_v19 = vadd.f32 %v404_v3, %v386_v16 }
  0xa6   :  { %v423_v4 = vpop.f32.mrf.mxu2  ;;  %v387_v6 = vpop.f32.mrf.mxu0 }
  0xa7   :  { %v442_v5 = vpop.f32.mrf.mxu3  ;;  %v406_v7 = vpop.f32.mrf.mxu1  ;;  %v388_v20 = vadd.f32 %v784_v12, %v387_v6  ;;  %v424_v22 = vadd.f32 %v423_v4, %v405_v19 }
  0xa9   :  { %v407_v27 = vadd.f32 %v406_v7, %v388_v20  ;;  %v443_v30 = vadd.f32 %v442_v5, %v424_v22 }
  0xae   :  { %v425_v8 = vpop.f32.mrf.mxu2  ;;  %v390_v10 = vpop.f32.mrf.mxu0 }
  0xaf   :  { %v444_v9 = vpop.f32.mrf.mxu3  ;;  %v409_v11 = vpop.f32.mrf.mxu1  ;;  %v391_v18 = vadd.f32 %v784_v12, %v390_v10  ;;  %v426_v31 = vadd.f32 %v425_v8, %v407_v27 }
  0xb1   :  { %v410_v23 = vadd.f32 %v409_v11, %v391_v18  ;;  %v445_v37 = vadd.f32 %v444_v9, %v426_v31 }
  0xb6   :  { %v428_v13 = vpop.f32.mrf.mxu2  ;;  %v392_v14 = vpop.f32.mrf.mxu0 }
  0xb7   :  { %v411_v15 = vpop.f32.mrf.mxu1  ;;  %v447_v17 = vpop.f32.mrf.mxu3  ;;  %v393_v21 = vadd.f32 %v784_v12, %v392_v14  ;;  %v429_v28 = vadd.f32 %v428_v13, %v410_v23 }
  0xb9   :  { %v412_v29 = vadd.f32 %v411_v15, %v393_v21  ;;  %v448_v35 = vadd.f32 %v447_v17, %v429_v28 }
  0xbe   :  { %v430_v24 = vpop.f32.mrf.mxu2  ;;  %v461_v25 = vpop.f32.mrf.mxu0 }
  0xbf   :  { %v466_v26 = vpop.f32.mrf.mxu1  ;;  %v431_v32 = vadd.f32 %v430_v24, %v412_v29  ;;  %v449_v33 = vpop.f32.mrf.mxu3  ;;  %v462_v36 = vadd.f32 %v461_v25, %v443_v30 }
  0xc0   :  { %v467_v39 = vadd.f32 %v466_v26, %v448_v35 }
  0xc1   :  { %v450_v38 = vadd.f32 %v449_v33, %v431_v32  ;;  %v471_v42 = vmax.f32 %v462_v36, 0.0 }
  0xc2   :  { %v473_v46 = vmax.f32 %v467_v39, 0.0 }
  0xc3   :  { %v476_v48 = vsel %vm475_vm1, %v471_v42, 0.0 }
  0xc4   :  { %v479_v53 = vsel %vm475_vm1, %v473_v46, 0.0 }
  0xc6   :  { %v463_v40 = vpop.f32.mrf.mxu0 }
  0xc7   :  { %v468_v41 = vpop.f32.mrf.mxu1  ;;  %v464_v43 = vadd.f32 %v463_v40, %v445_v37 }
  0xc8   :  { %v469_v44 = vadd.f32 %v468_v41, %v450_v38 }
  0xc9   :  { %v472_v47 = vmax.f32 %v464_v43, 0.0 }
  0xca   :  { %v474_v50 = vmax.f32 %v469_v44, 0.0 }
  0xcb   :  { %v477_v49 = vsel %vm475_vm1, %v472_v47, 0.0 }
  0xcc   :  { %v478_v52 = vadd.f32 %v477_v49, %v476_v48  ;;  %v481_v55 = vsel %vm475_vm1, %v474_v50, 0.0 }
  0xce   :  { %v480_v54 = vadd.f32 %v479_v53, %v478_v52 }
  0xd0   :  { %v482_v57 = vadd.f32 %v481_v55, %v480_v54 }
  0xd2   :  { %v483_v58 = vrot.slane %v482_v57, 4 }
  0xd4   :  { %v484_v60 = vadd.f32 %v483_v58, %v482_v57 }
  0xd6   :  { %v485_v61 = vrot.slane %v484_v60, 2 }
  0xd8   :  { %v486_v63 = vadd.f32 %v485_v61, %v484_v60 }
  0xda   :  { %v487_v0 = vrot.slane %v486_v63, 1 }
  0xdc   :  { %v488_v2 = vadd.f32 %v487_v0, %v486_v63 }
  0xde   :  { %v496_v3 = vmul.f32 %v495_v1, %v488_v2 }
  0xe0   :  { %v497_v4 = vsub.f32 %v471_v42, %v496_v3  ;;  %v498_v5 = vsub.f32 %v472_v47, %v496_v3  ;;  %v499_v6 = vsub.f32 %v473_v46, %v496_v3  ;;  %v500_v7 = vsub.f32 %v474_v50, %v496_v3 }
  0xe2   :  { %v501_v8 = vmul.f32 %v497_v4, %v497_v4  ;;  %v502_v9 = vmul.f32 %v498_v5, %v498_v5  ;;  %v503_v10 = vmul.f32 %v499_v6, %v499_v6  ;;  %v504_v11 = vmul.f32 %v500_v7, %v500_v7 }
  0xe4   :  { %v505_v12 = vsel %vm475_vm1, %v501_v8, 0.0  ;;  %v506_v13 = vsel %vm475_vm1, %v502_v9, 0.0  ;;  %v508_v15 = vsel %vm475_vm1, %v503_v10, 0.0  ;;  %v510_v17 = vsel %vm475_vm1, %v504_v11, 0.0 }
  0xe5   :  { %v507_v14 = vadd.f32 %v506_v13, %v505_v12 }
  0xe7   :  { %v509_v16 = vadd.f32 %v508_v15, %v507_v14 }
  0xe9   :  { %v511_v18 = vadd.f32 %v510_v17, %v509_v16 }
  0xeb   :  { %v512_v19 = vrot.slane %v511_v18, 4 }
  0xed   :  { %v513_v20 = vadd.f32 %v512_v19, %v511_v18 }
  0xef   :  { %v514_v21 = vrot.slane %v513_v20, 2 }
  0xf1   :  { %v515_v22 = vadd.f32 %v514_v21, %v513_v20 }
  0xf3   :  { %v516_v23 = vrot.slane %v515_v22, 1 }
  0xf5   :  { %v517_v24 = vadd.f32 %v516_v23, %v515_v22 }
  0xf7   :  { %v518_v25 = vmul.f32 %v517_v24, %v495_v1 }
  0xf9   :  { %v519_v26 = vadd.f32 1e-05, %v518_v25 }
  0xfb   :  { %787 = vrsqrt.f32 %v519_v26  ;;  %vm526_vm4 = vweird.f32 %v519_v26 }
 0x101   :  { %v788_v27 = vpop.eup %787 }
 0x102   :  { %v521_v28 = vmul.f32 %v788_v27, %v519_v26  ;;  %vm527_vm3 = vweird.f32 %v788_v27 }
 0x103   :  { %vm528_vm5 = vmor %vm526_vm4, %vm527_vm3 }
 0x104   :  { %v522_v29 = vmul.f32 %v788_v27, %v521_v28 }
 0x106   :  { %v523_v30 = vmul.f32 0.5, %v522_v29 }
 0x108   :  { %v524_v31 = vsub.f32 1.5, %v523_v30 }
 0x10a   :  { %v525_v32 = vmul.f32 %v788_v27, %v524_v31 }
 0x10c   :  { %v529_v33 = vsel %vm528_vm5, %v788_v27, %v525_v32 }
 0x10d   :  { %v530_v34 = vmul.f32 %v529_v33, %v497_v4  ;;  %v531_v35 = vmul.f32 %v529_v33, %v498_v5  ;;  %v532_v36 = vmul.f32 %v529_v33, %v499_v6  ;;  %v533_v37 = vmul.f32 %v529_v33, %v500_v7 }
 0x10f   :  { %v534_v38 = vpack.c.bf16 %v530_v34, %v530_v34  ;;  %v535_v39 = vpack.c.bf16 %v531_v35, %v531_v35  ;;  %v536_v40 = vpack.c.bf16 %v532_v36, %v532_v36  ;;  %v537_v41 = vpack.c.bf16 %v533_v37, %v533_v37 }
 0x111   :  { %539 = vst.msk [vmem:[%s1004_s3] sm:$0xf] %vm538_vm6, %v534_v38 }
 0x112   :  { %540 = vst.msk [vmem:[%s1004_s3 + $0x4] sm:$0xf] %vm538_vm6, %v535_v39 }
 0x113   :  { %541 = vst.msk [vmem:[%s1004_s3 + $0x8] sm:$0xf] %vm538_vm6, %v536_v40 }
 0x114   :  { %542 = vst.msk [vmem:[%s1004_s3 + $0xc] sm:$0xf] %vm538_vm6, %v537_v41 }

// kernel: actor_critic_forward.9
= control target key start
LH: loop header
LB: loop body
LE: loop exit
PB: predicated region body
PF: predicated region fallthrough
CT: control target
= control target key end

     0   :  { %vm1033_vm0 = vcmask 1041408   ;;  %vm2034_vm9 = vcmask 25600   ;;  %vm2059_vm14 = vcmask 31744   ;;  %s4852_s1 = inlined_call_operand.vmem [shape: bf16[512,512], index: 1, kind: input, shape index: {}]   ;;  %s4853_s0 = inlined_call_operand.vmem [shape: bf16[2,512], index: 0, kind: input, shape index: {}]   ;;  %s4854_s2 = inlined_call_operand.vmem [shape: f32[1,512], index: 2, kind: input, shape index: {}]   ;;  %s4855_s3 = inlined_call_operand.vmem [shape: bf16[512,256], index: 3, kind: input, shape index: {}]   ;;  %s4856_s4 = inlined_call_operand.vmem [shape: f32[1,256], index: 4, kind: input, shape index: {}]   ;;  %s4857_s5 = inlined_call_operand.vmem [shape: bf16[256,256], index: 5, kind: input, shape index: {}]   ;;  %s4858_s7 = inlined_call_operand.vmem [shape: bf16[256,128], index: 7, kind: input, shape index: {}]   ;;  %s4859_s8 = inlined_call_operand.vmem [shape: f32[1,128], index: 8, kind: input, shape index: {}]   ;;  %s4860_s6 = inlined_call_operand.vmem [shape: f32[1,256], index: 6, kind: input, shape index: {}]   ;;  %s4861_s9 = inlined_call_operand.vmem [shape: f32[2,128], index: 9, kind: output, shape index: {}]  }
   0x1   :  { %v2180_v0 = vld [vmem:[%s4852_s1 + $0xe0] sm:$0xf]  ;;  %v3056_v1 = vld [vmem:[%s4852_s1 + $0xec] sm:$0xf0] }
   0x2   :  { %v2308_v2 = vld [vmem:[%s4852_s1 + $0x1e0] sm:$0xf]  ;;  %v2181_v3 = vor.u32 %v3056_v1, %v2180_v0  ;;  %v3088_v4 = vld [vmem:[%s4852_s1 + $0x1ec] sm:$0xf0] }
   0x3   :  { %v2436_v5 = vld [vmem:[%s4852_s1 + $0x2e0] sm:$0xf]  ;;  %v3120_v6 = vld [vmem:[%s4852_s1 + $0x2ec] sm:$0xf0]  ;;  %v2309_v7 = vor.u32 %v3088_v4, %v2308_v2 }
   0x4   :  { %v2437_v8 = vor.u32 %v3120_v6, %v2436_v5  ;;  %v2564_v9 = vld [vmem:[%s4852_s1 + $0x3e0] sm:$0xf]  ;;  %v3152_v10 = vld [vmem:[%s4852_s1 + $0x3ec] sm:$0xf0]  ;;  %821 = vmatpush.bf16.msra.mxu0 %v2181_v3 }
   0x5   :  { %v2164_v11 = vld [vmem:[%s4852_s1 + $0xc0] sm:$0xf]  ;;  %v2565_v12 = vor.u32 %v3152_v10, %v2564_v9  ;;  %v3052_v13 = vld [vmem:[%s4852_s1 + $0xcc] sm:$0xf0]  ;;  %834 = vmatpush.bf16.msra.mxu1 %v2309_v7 }
   0x6   :  { %v2292_v14 = vld [vmem:[%s4852_s1 + $0x1c0] sm:$0xf]  ;;  %v3084_v15 = vld [vmem:[%s4852_s1 + $0x1cc] sm:$0xf0]  ;;  %847 = vmatpush.bf16.msra.mxu2 %v2437_v8  ;;  %v2165_v16 = vor.u32 %v3052_v13, %v2164_v11 }
   0x7   :  { %v2293_v17 = vor.u32 %v3084_v15, %v2292_v14  ;;  %v2420_v18 = vld [vmem:[%s4852_s1 + $0x2c0] sm:$0xf]  ;;  %v3116_v19 = vld [vmem:[%s4852_s1 + $0x2cc] sm:$0xf0]  ;;  %860 = vmatpush.bf16.msra.mxu3 %v2565_v12 }
   0x8   :  { %v2548_v20 = vld [vmem:[%s4852_s1 + $0x3c0] sm:$0xf]  ;;  %v2421_v21 = vor.u32 %v3116_v19, %v2420_v18  ;;  %v3148_v22 = vld [vmem:[%s4852_s1 + $0x3cc] sm:$0xf0]  ;;  %822 = vmatpush.bf16.msra.mxu0 %v2165_v16 }
   0x9   :  { %v2148_v23 = vld [vmem:[%s4852_s1 + $0xa0] sm:$0xf]  ;;  %v3048_v24 = vld [vmem:[%s4852_s1 + $0xac] sm:$0xf0]  ;;  %v2549_v25 = vor.u32 %v3148_v22, %v2548_v20  ;;  %835 = vmatpush.bf16.msra.mxu1 %v2293_v17 }
   0xa   :  { %v2276_v26 = vld [vmem:[%s4852_s1 + $0x1a0] sm:$0xf]  ;;  %v3080_v27 = vld [vmem:[%s4852_s1 + $0x1ac] sm:$0xf0]  ;;  %v2149_v29 = vor.u32 %v3048_v24, %v2148_v23  ;;  %848 = vmatpush.bf16.msra.mxu2 %v2421_v21 }
   0xb   :  { %v2404_v28 = vld [vmem:[%s4852_s1 + $0x2a0] sm:$0xf]  ;;  %v3112_v30 = vld [vmem:[%s4852_s1 + $0x2ac] sm:$0xf0]  ;;  %v2277_v33 = vor.u32 %v3080_v27, %v2276_v26  ;;  %861 = vmatpush.bf16.msra.mxu3 %v2549_v25 }
   0xc   :  { %v2532_v31 = vld [vmem:[%s4852_s1 + $0x3a0] sm:$0xf]  ;;  %v3144_v32 = vld [vmem:[%s4852_s1 + $0x3ac] sm:$0xf0]  ;;  %v2405_v34 = vor.u32 %v3112_v30, %v2404_v28  ;;  %823 = vmatpush.bf16.msra.mxu0 %v2149_v29  ;;  %v3054_v28 = vld [vmem:[%s4852_s1 + $0xe4] sm:$0xf] }
   0xd   :  { %v2132_v35 = vld [vmem:[%s4852_s1 + $0x80] sm:$0xf]  ;;  %v3044_v36 = vld [vmem:[%s4852_s1 + $0x8c] sm:$0xf0]  ;;  %v2533_v38 = vor.u32 %v3144_v32, %v2532_v31  ;;  %836 = vmatpush.bf16.msra.mxu1 %v2277_v33  ;;  %v2182_v29 = vld [vmem:[%s4852_s1 + $0xf0] sm:$0xf0] }
   0xe   :  { %v2260_v37 = vld [vmem:[%s4852_s1 + $0x180] sm:$0xf]  ;;  %v3076_v39 = vld [vmem:[%s4852_s1 + $0x18c] sm:$0xf0]  ;;  %v2133_v44 = vor.u32 %v3044_v36, %v2132_v35  ;;  %849 = vmatpush.bf16.msra.mxu2 %v2405_v34  ;;  %v3086_v30 = vld [vmem:[%s4852_s1 + $0x1e4] sm:$0xf] }
   0xf   :  { %v2388_v40 = vld [vmem:[%s4852_s1 + $0x280] sm:$0xf]  ;;  %v3108_v41 = vld [vmem:[%s4852_s1 + $0x28c] sm:$0xf0]  ;;  %v2261_v45 = vor.u32 %v3076_v39, %v2260_v37  ;;  %862 = vmatpush.bf16.msra.mxu3 %v2533_v38  ;;  %v2310_v32 = vld [vmem:[%s4852_s1 + $0x1f0] sm:$0xf0] }
  0x10   :  { %v2516_v42 = vld [vmem:[%s4852_s1 + $0x380] sm:$0xf]  ;;  %v3140_v43 = vld [vmem:[%s4852_s1 + $0x38c] sm:$0xf0]  ;;  %v2389_v46 = vor.u32 %v3108_v41, %v2388_v40  ;;  %824 = vmatpush.bf16.msra.mxu0 %v2133_v44  ;;  %v3118_v33 = vld [vmem:[%s4852_s1 + $0x2e4] sm:$0xf]  ;;  %v2185_v40 = vor.u32 %v3054_v28, %v2182_v29  ;;  %v2313_v41 = vor.u32 %v3086_v30, %v2310_v32 }
  0x11   :  { %v2116_v47 = vld [vmem:[%s4852_s1 + $0x60] sm:$0xf]  ;;  %v3040_v48 = vld [vmem:[%s4852_s1 + $0x6c] sm:$0xf0]  ;;  %v2517_v50 = vor.u32 %v3140_v43, %v2516_v42  ;;  %837 = vmatpush.bf16.msra.mxu1 %v2261_v45  ;;  %v2438_v34 = vld [vmem:[%s4852_s1 + $0x2f0] sm:$0xf0] }
  0x12   :  { %v2244_v49 = vld [vmem:[%s4852_s1 + $0x160] sm:$0xf]  ;;  %v3072_v51 = vld [vmem:[%s4852_s1 + $0x16c] sm:$0xf0]  ;;  %v2117_v56 = vor.u32 %v3040_v48, %v2116_v47  ;;  %850 = vmatpush.bf16.msra.mxu2 %v2389_v46  ;;  %v3150_v37 = vld [vmem:[%s4852_s1 + $0x3e4] sm:$0xf]  ;;  %v2441_v42 = vor.u32 %v3118_v33, %v2438_v34 }
  0x13   :  { %v2372_v52 = vld [vmem:[%s4852_s1 + $0x260] sm:$0xf]  ;;  %v3104_v53 = vld [vmem:[%s4852_s1 + $0x26c] sm:$0xf0]  ;;  %v2245_v57 = vor.u32 %v3072_v51, %v2244_v49  ;;  %863 = vmatpush.bf16.msra.mxu3 %v2517_v50  ;;  %v2566_v38 = vld [vmem:[%s4852_s1 + $0x3f0] sm:$0xf0] }
  0x14   :  { %v2500_v54 = vld [vmem:[%s4852_s1 + $0x360] sm:$0xf]  ;;  %v3136_v55 = vld [vmem:[%s4852_s1 + $0x36c] sm:$0xf0]  ;;  %v2373_v58 = vor.u32 %v3104_v53, %v2372_v52  ;;  %825 = vmatpush.bf16.msra.mxu0 %v2117_v56  ;;  %v3050_v43 = vld [vmem:[%s4852_s1 + $0xc4] sm:$0xf]  ;;  %v2569_v46 = vor.u32 %v3150_v37, %v2566_v38 }
  0x15   :  { %v2100_v59 = vld [vmem:[%s4852_s1 + $0x40] sm:$0xf]  ;;  %v3036_v60 = vld [vmem:[%s4852_s1 + $0x4c] sm:$0xf0]  ;;  %v2501_v62 = vor.u32 %v3136_v55, %v2500_v54  ;;  %838 = vmatpush.bf16.msra.mxu1 %v2245_v57  ;;  %v2166_v44 = vld [vmem:[%s4852_s1 + $0xd0] sm:$0xf0] }
  0x16   :  { %v2228_v61 = vld [vmem:[%s4852_s1 + $0x140] sm:$0xf]  ;;  %v3068_v63 = vld [vmem:[%s4852_s1 + $0x14c] sm:$0xf0]  ;;  %v2101_v4 = vor.u32 %v3036_v60, %v2100_v59  ;;  %851 = vmatpush.bf16.msra.mxu2 %v2373_v58  ;;  %v3082_v45 = vld [vmem:[%s4852_s1 + $0x1c4] sm:$0xf]  ;;  %v2169_v53 = vor.u32 %v3050_v43, %v2166_v44 }
  0x17   :  { %v2356_v0 = vld [vmem:[%s4852_s1 + $0x240] sm:$0xf]  ;;  %v3100_v1 = vld [vmem:[%s4852_s1 + $0x24c] sm:$0xf0]  ;;  %v2229_v5 = vor.u32 %v3068_v63, %v2228_v61  ;;  %864 = vmatpush.bf16.msra.mxu3 %v2501_v62  ;;  %v2294_v47 = vld [vmem:[%s4852_s1 + $0x1d0] sm:$0xf0] }
  0x18   :  { %v2484_v2 = vld [vmem:[%s4852_s1 + $0x340] sm:$0xf]  ;;  %v3132_v3 = vld [vmem:[%s4852_s1 + $0x34c] sm:$0xf0]  ;;  %v2357_v6 = vor.u32 %v3100_v1, %v2356_v0  ;;  %826 = vmatpush.bf16.msra.mxu0 %v2101_v4  ;;  %v3114_v48 = vld [vmem:[%s4852_s1 + $0x2c4] sm:$0xf]  ;;  %v2297_v54 = vor.u32 %v3082_v45, %v2294_v47 }
  0x19   :  { %v2084_v7 = vld [vmem:[%s4852_s1 + $0x20] sm:$0xf]  ;;  %v3032_v8 = vld [vmem:[%s4852_s1 + $0x2c] sm:$0xf0]  ;;  %v2485_v10 = vor.u32 %v3132_v3, %v2484_v2  ;;  %839 = vmatpush.bf16.msra.mxu1 %v2229_v5  ;;  %v2422_v49 = vld [vmem:[%s4852_s1 + $0x2d0] sm:$0xf0] }
  0x1a   :  { %v2212_v9 = vld [vmem:[%s4852_s1 + $0x120] sm:$0xf]  ;;  %v3064_v11 = vld [vmem:[%s4852_s1 + $0x12c] sm:$0xf0]  ;;  %v2085_v16 = vor.u32 %v3032_v8, %v2084_v7  ;;  %852 = vmatpush.bf16.msra.mxu2 %v2357_v6  ;;  %v3146_v50 = vld [vmem:[%s4852_s1 + $0x3c4] sm:$0xf]  ;;  %v2425_v55 = vor.u32 %v3114_v48, %v2422_v49 }
  0x1b   :  { %v2340_v12 = vld [vmem:[%s4852_s1 + $0x220] sm:$0xf]  ;;  %v3096_v13 = vld [vmem:[%s4852_s1 + $0x22c] sm:$0xf0]  ;;  %v2213_v19 = vor.u32 %v3064_v11, %v2212_v9  ;;  %865 = vmatpush.bf16.msra.mxu3 %v2485_v10  ;;  %v2550_v51 = vld [vmem:[%s4852_s1 + $0x3d0] sm:$0xf0] }
  0x1c   :  { %v2468_v14 = vld [vmem:[%s4852_s1 + $0x320] sm:$0xf]  ;;  %v3128_v15 = vld [vmem:[%s4852_s1 + $0x32c] sm:$0xf0]  ;;  %v2341_v20 = vor.u32 %v3096_v13, %v2340_v12  ;;  %827 = vmatpush.bf16.msra.mxu0 %v2085_v16  ;;  %v3046_v56 = vld [vmem:[%s4852_s1 + $0xa4] sm:$0xf]  ;;  %v2553_v59 = vor.u32 %v3146_v50, %v2550_v51 }
  0x1d   :  { %v2068_v17 = vld [vmem:[%s4852_s1] sm:$0xf]  ;;  %v3028_v18 = vld [vmem:[%s4852_s1 + $0xc] sm:$0xf0]  ;;  %v2469_v24 = vor.u32 %v3128_v15, %v2468_v14  ;;  %840 = vmatpush.bf16.msra.mxu1 %v2213_v19  ;;  %v2150_v57 = vld [vmem:[%s4852_s1 + $0xb0] sm:$0xf0] }
  0x1e   :  { %v2196_v21 = vld [vmem:[%s4852_s1 + $0x100] sm:$0xf]  ;;  %v3060_v22 = vld [vmem:[%s4852_s1 + $0x10c] sm:$0xf0]  ;;  %v2069_v31 = vor.u32 %v3028_v18, %v2068_v17  ;;  %853 = vmatpush.bf16.msra.mxu2 %v2341_v20  ;;  %v3078_v58 = vld [vmem:[%s4852_s1 + $0x1a4] sm:$0xf]  ;;  %v2153_v1 = vor.u32 %v3046_v56, %v2150_v57 }
  0x1f   :  { %v2324_v23 = vld [vmem:[%s4852_s1 + $0x200] sm:$0xf]  ;;  %v3092_v25 = vld [vmem:[%s4852_s1 + $0x20c] sm:$0xf0]  ;;  %v2197_v35 = vor.u32 %v3060_v22, %v2196_v21  ;;  %866 = vmatpush.bf16.msra.mxu3 %v2469_v24  ;;  %v2278_v60 = vld [vmem:[%s4852_s1 + $0x1b0] sm:$0xf0] }
  0x20   :  { %v2452_v26 = vld [vmem:[%s4852_s1 + $0x300] sm:$0xf]  ;;  %v3124_v27 = vld [vmem:[%s4852_s1 + $0x30c] sm:$0xf0]  ;;  %v2325_v36 = vor.u32 %v3092_v25, %v2324_v23  ;;  %828 = vmatpush.bf16.msra.mxu0 %v2069_v31  ;;  %v3110_v61 = vld [vmem:[%s4852_s1 + $0x2a4] sm:$0xf]  ;;  %v2281_v3 = vor.u32 %v3078_v58, %v2278_v60 }
  0x21   :  { %v2453_v39 = vor.u32 %v3124_v27, %v2452_v26  ;;  %841 = vmatpush.bf16.msra.mxu1 %v2197_v35  ;;  %v32_v52 = vld [vmem:[%s4853_s0] sm:$0xf]  ;;  %v2406_v62 = vld [vmem:[%s4852_s1 + $0x2b0] sm:$0xf0]  ;;  %v3142_v63 = vld [vmem:[%s4852_s1 + $0x3a4] sm:$0xf] }
  0x22   :  { %854 = vmatpush.bf16.msra.mxu2 %v2325_v36  ;;  %172 = vst [vmem:[#allocation1] ss:$9 sm:$0xff] %v32_v52  ;;  %v2534_v0 = vld [vmem:[%s4852_s1 + $0x3b0] sm:$0xf0]  ;;  %v3042_v2 = vld [vmem:[%s4852_s1 + $0x84] sm:$0xf]  ;;  %v2409_v4 = vor.u32 %v3110_v61, %v2406_v62 }
  0x23   :  { %867 = vmatpush.bf16.msra.mxu3 %v2453_v39  ;;  %v2134_v5 = vld [vmem:[%s4852_s1 + $0x90] sm:$0xf0]  ;;  %v3074_v6 = vld [vmem:[%s4852_s1 + $0x184] sm:$0xf]  ;;  %v2537_v8 = vor.u32 %v3142_v63, %v2534_v0 }
  0x24   :  { %873 = vmatpush.bf16.msrb.mxu0 %v2185_v40  ;;  %v2262_v7 = vld [vmem:[%s4852_s1 + $0x190] sm:$0xf0]  ;;  %v3106_v9 = vld [vmem:[%s4852_s1 + $0x284] sm:$0xf]  ;;  %v2137_v15 = vor.u32 %v3042_v2, %v2134_v5  ;;  %v3057_v2 = vld [vmem:[%s4852_s1 + $0xf4] sm:$0xf0] }
  0x25   :  { %886 = vmatpush.bf16.msrb.mxu1 %v2313_v41  ;;  %v2390_v10 = vld [vmem:[%s4852_s1 + $0x290] sm:$0xf0]  ;;  %v3138_v11 = vld [vmem:[%s4852_s1 + $0x384] sm:$0xf]  ;;  %v2265_v18 = vor.u32 %v3074_v6, %v2262_v7  ;;  %v3089_v5 = vld [vmem:[%s4852_s1 + $0x1f4] sm:$0xf0] }
  0x26   :  { %899 = vmatpush.bf16.msrb.mxu2 %v2441_v42  ;;  %v2518_v12 = vld [vmem:[%s4852_s1 + $0x390] sm:$0xf0]  ;;  %v2393_v19 = vor.u32 %v3106_v9, %v2390_v10  ;;  %v3038_v20 = vld [vmem:[%s4852_s1 + $0x64] sm:$0xf]  ;;  %v2444_v6 = vld [vmem:[%s4852_s1 + $0x2e8] sm:$0xf] }
  0x27   :  { %912 = vmatpush.bf16.msrb.mxu3 %v2569_v46  ;;  %v2118_v21 = vld [vmem:[%s4852_s1 + $0x70] sm:$0xf0]  ;;  %v3070_v22 = vld [vmem:[%s4852_s1 + $0x164] sm:$0xf]  ;;  %v2521_v23 = vor.u32 %v3138_v11, %v2518_v12  ;;  %v3121_v7 = vld [vmem:[%s4852_s1 + $0x2f4] sm:$0xf0] }
  0x28   :  { %874 = vmatpush.bf16.msrb.mxu0 %v2169_v53  ;;  %v2246_v24 = vld [vmem:[%s4852_s1 + $0x170] sm:$0xf0]  ;;  %v3102_v25 = vld [vmem:[%s4852_s1 + $0x264] sm:$0xf]  ;;  %v2121_v29 = vor.u32 %v3038_v20, %v2118_v21  ;;  %v2572_v10 = vld [vmem:[%s4852_s1 + $0x3e8] sm:$0xf] }
  0x29   :  { %887 = vmatpush.bf16.msrb.mxu1 %v2297_v54  ;;  %v3624_v13 = vld [vmem:[#allocation1 + $0x12] sm:$0xff]  ;;  %v3626_v14 = vld [vmem:[#allocation1] sm:$0xff]  ;;  %v3631_v17 = vld [vmem:[#allocation1 + $0x9] sm:$0xff]  ;;  %v2249_v30 = vor.u32 %v3070_v22, %v2246_v24 }
  0x2a   :  { %900 = vmatpush.bf16.msrb.mxu2 %v2425_v55  ;;  %v3629_v16 = vld [vmem:[#allocation1 + $0x1b] sm:$0xff]  ;;  %v2374_v26 = vld [vmem:[%s4852_s1 + $0x270] sm:$0xf0]  ;;  %829 = vmatmul.bf16.vlgmr.msra.gmra.mxu0 %v3626_v14  ;;  %v3134_v27 = vld [vmem:[%s4852_s1 + $0x364] sm:$0xf] }
  0x2b   :  { %913 = vmatpush.bf16.msrb.mxu3 %v2553_v59  ;;  %855 = vmatmul.bf16.vlgmr.msra.gmra.mxu2 %v3624_v13  ;;  %v2502_v28 = vld [vmem:[%s4852_s1 + $0x370] sm:$0xf0]  ;;  %v2377_v31 = vor.u32 %v3102_v25, %v2374_v26  ;;  %v3034_v32 = vld [vmem:[%s4852_s1 + $0x44] sm:$0xf]  ;;  %v3153_v11 = vld [vmem:[%s4852_s1 + $0x3f4] sm:$0xf0] }
  0x2c   :  { %875 = vmatpush.bf16.msrb.mxu0 %v2153_v1  ;;  %868 = vmatmul.bf16.vlgmr.msra.gmra.mxu3 %v3629_v16  ;;  %v2102_v33 = vld [vmem:[%s4852_s1 + $0x50] sm:$0xf0]  ;;  %v3066_v34 = vld [vmem:[%s4852_s1 + $0x144] sm:$0xf]  ;;  %v2505_v35 = vor.u32 %v3134_v27, %v2502_v28  ;;  %v2188_v1 = vld [vmem:[%s4852_s1 + $0xe8] sm:$0xf] }
  0x2d   :  { %888 = vmatpush.bf16.msrb.mxu1 %v2281_v3  ;;  %v2230_v36 = vld [vmem:[%s4852_s1 + $0x150] sm:$0xf0]  ;;  %v3098_v37 = vld [vmem:[%s4852_s1 + $0x244] sm:$0xf]  ;;  %v2105_v41 = vor.u32 %v3034_v32, %v2102_v33  ;;  %v2316_v3 = vld [vmem:[%s4852_s1 + $0x1e8] sm:$0xf] }
  0x2e   :  { %901 = vmatpush.bf16.msrb.mxu2 %v2409_v4  ;;  %842 = vmatmul.bf16.vlgmr.msra.gmra.mxu1 %v3631_v17  ;;  %v2358_v38 = vld [vmem:[%s4852_s1 + $0x250] sm:$0xf0]  ;;  %v3130_v39 = vld [vmem:[%s4852_s1 + $0x344] sm:$0xf]  ;;  %v2233_v42 = vor.u32 %v3066_v34, %v2230_v36  ;;  %v2172_v20 = vld [vmem:[%s4852_s1 + $0xc8] sm:$0xf] }
  0x2f   :  { %914 = vmatpush.bf16.msrb.mxu3 %v2537_v8  ;;  %v2486_v40 = vld [vmem:[%s4852_s1 + $0x350] sm:$0xf0]  ;;  %v2361_v43 = vor.u32 %v3098_v37, %v2358_v38  ;;  %v3030_v44 = vld [vmem:[%s4852_s1 + $0x24] sm:$0xf]  ;;  %v3053_v21 = vld [vmem:[%s4852_s1 + $0xd4] sm:$0xf0] }
  0x30   :  { %876 = vmatpush.bf16.msrb.mxu0 %v2137_v15  ;;  %v2086_v45 = vld [vmem:[%s4852_s1 + $0x30] sm:$0xf0]  ;;  %v3062_v46 = vld [vmem:[%s4852_s1 + $0x124] sm:$0xf]  ;;  %v2489_v47 = vor.u32 %v3130_v39, %v2486_v40  ;;  %v2189_v15 = vor.u32 %v3057_v2, %v2188_v1  ;;  %v2300_v22 = vld [vmem:[%s4852_s1 + $0x1c8] sm:$0xf] }
  0x31   :  { %889 = vmatpush.bf16.msrb.mxu1 %v2265_v18  ;;  %v2214_v48 = vld [vmem:[%s4852_s1 + $0x130] sm:$0xf0]  ;;  %v3094_v49 = vld [vmem:[%s4852_s1 + $0x224] sm:$0xf]  ;;  %v2089_v53 = vor.u32 %v3030_v44, %v2086_v45  ;;  %v2317_v18 = vor.u32 %v3089_v5, %v2316_v3  ;;  %v3085_v24 = vld [vmem:[%s4852_s1 + $0x1d4] sm:$0xf0] }
  0x32   :  { %902 = vmatpush.bf16.msrb.mxu2 %v2393_v19  ;;  %v2342_v50 = vld [vmem:[%s4852_s1 + $0x230] sm:$0xf0]  ;;  %v3126_v51 = vld [vmem:[%s4852_s1 + $0x324] sm:$0xf]  ;;  %v2217_v56 = vor.u32 %v3062_v46, %v2214_v48  ;;  %v2445_v19 = vor.u32 %v3121_v7, %v2444_v6  ;;  %v2428_v25 = vld [vmem:[%s4852_s1 + $0x2c8] sm:$0xf] }
  0x33   :  { %915 = vmatpush.bf16.msrb.mxu3 %v2521_v23  ;;  %v2470_v52 = vld [vmem:[%s4852_s1 + $0x330] sm:$0xf0]  ;;  %v3026_v54 = vld [vmem:[%s4852_s1 + $0x4] sm:$0xf]  ;;  %v2345_v57 = vor.u32 %v3094_v49, %v2342_v50  ;;  %v2573_v23 = vor.u32 %v3153_v11, %v2572_v10  ;;  %v3117_v26 = vld [vmem:[%s4852_s1 + $0x2d4] sm:$0xf0] }
  0x34   :  { %877 = vmatpush.bf16.msrb.mxu0 %v2121_v29  ;;  %v2070_v55 = vld [vmem:[%s4852_s1 + $0x10] sm:$0xf0]  ;;  %v3058_v58 = vld [vmem:[%s4852_s1 + $0x104] sm:$0xf]  ;;  %v2473_v61 = vor.u32 %v3126_v51, %v2470_v52  ;;  %v2556_v27 = vld [vmem:[%s4852_s1 + $0x3c8] sm:$0xf]  ;;  %v2173_v29 = vor.u32 %v3053_v21, %v2172_v20 }
  0x35   :  { %890 = vmatpush.bf16.msrb.mxu1 %v2249_v30  ;;  %v2198_v59 = vld [vmem:[%s4852_s1 + $0x110] sm:$0xf0]  ;;  %v3090_v60 = vld [vmem:[%s4852_s1 + $0x204] sm:$0xf]  ;;  %v2073_v4 = vor.u32 %v3026_v54, %v2070_v55  ;;  %v3149_v28 = vld [vmem:[%s4852_s1 + $0x3d4] sm:$0xf0]  ;;  %v2301_v30 = vor.u32 %v3085_v24, %v2300_v22 }
  0x36   :  { %903 = vmatpush.bf16.msrb.mxu2 %v2377_v31  ;;  %v2326_v62 = vld [vmem:[%s4852_s1 + $0x210] sm:$0xf0]  ;;  %v3122_v63 = vld [vmem:[%s4852_s1 + $0x304] sm:$0xf]  ;;  %v2201_v8 = vor.u32 %v3058_v58, %v2198_v59  ;;  %v2429_v31 = vor.u32 %v3117_v26, %v2428_v25  ;;  %v2156_v32 = vld [vmem:[%s4852_s1 + $0xa8] sm:$0xf] }
  0x37   :  { %916 = vmatpush.bf16.msrb.mxu3 %v2505_v35  ;;  %v2454_v0 = vld [vmem:[%s4852_s1 + $0x310] sm:$0xf0]  ;;  %v2329_v9 = vor.u32 %v3090_v60, %v2326_v62  ;;  %v3049_v33 = vld [vmem:[%s4852_s1 + $0xb4] sm:$0xf0]  ;;  %v2284_v34 = vld [vmem:[%s4852_s1 + $0x1a8] sm:$0xf]  ;;  %v2557_v35 = vor.u32 %v3149_v28, %v2556_v27 }
  0x38   :  { %878 = vmatpush.bf16.msrb.mxu0 %v2105_v41  ;;  %v2457_v12 = vor.u32 %v3122_v63, %v2454_v0  ;;  %v3081_v36 = vld [vmem:[%s4852_s1 + $0x1b4] sm:$0xf0]  ;;  %v2412_v37 = vld [vmem:[%s4852_s1 + $0x2a8] sm:$0xf]  ;;  %v2157_v41 = vor.u32 %v3049_v33, %v2156_v32 }
  0x39   :  { %891 = vmatpush.bf16.msrb.mxu1 %v2233_v42  ;;  %v3113_v38 = vld [vmem:[%s4852_s1 + $0x2b4] sm:$0xf0]  ;;  %v2540_v39 = vld [vmem:[%s4852_s1 + $0x3a8] sm:$0xf]  ;;  %v2285_v42 = vor.u32 %v3081_v36, %v2284_v34 }
  0x3a   :  { %904 = vmatpush.bf16.msrb.mxu2 %v2361_v43  ;;  %v3145_v40 = vld [vmem:[%s4852_s1 + $0x3b4] sm:$0xf0]  ;;  %v2413_v43 = vor.u32 %v3113_v38, %v2412_v37  ;;  %v2140_v44 = vld [vmem:[%s4852_s1 + $0x88] sm:$0xf] }
  0x3b   :  { %917 = vmatpush.bf16.msrb.mxu3 %v2489_v47  ;;  %v3045_v45 = vld [vmem:[%s4852_s1 + $0x94] sm:$0xf0]  ;;  %v2268_v46 = vld [vmem:[%s4852_s1 + $0x188] sm:$0xf]  ;;  %v2541_v47 = vor.u32 %v3145_v40, %v2540_v39 }
  0x3c   :  { %879 = vmatpush.bf16.msrb.mxu0 %v2089_v53  ;;  %v3077_v48 = vld [vmem:[%s4852_s1 + $0x194] sm:$0xf0]  ;;  %v2396_v49 = vld [vmem:[%s4852_s1 + $0x288] sm:$0xf]  ;;  %v2141_v53 = vor.u32 %v3045_v45, %v2140_v44  ;;  %v2318_v45 = vld [vmem:[%s4852_s1 + $0x1f8] sm:$0xf0] }
  0x3d   :  { %892 = vmatpush.bf16.msrb.mxu1 %v2217_v56  ;;  %v3109_v50 = vld [vmem:[%s4852_s1 + $0x294] sm:$0xf0]  ;;  %v2524_v51 = vld [vmem:[%s4852_s1 + $0x388] sm:$0xf]  ;;  %v2269_v54 = vor.u32 %v3077_v48, %v2268_v46  ;;  %v3119_v46 = vld [vmem:[%s4852_s1 + $0x2ec] sm:$0xf] }
  0x3e   :  { %905 = vmatpush.bf16.msrb.mxu2 %v2345_v57  ;;  %v3141_v52 = vld [vmem:[%s4852_s1 + $0x394] sm:$0xf0]  ;;  %v2397_v55 = vor.u32 %v3109_v50, %v2396_v49  ;;  %v2124_v56 = vld [vmem:[%s4852_s1 + $0x68] sm:$0xf]  ;;  %v3151_v50 = vld [vmem:[%s4852_s1 + $0x3ec] sm:$0xf] }
  0x3f   :  { %918 = vmatpush.bf16.msrb.mxu3 %v2473_v61  ;;  %v3041_v57 = vld [vmem:[%s4852_s1 + $0x74] sm:$0xf0]  ;;  %v2252_v58 = vld [vmem:[%s4852_s1 + $0x168] sm:$0xf]  ;;  %v2525_v59 = vor.u32 %v3141_v52, %v2524_v51  ;;  %v2574_v51 = vld [vmem:[%s4852_s1 + $0x3f8] sm:$0xf0] }
  0x40   :  { %880 = vmatpush.bf16.msrb.mxu0 %v2073_v4  ;;  %v3073_v60 = vld [vmem:[%s4852_s1 + $0x174] sm:$0xf0]  ;;  %v2380_v61 = vld [vmem:[%s4852_s1 + $0x268] sm:$0xf]  ;;  %v2125_v1 = vor.u32 %v3041_v57, %v2124_v56  ;;  %v3051_v56 = vld [vmem:[%s4852_s1 + $0xcc] sm:$0xf] }
  0x41   :  { %893 = vmatpush.bf16.msrb.mxu1 %v2201_v8  ;;  %v3105_v62 = vld [vmem:[%s4852_s1 + $0x274] sm:$0xf0]  ;;  %v2508_v63 = vld [vmem:[%s4852_s1 + $0x368] sm:$0xf]  ;;  %v2253_v2 = vor.u32 %v3073_v60, %v2252_v58  ;;  %v2174_v57 = vld [vmem:[%s4852_s1 + $0xd8] sm:$0xf0] }
  0x42   :  { %906 = vmatpush.bf16.msrb.mxu2 %v2329_v9  ;;  %v3137_v0 = vld [vmem:[%s4852_s1 + $0x374] sm:$0xf0]  ;;  %v2381_v3 = vor.u32 %v3105_v62, %v2380_v61  ;;  %v2108_v4 = vld [vmem:[%s4852_s1 + $0x48] sm:$0xf]  ;;  %v3083_v58 = vld [vmem:[%s4852_s1 + $0x1cc] sm:$0xf] }
  0x43   :  { %919 = vmatpush.bf16.msrb.mxu3 %v2457_v12  ;;  %881 = vmatmul.bf16.vlgmr.msrb.gmra.mxu0 %v3626_v14  ;;  %v3037_v5 = vld [vmem:[%s4852_s1 + $0x54] sm:$0xf0]  ;;  %v2236_v6 = vld [vmem:[%s4852_s1 + $0x148] sm:$0xf]  ;;  %v2509_v7 = vor.u32 %v3137_v0, %v2508_v63  ;;  %v2302_v60 = vld [vmem:[%s4852_s1 + $0x1d8] sm:$0xf0] }
  0x44   :  { %925 = vmatpush.bf16.msra.mxu0 %v2189_v15  ;;  %894 = vmatmul.bf16.vlgmr.msrb.gmra.mxu1 %v3631_v17  ;;  %v3069_v8 = vld [vmem:[%s4852_s1 + $0x154] sm:$0xf0]  ;;  %v2364_v9 = vld [vmem:[%s4852_s1 + $0x248] sm:$0xf]  ;;  %v2109_v15 = vor.u32 %v3037_v5, %v2108_v4  ;;  %v3115_v61 = vld [vmem:[%s4852_s1 + $0x2cc] sm:$0xf] }
  0x45   :  { %938 = vmatpush.bf16.msra.mxu1 %v2317_v18  ;;  %907 = vmatmul.bf16.vlgmr.msrb.gmra.mxu2 %v3624_v13  ;;  %v3101_v10 = vld [vmem:[%s4852_s1 + $0x254] sm:$0xf0]  ;;  %v2492_v11 = vld [vmem:[%s4852_s1 + $0x348] sm:$0xf]  ;;  %v2237_v18 = vor.u32 %v3069_v8, %v2236_v6  ;;  %v2430_v62 = vld [vmem:[%s4852_s1 + $0x2d8] sm:$0xf0] }
  0x46   :  { %951 = vmatpush.bf16.msra.mxu2 %v2445_v19  ;;  %920 = vmatmul.bf16.vlgmr.msrb.gmra.mxu3 %v3629_v16  ;;  %v3133_v12 = vld [vmem:[%s4852_s1 + $0x354] sm:$0xf0]  ;;  %v2365_v19 = vor.u32 %v3101_v10, %v2364_v9  ;;  %v2092_v20 = vld [vmem:[%s4852_s1 + $0x28] sm:$0xf]  ;;  %v3147_v63 = vld [vmem:[%s4852_s1 + $0x3cc] sm:$0xf] }
  0x47   :  { %964 = vmatpush.bf16.msra.mxu3 %v2573_v23  ;;  %v3033_v21 = vld [vmem:[%s4852_s1 + $0x34] sm:$0xf0]  ;;  %v2220_v22 = vld [vmem:[%s4852_s1 + $0x128] sm:$0xf]  ;;  %v2493_v23 = vor.u32 %v3133_v12, %v2492_v11  ;;  %v2558_v0 = vld [vmem:[%s4852_s1 + $0x3d8] sm:$0xf0] }
  0x48   :  { %926 = vmatpush.bf16.msra.mxu0 %v2173_v29  ;;  %v3065_v24 = vld [vmem:[%s4852_s1 + $0x134] sm:$0xf0]  ;;  %v2348_v25 = vld [vmem:[%s4852_s1 + $0x228] sm:$0xf]  ;;  %v2093_v29 = vor.u32 %v3033_v21, %v2092_v20  ;;  %v3047_v4 = vld [vmem:[%s4852_s1 + $0xac] sm:$0xf] }
  0x49   :  { %939 = vmatpush.bf16.msra.mxu1 %v2301_v30  ;;  %v3097_v26 = vld [vmem:[%s4852_s1 + $0x234] sm:$0xf0]  ;;  %v2476_v27 = vld [vmem:[%s4852_s1 + $0x328] sm:$0xf]  ;;  %v2221_v32 = vor.u32 %v3065_v24, %v2220_v22  ;;  %v2158_v5 = vld [vmem:[%s4852_s1 + $0xb8] sm:$0xf0] }
  0x4a   :  { %952 = vmatpush.bf16.msra.mxu2 %v2429_v31  ;;  %v3129_v28 = vld [vmem:[%s4852_s1 + $0x334] sm:$0xf0]  ;;  %v2076_v30 = vld [vmem:[%s4852_s1 + $0x8] sm:$0xf]  ;;  %v2349_v33 = vor.u32 %v3097_v26, %v2348_v25  ;;  %v3079_v6 = vld [vmem:[%s4852_s1 + $0x1ac] sm:$0xf] }
  0x4b   :  { %965 = vmatpush.bf16.msra.mxu3 %v2557_v35  ;;  %v3029_v31 = vld [vmem:[%s4852_s1 + $0x14] sm:$0xf0]  ;;  %v2204_v34 = vld [vmem:[%s4852_s1 + $0x108] sm:$0xf]  ;;  %v2477_v37 = vor.u32 %v3129_v28, %v2476_v27  ;;  %v2286_v8 = vld [vmem:[%s4852_s1 + $0x1b8] sm:$0xf0] }
  0x4c   :  { %927 = vmatpush.bf16.msra.mxu0 %v2157_v41  ;;  %v3061_v35 = vld [vmem:[%s4852_s1 + $0x114] sm:$0xf0]  ;;  %v2332_v36 = vld [vmem:[%s4852_s1 + $0x208] sm:$0xf]  ;;  %v3055_v41 = vld [vmem:[%s4852_s1 + $0xec] sm:$0xf]  ;;  %v2077_v44 = vor.u32 %v3029_v31, %v2076_v30 }
  0x4d   :  { %940 = vmatpush.bf16.msra.mxu1 %v2285_v42  ;;  %v3093_v38 = vld [vmem:[%s4852_s1 + $0x214] sm:$0xf0]  ;;  %v2460_v39 = vld [vmem:[%s4852_s1 + $0x308] sm:$0xf]  ;;  %v2190_v42 = vld [vmem:[%s4852_s1 + $0xf8] sm:$0xf0]  ;;  %v2205_v48 = vor.u32 %v3061_v35, %v2204_v34 }
  0x4e   :  { %953 = vmatpush.bf16.msra.mxu2 %v2413_v43  ;;  %v3125_v40 = vld [vmem:[%s4852_s1 + $0x314] sm:$0xf0]  ;;  %v3087_v43 = vld [vmem:[%s4852_s1 + $0x1ec] sm:$0xf]  ;;  %v2333_v49 = vor.u32 %v3093_v38, %v2332_v36  ;;  %v2414_v10 = vld [vmem:[%s4852_s1 + $0x2b8] sm:$0xf0] }
  0x4f   :  { %966 = vmatpush.bf16.msra.mxu3 %v2541_v47  ;;  %v2446_v47 = vld [vmem:[%s4852_s1 + $0x2f8] sm:$0xf0]  ;;  %v2461_v52 = vor.u32 %v3125_v40, %v2460_v39  ;;  %v3111_v9 = vld [vmem:[%s4852_s1 + $0x2ac] sm:$0xf] }
  0x50   :  { %928 = vmatpush.bf16.msra.mxu0 %v2141_v53  ;;  %v2193_v53 = vor.u32 %v3055_v41, %v2190_v42  ;;  %v3143_v11 = vld [vmem:[%s4852_s1 + $0x3ac] sm:$0xf]  ;;  %v2542_v12 = vld [vmem:[%s4852_s1 + $0x3b8] sm:$0xf0] }
  0x51   :  { %941 = vmatpush.bf16.msra.mxu1 %v2269_v54  ;;  %v2321_v54 = vor.u32 %v3087_v43, %v2318_v45  ;;  %v3043_v20 = vld [vmem:[%s4852_s1 + $0x8c] sm:$0xf]  ;;  %v2142_v21 = vld [vmem:[%s4852_s1 + $0x98] sm:$0xf0] }
  0x52   :  { %954 = vmatpush.bf16.msra.mxu2 %v2397_v55  ;;  %v2449_v55 = vor.u32 %v3119_v46, %v2446_v47  ;;  %v3075_v22 = vld [vmem:[%s4852_s1 + $0x18c] sm:$0xf]  ;;  %v2270_v24 = vld [vmem:[%s4852_s1 + $0x198] sm:$0xf0] }
  0x53   :  { %967 = vmatpush.bf16.msra.mxu3 %v2525_v59  ;;  %v2577_v59 = vor.u32 %v3151_v50, %v2574_v51  ;;  %v3107_v25 = vld [vmem:[%s4852_s1 + $0x28c] sm:$0xf]  ;;  %v2398_v26 = vld [vmem:[%s4852_s1 + $0x298] sm:$0xf0]  ;;  %v2273_v30 = vor.u32 %v3075_v22, %v2270_v24 }
  0x54   :  { %929 = vmatpush.bf16.msra.mxu0 %v2125_v1  ;;  %v2177_v1 = vor.u32 %v3051_v56, %v2174_v57  ;;  %v3139_v27 = vld [vmem:[%s4852_s1 + $0x38c] sm:$0xf]  ;;  %v2526_v28 = vld [vmem:[%s4852_s1 + $0x398] sm:$0xf0]  ;;  %v2401_v31 = vor.u32 %v3107_v25, %v2398_v26 }
  0x55   :  { %942 = vmatpush.bf16.msra.mxu1 %v2253_v2  ;;  %v2305_v2 = vor.u32 %v3083_v58, %v2302_v60  ;;  %v3071_v34 = vld [vmem:[%s4852_s1 + $0x16c] sm:$0xf]  ;;  %v2529_v35 = vor.u32 %v3139_v27, %v2526_v28  ;;  %v2254_v36 = vld [vmem:[%s4852_s1 + $0x178] sm:$0xf0] }
  0x56   :  { %955 = vmatpush.bf16.msra.mxu2 %v2381_v3  ;;  %v2433_v3 = vor.u32 %v3115_v61, %v2430_v62  ;;  %v2382_v38 = vld [vmem:[%s4852_s1 + $0x278] sm:$0xf0]  ;;  %v3135_v39 = vld [vmem:[%s4852_s1 + $0x36c] sm:$0xf]  ;;  %v2257_v42 = vor.u32 %v3071_v34, %v2254_v36 }
  0x57   :  { %968 = vmatpush.bf16.msra.mxu3 %v2509_v7  ;;  %v2561_v7 = vor.u32 %v3147_v63, %v2558_v0  ;;  %v2510_v40 = vld [vmem:[%s4852_s1 + $0x378] sm:$0xf0]  ;;  %v3067_v46 = vld [vmem:[%s4852_s1 + $0x14c] sm:$0xf] }
  0x58   :  { %930 = vmatpush.bf16.msra.mxu0 %v2109_v15  ;;  %v2161_v15 = vor.u32 %v3047_v4, %v2158_v5  ;;  %v2110_v45 = vld [vmem:[%s4852_s1 + $0x58] sm:$0xf0]  ;;  %v2513_v47 = vor.u32 %v3135_v39, %v2510_v40  ;;  %v3131_v51 = vld [vmem:[%s4852_s1 + $0x34c] sm:$0xf] }
  0x59   :  { %943 = vmatpush.bf16.msra.mxu1 %v2237_v18  ;;  %v2289_v18 = vor.u32 %v3079_v6, %v2286_v8  ;;  %v2366_v50 = vld [vmem:[%s4852_s1 + $0x258] sm:$0xf0]  ;;  %v3031_v56 = vld [vmem:[%s4852_s1 + $0x2c] sm:$0xf] }
  0x5a   :  { %956 = vmatpush.bf16.msra.mxu2 %v2365_v19  ;;  %v2417_v19 = vor.u32 %v3111_v9, %v2414_v10  ;;  %v2094_v57 = vld [vmem:[%s4852_s1 + $0x38] sm:$0xf0]  ;;  %v3063_v58 = vld [vmem:[%s4852_s1 + $0x12c] sm:$0xf] }
  0x5b   :  { %969 = vmatpush.bf16.msra.mxu3 %v2493_v23  ;;  %v2545_v23 = vor.u32 %v3143_v11, %v2542_v12  ;;  %v2222_v60 = vld [vmem:[%s4852_s1 + $0x138] sm:$0xf0]  ;;  %v3095_v61 = vld [vmem:[%s4852_s1 + $0x22c] sm:$0xf] }
  0x5c   :  { %931 = vmatpush.bf16.msra.mxu0 %v2093_v29  ;;  %v2145_v29 = vor.u32 %v3043_v20, %v2142_v21  ;;  %v2350_v62 = vld [vmem:[%s4852_s1 + $0x238] sm:$0xf0]  ;;  %v3127_v63 = vld [vmem:[%s4852_s1 + $0x32c] sm:$0xf]  ;;  %v161_v21 = vld [vmem:[%s4854_s2] sm:$0xf] }
  0x5d   :  { %944 = vmatpush.bf16.msra.mxu1 %v2221_v32  ;;  %v3039_v32 = vld [vmem:[%s4852_s1 + $0x6c] sm:$0xf]  ;;  %v2478_v0 = vld [vmem:[%s4852_s1 + $0x338] sm:$0xf0]  ;;  %v163_v22 = vperm.slane %v161_v21, 0 }
  0x5e   :  { %957 = vmatpush.bf16.msra.mxu2 %v2349_v33  ;;  %v2126_v33 = vld [vmem:[%s4852_s1 + $0x78] sm:$0xf0]  ;;  %v3027_v4 = vld [vmem:[%s4852_s1 + $0xc] sm:$0xf] }
  0x5f   :  { %970 = vmatpush.bf16.msra.mxu3 %v2477_v37  ;;  %v3103_v37 = vld [vmem:[%s4852_s1 + $0x26c] sm:$0xf]  ;;  %v2129_v41 = vor.u32 %v3039_v32, %v2126_v33  ;;  %v2078_v5 = vld [vmem:[%s4852_s1 + $0x18] sm:$0xf0] }
  0x60   :  { %932 = vmatpush.bf16.msra.mxu0 %v2077_v44  ;;  %v2385_v43 = vor.u32 %v3103_v37, %v2382_v38  ;;  %v3035_v44 = vld [vmem:[%s4852_s1 + $0x4c] sm:$0xf]  ;;  %v2206_v8 = vld [vmem:[%s4852_s1 + $0x118] sm:$0xf0] }
  0x61   :  { %945 = vmatpush.bf16.msra.mxu1 %v2205_v48  ;;  %v2238_v48 = vld [vmem:[%s4852_s1 + $0x158] sm:$0xf0]  ;;  %v3059_v6 = vld [vmem:[%s4852_s1 + $0x10c] sm:$0xf] }
  0x62   :  { %958 = vmatpush.bf16.msra.mxu2 %v2333_v49  ;;  %v3099_v49 = vld [vmem:[%s4852_s1 + $0x24c] sm:$0xf]  ;;  %v2334_v10 = vld [vmem:[%s4852_s1 + $0x218] sm:$0xf0] }
  0x63   :  { %971 = vmatpush.bf16.msra.mxu3 %v2461_v52  ;;  %933 = vmatmul.bf16.vlgmr.msra.gmra.mxu0 %v3626_v14  ;;  %v2494_v52 = vld [vmem:[%s4852_s1 + $0x358] sm:$0xf0]  ;;  %v3091_v9 = vld [vmem:[%s4852_s1 + $0x20c] sm:$0xf] }
  0x64   :  { %977 = vmatpush.bf16.msrb.mxu0 %v2193_v53  ;;  %946 = vmatmul.bf16.vlgmr.msra.gmra.mxu1 %v3631_v17  ;;  %v2113_v53 = vor.u32 %v3035_v44, %v2110_v45  ;;  %v3123_v11 = vld [vmem:[%s4852_s1 + $0x30c] sm:$0xf]  ;;  %v2462_v12 = vld [vmem:[%s4852_s1 + $0x318] sm:$0xf0]  ;;  %v164_v45 = vperm.slane %v161_v21, 1 }
  0x65   :  { %990 = vmatpush.bf16.msrb.mxu1 %v2321_v54  ;;  %959 = vmatmul.bf16.vlgmr.msra.gmra.mxu2 %v3624_v13  ;;  %v2241_v54 = vor.u32 %v3067_v46, %v2238_v48  ;;  %v2465_v20 = vor.u32 %v3123_v11, %v2462_v12 }
  0x66   :  { %1003 = vmatpush.bf16.msrb.mxu2 %v2449_v55  ;;  %972 = vmatmul.bf16.vlgmr.msra.gmra.mxu3 %v3629_v16  ;;  %v2369_v55 = vor.u32 %v3099_v49, %v2366_v50 }
  0x67   :  { %1016 = vmatpush.bf16.msrb.mxu3 %v2577_v59  ;;  %v2497_v59 = vor.u32 %v3131_v51, %v2494_v52 }
  0x68   :  { %978 = vmatpush.bf16.msrb.mxu0 %v2177_v1  ;;  %v2097_v1 = vor.u32 %v3031_v56, %v2094_v57 }
  0x69   :  { %991 = vmatpush.bf16.msrb.mxu1 %v2305_v2  ;;  %v2225_v2 = vor.u32 %v3063_v58, %v2222_v60 }
  0x6a   :  { %1004 = vmatpush.bf16.msrb.mxu2 %v2433_v3  ;;  %v2353_v3 = vor.u32 %v3095_v61, %v2350_v62 }
  0x6b   :  { %1017 = vmatpush.bf16.msrb.mxu3 %v2561_v7  ;;  %v2481_v7 = vor.u32 %v3127_v63, %v2478_v0 }
  0x6c   :  { %979 = vmatpush.bf16.msrb.mxu0 %v2161_v15  ;;  %v2081_v15 = vor.u32 %v3027_v4, %v2078_v5 }
  0x6d   :  { %992 = vmatpush.bf16.msrb.mxu1 %v2289_v18  ;;  %v2209_v18 = vor.u32 %v3059_v6, %v2206_v8 }
  0x6e   :  { %1005 = vmatpush.bf16.msrb.mxu2 %v2417_v19  ;;  %v2337_v19 = vor.u32 %v3091_v9, %v2334_v10 }
  0x6f   :  { %1018 = vmatpush.bf16.msrb.mxu3 %v2545_v23 }
  0x70   :  { %980 = vmatpush.bf16.msrb.mxu0 %v2145_v29 }
  0x71   :  { %993 = vmatpush.bf16.msrb.mxu1 %v2273_v30 }
  0x72   :  { %1006 = vmatpush.bf16.msrb.mxu2 %v2401_v31 }
  0x73   :  { %1019 = vmatpush.bf16.msrb.mxu3 %v2529_v35 }
  0x74   :  { %981 = vmatpush.bf16.msrb.mxu0 %v2129_v41 }
  0x75   :  { %994 = vmatpush.bf16.msrb.mxu1 %v2257_v42 }
  0x76   :  { %1007 = vmatpush.bf16.msrb.mxu2 %v2385_v43 }
  0x77   :  { %1020 = vmatpush.bf16.msrb.mxu3 %v2513_v47  ;;  %v165_v47 = vperm.slane %v161_v21, 2 }
  0x78   :  { %982 = vmatpush.bf16.msrb.mxu0 %v2113_v53 }
  0x79   :  { %995 = vmatpush.bf16.msrb.mxu1 %v2241_v54  ;;  %v166_v54 = vperm.slane %v161_v21, 3  ;;  %v3281_v21 = vmov 512.0  }
  0x7a   :  { %1008 = vmatpush.bf16.msrb.mxu2 %v2369_v55  ;;  %3269 = vrcp.f32 %v3281_v21 }
  0x7b   :  { %1021 = vmatpush.bf16.msrb.mxu3 %v2497_v59 }
  0x7c   :  { %983 = vmatpush.bf16.msrb.mxu0 %v2097_v1 }
  0x7d   :  { %996 = vmatpush.bf16.msrb.mxu1 %v2225_v2 }
  0x7e   :  { %1009 = vmatpush.bf16.msrb.mxu2 %v2353_v3 }
  0x7f   :  { %1022 = vmatpush.bf16.msrb.mxu3 %v2481_v7 }
  0x80   :  { %984 = vmatpush.bf16.msrb.mxu0 %v2081_v15 }
  0x81   :  { %997 = vmatpush.bf16.msrb.mxu1 %v2209_v18 }
  0x82   :  { %1010 = vmatpush.bf16.msrb.mxu2 %v2337_v19 }
  0x83   :  { %1023 = vmatpush.bf16.msrb.mxu3 %v2465_v20  ;;  %985 = vmatmul.bf16.vlgmr.msrb.gmra.mxu0 %v3626_v14 }
  0x84   :  { %998 = vmatmul.bf16.vlgmr.msrb.gmra.mxu1 %v3631_v17 }
  0x85   :  { %1011 = vmatmul.bf16.vlgmr.msrb.gmra.mxu2 %v3624_v13 }
  0x86   :  { %1024 = vmatmul.bf16.vlgmr.msrb.gmra.mxu3 %v3629_v16 }
  0xa7   :  { %v830_v23 = vpop.f32.mrf.mxu0 }
  0xa8   :  { %v831_v24 = vadd.f32 %v830_v23, %v163_v22  ;;  %v4155_v22 = vpop.eup %3269 }
  0xa9   :  { %v1044_v23 = vmul.f32 512.0, %v4155_v22  ;;  %vm1048_vm1 = vweird.f32 %v4155_v22 }
  0xab   :  { %v843_v25 = vpop.f32.mrf.mxu1 }
  0xac   :  { %v844_v26 = vadd.f32 %v843_v25, %v831_v24  ;;  %v1045_v24 = vsub.f32 1.0, %v1044_v23  ;;  %v2636_v25 = vld [vmem:[%s4855_s3 + $0x70] sm:$0xf]  ;;  %v3177_v23 = vld [vmem:[%s4855_s3 + $0xb4] sm:$0xf0] }
  0xae   :  { %v856_v27 = vpop.f32.mrf.mxu2 }
  0xaf   :  { %v857_v28 = vadd.f32 %v856_v27, %v844_v26  ;;  %v869_v29 = vpop.f32.mrf.mxu3  ;;  %v832_v14 = vpop.f32.mrf.mxu0  ;;  %v3169_v26 = vld [vmem:[%s4855_s3 + $0x74] sm:$0xf0]  ;;  %v2700_v27 = vld [vmem:[%s4855_s3 + $0xf0] sm:$0xf] }
  0xb0   :  { %v2764_v14 = vld [vmem:[%s4855_s3 + $0x170] sm:$0xf] }
  0xb1   :  { %v4131_v30 = vadd.f32 %v869_v29, %v857_v28  ;;  %v2637_v28 = vor.u32 %v3169_v26, %v2636_v25  ;;  %v3185_v29 = vld [vmem:[%s4855_s3 + $0xf4] sm:$0xf0]  ;;  %v2796_v26 = vld [vmem:[%s4855_s3 + $0x1b0] sm:$0xf] }
  0xb2   :  { %v3193_v25 = vld [vmem:[%s4855_s3 + $0x134] sm:$0xf0] }
  0xb3   :  { %v845_v17 = vpop.f32.mrf.mxu1  ;;  %v1029_v63 = vmax.f32 %v4131_v30, 0.0  ;;  %1478 = vmatpush.bf16.msra.mxu0 %v2637_v28 }
  0xb4   :  { %v3201_v17 = vld [vmem:[%s4855_s3 + $0x174] sm:$0xf0] }
  0xb5   :  { %v1034_v7 = vsel %vm1033_vm0, %v1029_v63, 0.0 }
  0xb6   :  { %v858_v31 = vpop.f32.mrf.mxu2 }
  0xb7   :  { %v871_v13 = vpop.f32.mrf.mxu3  ;;  %v2701_v31 = vor.u32 %v3185_v29, %v2700_v27  ;;  %v3209_v27 = vld [vmem:[%s4855_s3 + $0x1b4] sm:$0xf0] }
  0xb8   :  { %v2765_v13 = vor.u32 %v3201_v17, %v2764_v14 }
  0xb9   :  { %1491 = vmatpush.bf16.msra.mxu1 %v2701_v31  ;;  %v2797_v31 = vor.u32 %v3209_v27, %v2796_v26 }
  0xba   :  { %1504 = vmatpush.bf16.msra.mxu2 %v2765_v13 }
  0xc0   :  { %v882_v32 = vpop.f32.mrf.mxu0 }
  0xc1   :  { %v895_v16 = vpop.f32.mrf.mxu1  ;;  %v883_v49 = vadd.f32 %v882_v32, %v164_v45  ;;  %v2828_v32 = vld [vmem:[%s4855_s3 + $0x1f0] sm:$0xf] }
  0xc2   :  { %v2620_v45 = vld [vmem:[%s4855_s3 + $0x50] sm:$0xf] }
  0xc3   :  { %v896_v51 = vadd.f32 %v895_v16, %v883_v49  ;;  %v3217_v16 = vld [vmem:[%s4855_s3 + $0x1f4] sm:$0xf0] }
  0xc4   :  { %v3181_v49 = vld [vmem:[%s4855_s3 + $0xd4] sm:$0xf0] }
  0xc8   :  { %v908_v33 = vpop.f32.mrf.mxu2  ;;  %v884_v35 = vpop.f32.mrf.mxu0 }
  0xc9   :  { %v921_v34 = vpop.f32.mrf.mxu3  ;;  %v897_v36 = vpop.f32.mrf.mxu1  ;;  %v909_v53 = vadd.f32 %v908_v33, %v896_v51  ;;  %v2628_v33 = vld [vmem:[%s4855_s3 + $0x60] sm:$0xf]  ;;  %v3167_v35 = vld [vmem:[%s4855_s3 + $0x64] sm:$0xf0] }
  0xca   :  { %v2692_v36 = vld [vmem:[%s4855_s3 + $0xe0] sm:$0xf] }
  0xcb   :  { %v4133_v56 = vadd.f32 %v921_v34, %v909_v53  ;;  %v2829_v34 = vor.u32 %v3217_v16, %v2828_v32  ;;  %v2812_v53 = vld [vmem:[%s4855_s3 + $0x1d0] sm:$0xf] }
  0xcd   :  { %v1030_v61 = vmax.f32 %v4133_v56, 0.0  ;;  %1517 = vmatpush.bf16.msra.mxu3 %v2829_v34 }
  0xcf   :  { %v1035_v2 = vsel %vm1033_vm0, %v1030_v61, 0.0 }
  0xd0   :  { %v910_v37 = vpop.f32.mrf.mxu2  ;;  %v1036_v10 = vadd.f32 %v1035_v2, %v1034_v7  ;;  %v3211_v7 = vld [vmem:[%s4855_s3 + $0x1c4] sm:$0xf0] }
  0xd1   :  { %v923_v38 = vpop.f32.mrf.mxu3  ;;  %v3183_v37 = vld [vmem:[%s4855_s3 + $0xe4] sm:$0xf0] }
  0xd2   :  { %v2629_v38 = vor.u32 %v3167_v35, %v2628_v33 }
  0xd4   :  { %1479 = vmatpush.bf16.msra.mxu0 %v2629_v38  ;;  %v2596_v38 = vld [vmem:[%s4855_s3 + $0x20] sm:$0xf] }
  0xe0   :  { %v934_v39 = vpop.f32.mrf.mxu0 }
  0xe1   :  { %v947_v40 = vpop.f32.mrf.mxu1  ;;  %v935_v50 = vadd.f32 %v934_v39, %v165_v47  ;;  %v2693_v39 = vor.u32 %v3183_v37, %v2692_v36 }
  0xe3   :  { %v948_v52 = vadd.f32 %v947_v40, %v935_v50  ;;  %v2756_v40 = vld [vmem:[%s4855_s3 + $0x160] sm:$0xf]  ;;  %v2748_v50 = vld [vmem:[%s4855_s3 + $0x150] sm:$0xf]  ;;  %1492 = vmatpush.bf16.msra.mxu1 %v2693_v39  ;;  %v3159_v39 = vld [vmem:[%s4855_s3 + $0x24] sm:$0xf0] }
  0xe8   :  { %v960_v41 = vpop.f32.mrf.mxu2  ;;  %v936_v43 = vpop.f32.mrf.mxu0 }
  0xe9   :  { %v973_v42 = vpop.f32.mrf.mxu3  ;;  %v949_v44 = vpop.f32.mrf.mxu1  ;;  %v961_v55 = vadd.f32 %v960_v41, %v948_v52  ;;  %v3199_v41 = vld [vmem:[%s4855_s3 + $0x164] sm:$0xf0]  ;;  %v3197_v52 = vld [vmem:[%s4855_s3 + $0x154] sm:$0xf0] }
  0xea   :  { %v2757_v43 = vor.u32 %v3199_v41, %v2756_v40  ;;  %v3215_v44 = vld [vmem:[%s4855_s3 + $0x1e4] sm:$0xf0]  ;;  %v2660_v40 = vld [vmem:[%s4855_s3 + $0xa0] sm:$0xf]  ;;  %v2597_v41 = vor.u32 %v3159_v39, %v2596_v38  ;;  %v3164_v39 = vld [vmem:[%s4855_s3 + $0x54] sm:$0xf] }
  0xeb   :  { %v4135_v60 = vadd.f32 %v973_v42, %v961_v55  ;;  %v2820_v42 = vld [vmem:[%s4855_s3 + $0x1e0] sm:$0xf]  ;;  %v1046_v55 = vmul.f32 %v4155_v22, %v1045_v24  ;;  %v2732_v24 = vld [vmem:[%s4855_s3 + $0x130] sm:$0xf] }
  0xec   :  { %v2821_v47 = vor.u32 %v3215_v44, %v2820_v42  ;;  %1505 = vmatpush.bf16.msra.mxu2 %v2757_v43  ;;  %v2733_v17 = vor.u32 %v3193_v25, %v2732_v24  ;;  %v3175_v42 = vld [vmem:[%s4855_s3 + $0xa4] sm:$0xf0]  ;;  %v2724_v43 = vld [vmem:[%s4855_s3 + $0x120] sm:$0xf]  ;;  %v3184_v24 = vld [vmem:[%s4855_s3 + $0xf4] sm:$0xf] }
  0xed   :  { %v1031_v0 = vmax.f32 %v4135_v60, 0.0  ;;  %v3191_v44 = vld [vmem:[%s4855_s3 + $0x124] sm:$0xf0]  ;;  %v2702_v25 = vld [vmem:[%s4855_s3 + $0xf8] sm:$0xf0] }
  0xee   :  { %1518 = vmatpush.bf16.msra.mxu3 %v2821_v47  ;;  %v2788_v47 = vld [vmem:[%s4855_s3 + $0x1a0] sm:$0xf]  ;;  %v2705_v27 = vor.u32 %v3184_v24, %v2702_v25  ;;  %v2598_v24 = vld [vmem:[%s4855_s3 + $0x28] sm:$0xf0]  ;;  %v3174_v25 = vld [vmem:[%s4855_s3 + $0xa4] sm:$0xf] }
  0xef   :  { %v1037_v9 = vsel %vm1033_vm0, %v1031_v0, 0.0 }
  0xf0   :  { %v962_v46 = vpop.f32.mrf.mxu2  ;;  %v1038_v12 = vadd.f32 %v1037_v9, %v1036_v10  ;;  %v1047_v10 = vadd.f32 %v4155_v22, %v1046_v55  ;;  %v2716_v55 = vld [vmem:[%s4855_s3 + $0x110] sm:$0xf] }
  0xf1   :  { %v975_v48 = vpop.f32.mrf.mxu3  ;;  %v3165_v46 = vld [vmem:[%s4855_s3 + $0x54] sm:$0xf0] }
  0xf2   :  { %v2684_v48 = vld [vmem:[%s4855_s3 + $0xd0] sm:$0xf]  ;;  %v2621_v51 = vor.u32 %v3165_v46, %v2620_v45  ;;  %v4282_v29 = vsel %vm1048_vm1, %v4155_v22, %v1047_v10  ;;  %v2661_v45 = vor.u32 %v3175_v42, %v2660_v40  ;;  %v2725_v46 = vor.u32 %v3191_v44, %v2724_v43  ;;  %v3187_v10 = vld [vmem:[%s4855_s3 + $0x104] sm:$0xf0]  ;;  %v2622_v40 = vld [vmem:[%s4855_s3 + $0x58] sm:$0xf0] }
  0xf3   :  { %v2625_v42 = vor.u32 %v3164_v39, %v2622_v40  ;;  %v2686_v43 = vld [vmem:[%s4855_s3 + $0xd8] sm:$0xf0]  ;;  %v3196_v44 = vld [vmem:[%s4855_s3 + $0x154] sm:$0xf]  ;;  %v3154_v40 = vld [vmem:[%s4855_s3 + $0x4] sm:$0xf] }
  0xf4   :  { %1480 = vmatpush.bf16.msra.mxu0 %v2621_v51  ;;  %v3157_v51 = vld [vmem:[%s4855_s3 + $0x14] sm:$0xf0] }
 0x100   :  { %v986_v57 = vpop.f32.mrf.mxu0 }
 0x101   :  { %v987_v58 = vadd.f32 %v986_v57, %v166_v54  ;;  %v999_v59 = vpop.f32.mrf.mxu1  ;;  %v3213_v54 = vld [vmem:[%s4855_s3 + $0x1d4] sm:$0xf0]  ;;  %v2685_v57 = vor.u32 %v3181_v49, %v2684_v48  ;;  %v3207_v48 = vld [vmem:[%s4855_s3 + $0x1a4] sm:$0xf0] }
 0x102   :  { %v2813_v2 = vor.u32 %v3213_v54, %v2812_v53  ;;  %v2789_v49 = vor.u32 %v3207_v48, %v2788_v47  ;;  %v3173_v54 = vld [vmem:[%s4855_s3 + $0x94] sm:$0xf0]  ;;  %v3212_v48 = vld [vmem:[%s4855_s3 + $0x1d4] sm:$0xf] }
 0x103   :  { %v1000_v62 = vadd.f32 %v999_v59, %v987_v58  ;;  %v2749_v58 = vor.u32 %v3197_v52, %v2748_v50  ;;  %v2612_v59 = vld [vmem:[%s4855_s3 + $0x40] sm:$0xf]  ;;  %1493 = vmatpush.bf16.msra.mxu1 %v2685_v57  ;;  %v2588_v50 = vld [vmem:[%s4855_s3 + $0x10] sm:$0xf]  ;;  %v3189_v57 = vld [vmem:[%s4855_s3 + $0x114] sm:$0xf0] }
 0x104   :  { %1519 = vmatpush.bf16.msra.mxu3 %v2813_v2  ;;  %v2652_v52 = vld [vmem:[%s4855_s3 + $0x90] sm:$0xf]  ;;  %v2589_v53 = vor.u32 %v3157_v51, %v2588_v50  ;;  %v3162_v51 = vld [vmem:[%s4855_s3 + $0x44] sm:$0xf] }
 0x105   :  { %1506 = vmatpush.bf16.msra.mxu2 %v2749_v58  ;;  %v2653_v58 = vor.u32 %v3173_v54, %v2652_v52  ;;  %v2614_v52 = vld [vmem:[%s4855_s3 + $0x48] sm:$0xf0] }
 0x106   :  { %v2617_v54 = vor.u32 %v3162_v51, %v2614_v52 }
 0x108   :  { %v1012_v1 = vpop.f32.mrf.mxu2  ;;  %v988_v5 = vpop.f32.mrf.mxu0 }
 0x109   :  { %v1013_v3 = vadd.f32 %v1012_v1, %v1000_v62  ;;  %v1025_v4 = vpop.f32.mrf.mxu3  ;;  %v1001_v6 = vpop.f32.mrf.mxu1  ;;  %v3163_v62 = vld [vmem:[%s4855_s3 + $0x44] sm:$0xf0]  ;;  %v2676_v1 = vld [vmem:[%s4855_s3 + $0xc0] sm:$0xf] }
 0x10a   :  { %v3195_v5 = vld [vmem:[%s4855_s3 + $0x144] sm:$0xf0]  ;;  %v2804_v6 = vld [vmem:[%s4855_s3 + $0x1c0] sm:$0xf]  ;;  %v2613_v9 = vor.u32 %v3163_v62, %v2612_v59  ;;  %v2717_v59 = vor.u32 %v3189_v57, %v2716_v55  ;;  %v2780_v62 = vld [vmem:[%s4855_s3 + $0x190] sm:$0xf] }
 0x10b   :  { %v4146_v8 = vadd.f32 %v1025_v4, %v1013_v3  ;;  %v3179_v3 = vld [vmem:[%s4855_s3 + $0xc4] sm:$0xf0]  ;;  %v2740_v4 = vld [vmem:[%s4855_s3 + $0x140] sm:$0xf]  ;;  %v2805_v21 = vor.u32 %v3211_v7, %v2804_v6  ;;  %v2678_v55 = vld [vmem:[%s4855_s3 + $0xc8] sm:$0xf0] }
 0x10c   :  { %1481 = vmatpush.bf16.msra.mxu0 %v2613_v9  ;;  %v3171_v7 = vld [vmem:[%s4855_s3 + $0x84] sm:$0xf0]  ;;  %v2708_v9 = vld [vmem:[%s4855_s3 + $0x100] sm:$0xf]  ;;  %v3194_v57 = vld [vmem:[%s4855_s3 + $0x144] sm:$0xf] }
 0x10d   :  { %v1032_v11 = vmax.f32 %v4146_v8, 0.0  ;;  %1520 = vmatpush.bf16.msra.mxu3 %v2805_v21 }
 0x10f   :  { %v1039_v15 = vsel %vm1033_vm0, %v1032_v11, 0.0 }
 0x110   :  { %v1014_v18 = vpop.f32.mrf.mxu2  ;;  %v1040_v19 = vadd.f32 %v1039_v15, %v1038_v12  ;;  %v2677_v12 = vor.u32 %v3179_v3, %v2676_v1  ;;  %v2741_v15 = vor.u32 %v3195_v5, %v2740_v4  ;;  %v3205_v1 = vld [vmem:[%s4855_s3 + $0x194] sm:$0xf0]  ;;  %v2580_v3 = vld [vmem:[%s4855_s3] sm:$0xf]  ;;  %v3155_v4 = vld [vmem:[%s4855_s3 + $0x4] sm:$0xf0] }
 0x111   :  { %v1027_v20 = vpop.f32.mrf.mxu3  ;;  %v2604_v18 = vld [vmem:[%s4855_s3 + $0x30] sm:$0xf]  ;;  %1521 = vmatpush.bf16.msra.mxu3 %v2797_v31  ;;  %v2781_v2 = vor.u32 %v3205_v1, %v2780_v62  ;;  %v2644_v5 = vld [vmem:[%s4855_s3 + $0x80] sm:$0xf]  ;;  %v2581_v6 = vor.u32 %v3155_v4, %v2580_v3  ;;  %v3210_v1 = vld [vmem:[%s4855_s3 + $0x1c4] sm:$0xf] }
 0x112   :  { %1041 = vadd.xlane.f32.xlu0 %v1040_v19  ;;  %v3161_v19 = vld [vmem:[%s4855_s3 + $0x34] sm:$0xf0]  ;;  %v2668_v20 = vld [vmem:[%s4855_s3 + $0xb0] sm:$0xf]  ;;  %1494 = vmatpush.bf16.msra.mxu1 %v2677_v12  ;;  %v2645_v12 = vor.u32 %v3171_v7, %v2644_v5  ;;  %v3160_v4 = vld [vmem:[%s4855_s3 + $0x34] sm:$0xf] }
 0x113   :  { %v2605_v28 = vor.u32 %v3161_v19, %v2604_v18  ;;  %1507 = vmatpush.bf16.msra.mxu2 %v2741_v15  ;;  %v2669_v14 = vor.u32 %v3177_v23, %v2668_v20  ;;  %v2709_v15 = vor.u32 %v3187_v10, %v2708_v9  ;;  %v2772_v18 = vld [vmem:[%s4855_s3 + $0x180] sm:$0xf]  ;;  %v3203_v19 = vld [vmem:[%s4855_s3 + $0x184] sm:$0xf0]  ;;  %v3168_v20 = vld [vmem:[%s4855_s3 + $0x74] sm:$0xf] }
 0x114   :  { %v2773_v21 = vor.u32 %v3203_v19, %v2772_v18  ;;  %v2638_v23 = vld [vmem:[%s4855_s3 + $0x78] sm:$0xf0]  ;;  %v3192_v10 = vld [vmem:[%s4855_s3 + $0x134] sm:$0xf] }
 0x115   :  { %1482 = vmatpush.bf16.msra.mxu0 %v2605_v28  ;;  %1522 = vmatpush.bf16.msra.mxu3 %v2789_v49  ;;  %v2641_v26 = vor.u32 %v3168_v20, %v2638_v23  ;;  %v3200_v28 = vld [vmem:[%s4855_s3 + $0x174] sm:$0xf]  ;;  %v2814_v49 = vld [vmem:[%s4855_s3 + $0x1d8] sm:$0xf0] }
 0x116   :  { %1495 = vmatpush.bf16.msra.mxu1 %v2669_v14  ;;  %v2766_v14 = vld [vmem:[%s4855_s3 + $0x178] sm:$0xf0]  ;;  %v2817_v50 = vor.u32 %v3212_v48, %v2814_v49  ;;  %v3208_v19 = vld [vmem:[%s4855_s3 + $0x1b4] sm:$0xf]  ;;  %v3202_v48 = vld [vmem:[%s4855_s3 + $0x184] sm:$0xf] }
 0x117   :  { %1508 = vmatpush.bf16.msra.mxu2 %v2733_v17  ;;  %v3216_v17 = vld [vmem:[%s4855_s3 + $0x1f4] sm:$0xf]  ;;  %v2769_v31 = vor.u32 %v3200_v28, %v2766_v14  ;;  %v2606_v5 = vld [vmem:[%s4855_s3 + $0x38] sm:$0xf0]  ;;  %v2726_v28 = vld [vmem:[%s4855_s3 + $0x128] sm:$0xf0] }
 0x118   :  { %v2609_v7 = vor.u32 %v3160_v4, %v2606_v5  ;;  %v2670_v9 = vld [vmem:[%s4855_s3 + $0xb8] sm:$0xf0]  ;;  %v3206_v14 = vld [vmem:[%s4855_s3 + $0x1a4] sm:$0xf]  ;;  %v2774_v49 = vld [vmem:[%s4855_s3 + $0x188] sm:$0xf0] }
 0x119   :  { %1483 = vmatpush.bf16.msra.mxu0 %v2597_v41  ;;  %1523 = vmatpush.bf16.msra.mxu3 %v2781_v2  ;;  %v3180_v41 = vld [vmem:[%s4855_s3 + $0xd4] sm:$0xf]  ;;  %v2806_v2 = vld [vmem:[%s4855_s3 + $0x1c8] sm:$0xf0]  ;;  %v2798_v20 = vld [vmem:[%s4855_s3 + $0x1b8] sm:$0xf0] }
 0x11a   :  { %1496 = vmatpush.bf16.msra.mxu1 %v2661_v45  ;;  %v2750_v45 = vld [vmem:[%s4855_s3 + $0x158] sm:$0xf0]  ;;  %v2809_v3 = vor.u32 %v3210_v1, %v2806_v2  ;;  %v2801_v23 = vor.u32 %v3208_v19, %v2798_v20 }
 0x11b   :  { %1509 = vmatpush.bf16.msra.mxu2 %v2725_v46  ;;  %v2689_v46 = vor.u32 %v3180_v41, %v2686_v43  ;;  %v2753_v47 = vor.u32 %v3196_v44, %v2750_v45  ;;  %v3170_v43 = vld [vmem:[%s4855_s3 + $0x84] sm:$0xf]  ;;  %v2646_v44 = vld [vmem:[%s4855_s3 + $0x88] sm:$0xf0] }
 0x11c   :  { %v2649_v51 = vor.u32 %v3170_v43, %v2646_v44  ;;  %v3249_v44 = vld [vmem:[%s4857_s5 + $0xf4] sm:$0xf0] }
 0x11d   :  { %1484 = vmatpush.bf16.msra.mxu0 %v2589_v53  ;;  %1524 = vmatpush.bf16.msra.mxu3 %v2773_v21  ;;  %v3178_v53 = vld [vmem:[%s4855_s3 + $0xc4] sm:$0xf] }
 0x11e   :  { %1497 = vmatpush.bf16.msra.mxu1 %v2653_v58  ;;  %v2742_v58 = vld [vmem:[%s4855_s3 + $0x148] sm:$0xf0]  ;;  %v3158_v21 = vld [vmem:[%s4855_s3 + $0x24] sm:$0xf] }
 0x11f   :  { %1510 = vmatpush.bf16.msra.mxu2 %v2717_v59  ;;  %v2681_v59 = vor.u32 %v3178_v53, %v2678_v55  ;;  %v2745_v62 = vor.u32 %v3194_v57, %v2742_v58  ;;  %v2777_v53 = vor.u32 %v3202_v48, %v2774_v49  ;;  %v3248_v49 = vld [vmem:[%s4857_s5 + $0xf4] sm:$0xf] }
 0x121   :  { %1485 = vmatpush.bf16.msra.mxu0 %v2581_v6  ;;  %v3176_v6 = vld [vmem:[%s4855_s3 + $0xb4] sm:$0xf] }
 0x122   :  { %1498 = vmatpush.bf16.msra.mxu1 %v2645_v12  ;;  %v2734_v12 = vld [vmem:[%s4855_s3 + $0x138] sm:$0xf0] }
 0x123   :  { %1511 = vmatpush.bf16.msra.mxu2 %v2709_v15  ;;  %v2673_v15 = vor.u32 %v3176_v6, %v2670_v9  ;;  %v2737_v18 = vor.u32 %v3192_v10, %v2734_v12 }
 0x125   :  { %1530 = vmatpush.bf16.msrb.mxu0 %v2641_v26  ;;  %v2662_v26 = vld [vmem:[%s4855_s3 + $0xa8] sm:$0xf0] }
 0x126   :  { %1543 = vmatpush.bf16.msrb.mxu1 %v2705_v27  ;;  %v3190_v27 = vld [vmem:[%s4855_s3 + $0x124] sm:$0xf] }
 0x127   :  { %1556 = vmatpush.bf16.msrb.mxu2 %v2769_v31  ;;  %v2665_v31 = vor.u32 %v3174_v25, %v2662_v26 }
 0x185   :  { %v1042_v13 = vpop.xlane.xlu0 %1041 }
 0x186   :  { %v1050_v32 = vmul.f32 %v4282_v29, %v1042_v13  ;;  %v2830_v13 = vld [vmem:[%s4855_s3 + $0x1f8] sm:$0xf0] }
 0x188   :  { %v4287_v16 = vsub.f32 %v1029_v63, %v1050_v32  ;;  %v4291_v22 = vsub.f32 %v1030_v61, %v1050_v32  ;;  %v4295_v33 = vsub.f32 %v1031_v0, %v1050_v32  ;;  %v4299_v34 = vsub.f32 %v1032_v11, %v1050_v32  ;;  %v3166_v32 = vld [vmem:[%s4855_s3 + $0x64] sm:$0xf] }
 0x18a   :  { %v1055_v35 = vmul.f32 %v4287_v16, %v4287_v16  ;;  %v1056_v30 = vmul.f32 %v4291_v22, %v4291_v22  ;;  %v1057_v56 = vmul.f32 %v4295_v33, %v4295_v33  ;;  %v1058_v61 = vmul.f32 %v4299_v34, %v4299_v34 }
 0x18c   :  { %v1059_v60 = vsel %vm1033_vm0, %v1055_v35, 0.0  ;;  %v1060_v63 = vsel %vm1033_vm0, %v1056_v30, 0.0  ;;  %v1062_v8 = vsel %vm1033_vm0, %v1057_v56, 0.0  ;;  %v1064_v36 = vsel %vm1033_vm0, %v1058_v61, 0.0  ;;  %v2630_v35 = vld [vmem:[%s4855_s3 + $0x68] sm:$0xf0] }
 0x18d   :  { %v1061_v0 = vadd.f32 %v1060_v63, %v1059_v60  ;;  %v2833_v30 = vor.u32 %v3216_v17, %v2830_v13  ;;  %v2633_v56 = vor.u32 %v3166_v32, %v2630_v35  ;;  %v3182_v61 = vld [vmem:[%s4855_s3 + $0xe4] sm:$0xf]  ;;  %v2694_v60 = vld [vmem:[%s4855_s3 + $0xe8] sm:$0xf0]  ;;  %v2601_v17 = vor.u32 %v3158_v21, %v2598_v24  ;;  %v3156_v32 = vld [vmem:[%s4855_s3 + $0x14] sm:$0xf] }
 0x18e   :  { %v3198_v63 = vld [vmem:[%s4855_s3 + $0x164] sm:$0xf]  ;;  %v2790_v13 = vld [vmem:[%s4855_s3 + $0x1a8] sm:$0xf0] }
 0x18f   :  { %v1063_v11 = vadd.f32 %v1062_v8, %v1061_v0  ;;  %v2697_v0 = vor.u32 %v3182_v61, %v2694_v60  ;;  %v2758_v8 = vld [vmem:[%s4855_s3 + $0x168] sm:$0xf0]  ;;  %1569 = vmatpush.bf16.msrb.mxu3 %v2833_v30  ;;  %1531 = vmatpush.bf16.msrb.mxu0 %v2633_v56  ;;  %v2729_v30 = vor.u32 %v3190_v27, %v2726_v28  ;;  %v2590_v56 = vld [vmem:[%s4855_s3 + $0x18] sm:$0xf0]  ;;  %v3172_v61 = vld [vmem:[%s4855_s3 + $0x94] sm:$0xf] }
 0x190   :  { %v2654_v60 = vld [vmem:[%s4855_s3 + $0x98] sm:$0xf0] }
 0x191   :  { %v1065_v37 = vadd.f32 %v1064_v36, %v1063_v11  ;;  %v3214_v11 = vld [vmem:[%s4855_s3 + $0x1e4] sm:$0xf]  ;;  %v2822_v36 = vld [vmem:[%s4855_s3 + $0x1e8] sm:$0xf0]  ;;  %1544 = vmatpush.bf16.msrb.mxu1 %v2697_v0  ;;  %v2793_v0 = vor.u32 %v3206_v14, %v2790_v13  ;;  %v2657_v39 = vor.u32 %v3172_v61, %v2654_v60 }
 0x192   :  { %v2825_v38 = vor.u32 %v3214_v11, %v2822_v36  ;;  %v2718_v11 = vld [vmem:[%s4855_s3 + $0x118] sm:$0xf0]  ;;  %v3204_v36 = vld [vmem:[%s4855_s3 + $0x194] sm:$0xf] }
 0x193   :  { %1066 = vadd.xlane.f32.xlu0 %v1065_v37  ;;  %v2761_v37 = vor.u32 %v3198_v63, %v2758_v8  ;;  %1532 = vmatpush.bf16.msrb.mxu0 %v2625_v42  ;;  %v3188_v8 = vld [vmem:[%s4855_s3 + $0x114] sm:$0xf]  ;;  %v2582_v42 = vld [vmem:[%s4855_s3 + $0x8] sm:$0xf0] }
 0x194   :  { %1570 = vmatpush.bf16.msrb.mxu3 %v2825_v38  ;;  %v2721_v41 = vor.u32 %v3188_v8, %v2718_v11 }
 0x195   :  { %1557 = vmatpush.bf16.msrb.mxu2 %v2761_v37  ;;  %1545 = vmatpush.bf16.msrb.mxu1 %v2689_v46  ;;  %v2782_v37 = vld [vmem:[%s4855_s3 + $0x198] sm:$0xf0]  ;;  %v3186_v46 = vld [vmem:[%s4855_s3 + $0x104] sm:$0xf] }
 0x196   :  { %v2785_v45 = vor.u32 %v3204_v36, %v2782_v37 }
 0x197   :  { %1533 = vmatpush.bf16.msrb.mxu0 %v2617_v54 }
 0x198   :  { %1571 = vmatpush.bf16.msrb.mxu3 %v2817_v50  ;;  %v2585_v50 = vor.u32 %v3154_v40, %v2582_v42  ;;  %v2892_v40 = vld [vmem:[%s4857_s5 + $0x70] sm:$0xf] }
 0x199   :  { %1558 = vmatpush.bf16.msrb.mxu2 %v2753_v47  ;;  %1546 = vmatpush.bf16.msrb.mxu1 %v2681_v59  ;;  %v2710_v47 = vld [vmem:[%s4855_s3 + $0x108] sm:$0xf0]  ;;  %v2956_v42 = vld [vmem:[%s4857_s5 + $0xf0] sm:$0xf] }
 0x19a   :  { %v2713_v52 = vor.u32 %v3186_v46, %v2710_v47  ;;  %v2894_v46 = vld [vmem:[%s4857_s5 + $0x78] sm:$0xf0]  ;;  %v2957_v47 = vor.u32 %v3249_v44, %v2956_v42  ;;  %v3224_v42 = vld [vmem:[%s4857_s5 + $0x34] sm:$0xf] }
 0x19b   :  { %1534 = vmatpush.bf16.msrb.mxu0 %v2609_v7 }
 0x19c   :  { %1572 = vmatpush.bf16.msrb.mxu3 %v2809_v3 }
 0x19d   :  { %1559 = vmatpush.bf16.msrb.mxu2 %v2745_v62  ;;  %1547 = vmatpush.bf16.msrb.mxu1 %v2673_v15 }
 0x19f   :  { %1535 = vmatpush.bf16.msrb.mxu0 %v2601_v17 }
 0x1a0   :  { %1573 = vmatpush.bf16.msrb.mxu3 %v2801_v23 }
 0x1a1   :  { %1560 = vmatpush.bf16.msrb.mxu2 %v2737_v18  ;;  %1548 = vmatpush.bf16.msrb.mxu1 %v2665_v31 }
 0x1a4   :  { %1574 = vmatpush.bf16.msrb.mxu3 %v2793_v0 }
 0x1a5   :  { %1561 = vmatpush.bf16.msrb.mxu2 %v2729_v30  ;;  %1549 = vmatpush.bf16.msrb.mxu1 %v2657_v39 }
 0x1a8   :  { %1575 = vmatpush.bf16.msrb.mxu3 %v2785_v45  ;;  %v3232_v45 = vld [vmem:[%s4857_s5 + $0x74] sm:$0xf] }
 0x1a9   :  { %1562 = vmatpush.bf16.msrb.mxu2 %v2721_v41  ;;  %1550 = vmatpush.bf16.msrb.mxu1 %v2649_v51  ;;  %v3233_v41 = vld [vmem:[%s4857_s5 + $0x74] sm:$0xf0]  ;;  %v2897_v48 = vor.u32 %v3232_v45, %v2894_v46  ;;  %v2884_v51 = vld [vmem:[%s4857_s5 + $0x60] sm:$0xf]  ;;  %v3240_v46 = vld [vmem:[%s4857_s5 + $0xb4] sm:$0xf] }
 0x1aa   :  { %v2893_v43 = vor.u32 %v3233_v41, %v2892_v40  ;;  %v3241_v41 = vld [vmem:[%s4857_s5 + $0xb4] sm:$0xf0] }
 0x1ac   :  { %1576 = vmatpush.bf16.msrb.mxu3 %v2777_v53  ;;  %v3231_v53 = vld [vmem:[%s4857_s5 + $0x64] sm:$0xf0] }
 0x1ad   :  { %1563 = vmatpush.bf16.msrb.mxu2 %v2713_v52 }
 0x206   :  { %v1067_v35 = vpop.xlane.xlu0 %1066 }
 0x207   :  { %v1068_v63 = vmul.f32 %v1067_v35, %v4282_v29  ;;  %v2593_v29 = vor.u32 %v3156_v32, %v2590_v56 }
 0x209   :  { %v1069_v38 = vadd.f32 1e-05, %v1068_v63  ;;  %1536 = vmatpush.bf16.msrb.mxu0 %v2593_v29 }
 0x20b   :  { %3271 = vrsqrt.f32 %v1069_v38  ;;  %vm1076_vm3 = vweird.f32 %v1069_v38 }
 0x20d   :  { %1537 = vmatpush.bf16.msrb.mxu0 %v2585_v50  ;;  %v2958_v50 = vld [vmem:[%s4857_s5 + $0xf8] sm:$0xf0] }
 0x20e   :  { %v2961_v52 = vor.u32 %v3248_v49, %v2958_v50  ;;  %v2852_v49 = vld [vmem:[%s4857_s5 + $0x20] sm:$0xf]  ;;  %v3223_v50 = vld [vmem:[%s4857_s5 + $0x24] sm:$0xf0] }
 0x211   :  { %v3272_v54 = vpop.eup %3271 }
 0x212   :  { %v1071_v55 = vmul.f32 %v3272_v54, %v1069_v38  ;;  %vm1077_vm2 = vweird.f32 %v3272_v54  ;;  %v3282_v38 = vmov 256.0  }
 0x213   :  { %vm1078_vm4 = vmor %vm1076_vm3, %vm1077_vm2  ;;  %3273 = vrcp.f32 %v3282_v38  ;;  %v2860_v38 = vld [vmem:[%s4857_s5 + $0x30] sm:$0xf] }
 0x214   :  { %v1072_v57 = vmul.f32 %v3272_v54, %v1071_v55  ;;  %v3247_v55 = vld [vmem:[%s4857_s5 + $0xe4] sm:$0xf0] }
 0x216   :  { %v1073_v58 = vmul.f32 0.5, %v1072_v57  ;;  %v2885_v57 = vor.u32 %v3231_v53, %v2884_v51  ;;  %v2916_v51 = vld [vmem:[%s4857_s5 + $0xa0] sm:$0xf]  ;;  %v3239_v53 = vld [vmem:[%s4857_s5 + $0xa4] sm:$0xf0] }
 0x218   :  { %v1074_v59 = vsub.f32 1.5, %v1073_v58 }
 0x219   :  { %v3274_v29 = vpop.eup %3273 }
 0x21a   :  { %v1075_v62 = vmul.f32 %v3272_v54, %v1074_v59  ;;  %v1590_v39 = vmul.f32 256.0, %v3274_v29  ;;  %v3230_v59 = vld [vmem:[%s4857_s5 + $0x64] sm:$0xf]  ;;  %vm1594_vm5 = vweird.f32 %v3274_v29 }
 0x21c   :  { %v1079_v1 = vsel %vm1078_vm4, %v3272_v54, %v1075_v62  ;;  %v2948_v54 = vld [vmem:[%s4857_s5 + $0xe0] sm:$0xf]  ;;  %v2886_v62 = vld [vmem:[%s4857_s5 + $0x68] sm:$0xf0] }
 0x21d   :  { %v1080_v2 = vmul.f32 %v1079_v1, %v4287_v16  ;;  %v1081_v3 = vmul.f32 %v1079_v1, %v4291_v22  ;;  %v1082_v4 = vmul.f32 %v1079_v1, %v4295_v33  ;;  %v1083_v5 = vmul.f32 %v1079_v1, %v4299_v34  ;;  %v1152_v22 = vld [vmem:[%s4856_s4] sm:$0x3]  ;;  %v3246_v1 = vld [vmem:[%s4857_s5 + $0xe4] sm:$0xf] }
 0x21e   :  { %v1154_v15 = vperm.slane %v1152_v22, 0  ;;  %v1155_v21 = vperm.slane %v1152_v22, 1  ;;  %v2949_v58 = vor.u32 %v3247_v55, %v2948_v54  ;;  %v3222_v54 = vld [vmem:[%s4857_s5 + $0x24] sm:$0xf]  ;;  %v2854_v55 = vld [vmem:[%s4857_s5 + $0x28] sm:$0xf0] }
 0x21f   :  { %v1084_v6 = vpack.c.bf16 %v1080_v2, %v1080_v2  ;;  %v1085_v7 = vpack.c.bf16 %v1081_v3, %v1081_v3  ;;  %v1086_v9 = vpack.c.bf16 %v1082_v4, %v1082_v4  ;;  %v1087_v10 = vpack.c.bf16 %v1083_v5, %v1083_v5  ;;  %v2950_v3 = vld [vmem:[%s4857_s5 + $0xe8] sm:$0xf0] }
 0x220   :  { %v2889_v2 = vor.u32 %v3230_v59, %v2886_v62  ;;  %v2953_v4 = vor.u32 %v3246_v1, %v2950_v3  ;;  %v1591_v5 = vsub.f32 1.0, %v1590_v39  ;;  %v2924_v39 = vld [vmem:[%s4857_s5 + $0xb0] sm:$0xf]  ;;  %v3238_v59 = vld [vmem:[%s4857_s5 + $0xa4] sm:$0xf] }
 0x221   :  { %1486 = vmatmul.bf16.vlgmr.msra.gmra.mxu0 %v1084_v6  ;;  %1499 = vmatmul.bf16.vlgmr.msra.gmra.mxu1 %v1085_v7  ;;  %v2925_v44 = vor.u32 %v3241_v41, %v2924_v39  ;;  %v2918_v62 = vld [vmem:[%s4857_s5 + $0xa8] sm:$0xf0]  ;;  %v3221_v3 = vld [vmem:[%s4857_s5 + $0x14] sm:$0xf0] }
 0x222   :  { %1512 = vmatmul.bf16.vlgmr.msra.gmra.mxu2 %v1086_v9  ;;  %1525 = vmatmul.bf16.vlgmr.msra.gmra.mxu3 %v1087_v10  ;;  %v2921_v1 = vor.u32 %v3238_v59, %v2918_v62 }
 0x223   :  { %1820 = vmatpush.bf16.msra.mxu0 %v2893_v43  ;;  %1833 = vmatpush.bf16.msra.mxu1 %v2957_v47  ;;  %v2862_v43 = vld [vmem:[%s4857_s5 + $0x38] sm:$0xf0] }
 0x224   :  { %1846 = vmatpush.bf16.msra.mxu2 %v2897_v48  ;;  %1859 = vmatpush.bf16.msra.mxu3 %v2961_v52  ;;  %v2865_v45 = vor.u32 %v3224_v42, %v2862_v43  ;;  %v2926_v47 = vld [vmem:[%s4857_s5 + $0xb8] sm:$0xf0]  ;;  %v2853_v52 = vor.u32 %v3223_v50, %v2852_v49  ;;  %v3259_v49 = vld [vmem:[%s4858_s7 + $0x48] sm:$0xff]  ;;  %v3258_v50 = vld [vmem:[%s4858_s7 + $0x40] sm:$0xff] }
 0x225   :  { %v2929_v48 = vor.u32 %v3240_v46, %v2926_v47  ;;  %v3261_v47 = vld [vmem:[%s4858_s7 + $0x58] sm:$0xff] }
 0x227   :  { %1821 = vmatpush.bf16.msra.mxu0 %v2885_v57  ;;  %1834 = vmatpush.bf16.msra.mxu1 %v2949_v58  ;;  %v2917_v57 = vor.u32 %v3239_v53, %v2916_v51  ;;  %v2857_v58 = vor.u32 %v3222_v54, %v2854_v55  ;;  %v1654_v51 = vld [vmem:[%s4860_s6] sm:$0x3] }
 0x228   :  { %1847 = vmatpush.bf16.msra.mxu2 %v2889_v2  ;;  %1860 = vmatpush.bf16.msra.mxu3 %v2953_v4  ;;  %v2844_v2 = vld [vmem:[%s4857_s5 + $0x10] sm:$0xf] }
 0x229   :  { %v2908_v4 = vld [vmem:[%s4857_s5 + $0x90] sm:$0xf] }
 0x231   :  { %1538 = vmatmul.bf16.vlgmr.msrb.gmra.mxu0 %v1084_v6  ;;  %1551 = vmatmul.bf16.vlgmr.msrb.gmra.mxu1 %v1085_v7  ;;  %v1592_v6 = vmul.f32 %v3274_v29, %v1591_v5  ;;  %v2845_v5 = vor.u32 %v3221_v3, %v2844_v2 }
 0x232   :  { %1564 = vmatmul.bf16.vlgmr.msrb.gmra.mxu2 %v1086_v9  ;;  %1577 = vmatmul.bf16.vlgmr.msrb.gmra.mxu3 %v1087_v10 }
 0x233   :  { %v1593_v7 = vadd.f32 %v3274_v29, %v1592_v6  ;;  %v3237_v6 = vld [vmem:[%s4857_s5 + $0x94] sm:$0xf0] }
 0x235   :  { %v4635_v9 = vsel %vm1594_vm5, %v3274_v29, %v1593_v7  ;;  %v3225_v29 = vld [vmem:[%s4857_s5 + $0x34] sm:$0xf0]  ;;  %v3220_v7 = vld [vmem:[%s4857_s5 + $0x14] sm:$0xf] }
 0x236   :  { %v2861_v40 = vor.u32 %v3225_v29, %v2860_v38  ;;  %v3252_v29 = vld [vmem:[%s4858_s7 + $0x10] sm:$0xff] }
 0x29e   :  { %v1487_v12 = vpop.f32.mrf.mxu0  ;;  %v1500_v16 = vpop.f32.mrf.mxu1 }
 0x29f   :  { %v1488_v20 = vadd.f32 %v1487_v12, %v1154_v15 }
 0x2a1   :  { %v1501_v25 = vadd.f32 %v1500_v16, %v1488_v20  ;;  %v2876_v20 = vld [vmem:[%s4857_s5 + $0x50] sm:$0xf] }
 0x2a5   :  { %v1513_v33 = vpop.f32.mrf.mxu2  ;;  %v1526_v34 = vpop.f32.mrf.mxu3 }
 0x2a6   :  { %v1489_v18 = vpop.f32.mrf.mxu0  ;;  %v1502_v19 = vpop.f32.mrf.mxu1  ;;  %v1514_v28 = vadd.f32 %v1513_v33, %v1501_v25  ;;  %v3245_v25 = vld [vmem:[%s4857_s5 + $0xd4] sm:$0xf0] }
 0x2a8   :  { %v1527_v17 = vadd.f32 %v1526_v34, %v1514_v28 }
 0x2aa   :  { %v1582_v61 = vmax.f32 %v1527_v17, 0.0  ;;  %v3244_v17 = vld [vmem:[%s4857_s5 + $0xd4] sm:$0xf] }
 0x2ac   :  { %v1584_v0 = vsel %vm1033_vm0, %v1582_v61, 0.0 }
 0x2ad   :  { %v1515_v23 = vpop.f32.mrf.mxu2  ;;  %v1528_v24 = vpop.f32.mrf.mxu3 }
 0x2ae   :  { %v1539_v26 = vpop.f32.mrf.mxu0  ;;  %v1552_v27 = vpop.f32.mrf.mxu1  ;;  %v2940_v23 = vld [vmem:[%s4857_s5 + $0xd0] sm:$0xf] }
 0x2af   :  { %v1540_v14 = vadd.f32 %v1539_v26, %v1155_v21  ;;  %v3229_v21 = vld [vmem:[%s4857_s5 + $0x54] sm:$0xf0]  ;;  %v3228_v26 = vld [vmem:[%s4857_s5 + $0x54] sm:$0xf]  ;;  %v2941_v28 = vor.u32 %v3245_v25, %v2940_v23  ;;  %v3218_v25 = vld [vmem:[%s4857_s5 + $0x4] sm:$0xf] }
 0x2b0   :  { %v2877_v24 = vor.u32 %v3229_v21, %v2876_v20  ;;  %v3219_v20 = vld [vmem:[%s4857_s5 + $0x4] sm:$0xf0]  ;;  %v2900_v21 = vld [vmem:[%s4857_s5 + $0x80] sm:$0xf] }
 0x2b1   :  { %v1553_v31 = vadd.f32 %v1552_v27, %v1540_v14  ;;  %v2878_v27 = vld [vmem:[%s4857_s5 + $0x58] sm:$0xf0]  ;;  %1835 = vmatpush.bf16.msra.mxu1 %v2941_v28 }
 0x2b2   :  { %v2881_v14 = vor.u32 %v3228_v26, %v2878_v27  ;;  %1822 = vmatpush.bf16.msra.mxu0 %v2877_v24  ;;  %v3235_v24 = vld [vmem:[%s4857_s5 + $0x84] sm:$0xf0]  ;;  %v2838_v26 = vld [vmem:[%s4857_s5 + $0x8] sm:$0xf0] }
 0x2b3   :  { %v2901_v27 = vor.u32 %v3235_v24, %v2900_v21  ;;  %v2841_v28 = vor.u32 %v3218_v25, %v2838_v26 }
 0x2b4   :  { %1848 = vmatpush.bf16.msra.mxu2 %v2881_v14  ;;  %v3234_v14 = vld [vmem:[%s4857_s5 + $0x84] sm:$0xf] }
 0x2b5   :  { %v1565_v13 = vpop.f32.mrf.mxu2  ;;  %v1578_v32 = vpop.f32.mrf.mxu3 }
 0x2b6   :  { %v1566_v35 = vadd.f32 %v1565_v13, %v1553_v31  ;;  %v1541_v30 = vpop.f32.mrf.mxu0  ;;  %v1554_v56 = vpop.f32.mrf.mxu1  ;;  %v2942_v31 = vld [vmem:[%s4857_s5 + $0xd8] sm:$0xf0] }
 0x2b7   :  { %v2945_v13 = vor.u32 %v3244_v17, %v2942_v31  ;;  %v2932_v30 = vld [vmem:[%s4857_s5 + $0xc0] sm:$0xf]  ;;  %v2902_v17 = vld [vmem:[%s4857_s5 + $0x88] sm:$0xf0] }
 0x2b8   :  { %v1579_v60 = vadd.f32 %v1578_v32, %v1566_v35  ;;  %v2868_v32 = vld [vmem:[%s4857_s5 + $0x40] sm:$0xf]  ;;  %v3227_v35 = vld [vmem:[%s4857_s5 + $0x44] sm:$0xf0]  ;;  %v2905_v31 = vor.u32 %v3234_v14, %v2902_v17 }
 0x2b9   :  { %1861 = vmatpush.bf16.msra.mxu3 %v2945_v13  ;;  %v2869_v56 = vor.u32 %v3227_v35, %v2868_v32  ;;  %v3257_v13 = vld [vmem:[%s4858_s7 + $0x38] sm:$0xff]  ;;  %v3256_v35 = vld [vmem:[%s4858_s7 + $0x30] sm:$0xff] }
 0x2ba   :  { %v1583_v63 = vmax.f32 %v1579_v60, 0.0  ;;  %v3226_v60 = vld [vmem:[%s4857_s5 + $0x44] sm:$0xf]  ;;  %v3265_v32 = vld [vmem:[%s4858_s7 + $0x78] sm:$0xff] }
 0x2bb   :  { %1823 = vmatpush.bf16.msra.mxu0 %v2869_v56 }
 0x2bc   :  { %v1585_v8 = vsel %vm1033_vm0, %v1583_v63, 0.0 }
 0x2bd   :  { %v1567_v11 = vpop.f32.mrf.mxu2  ;;  %v1580_v36 = vpop.f32.mrf.mxu3  ;;  %v1586_v37 = vadd.f32 %v1585_v8, %v1584_v0 }
 0x2be   :  { %v3242_v11 = vld [vmem:[%s4857_s5 + $0xc4] sm:$0xf]  ;;  %v2934_v36 = vld [vmem:[%s4857_s5 + $0xc8] sm:$0xf0] }
 0x2bf   :  { %1587 = vadd.xlane.f32.xlu1 %v1586_v37  ;;  %v2937_v37 = vor.u32 %v3242_v11, %v2934_v36  ;;  %1824 = vmatpush.bf16.msra.mxu0 %v2861_v40  ;;  %v3253_v11 = vld [vmem:[%s4858_s7 + $0x18] sm:$0xff] }
 0x2c1   :  { %1862 = vmatpush.bf16.msra.mxu3 %v2937_v37 }
 0x2c3   :  { %1825 = vmatpush.bf16.msra.mxu0 %v2853_v52  ;;  %v1656_v52 = vperm.slane %v1654_v51, 0 }
 0x2c5   :  { %1863 = vmatpush.bf16.msra.mxu3 %v2929_v48  ;;  %v3251_v48 = vld [vmem:[%s4858_s7 + $0x8] sm:$0xff] }
 0x2c7   :  { %1826 = vmatpush.bf16.msra.mxu0 %v2845_v5 }
 0x2c9   :  { %1864 = vmatpush.bf16.msra.mxu3 %v2921_v1 }
 0x332   :  { %v1588_v10 = vpop.xlane.xlu1 %1587 }
 0x333   :  { %v1596_v12 = vmul.f32 %v4635_v9, %v1588_v10  ;;  %v2846_v10 = vld [vmem:[%s4857_s5 + $0x18] sm:$0xf0] }
 0x335   :  { %v4638_v16 = vsub.f32 %v1582_v61, %v1596_v12  ;;  %v4640_v22 = vsub.f32 %v1583_v63, %v1596_v12  ;;  %v3243_v61 = vld [vmem:[%s4857_s5 + $0xc4] sm:$0xf0]  ;;  %v2870_v63 = vld [vmem:[%s4857_s5 + $0x48] sm:$0xf0]  ;;  %v2909_v12 = vor.u32 %v3237_v6, %v2908_v4 }
 0x336   :  { %v2933_v0 = vor.u32 %v3243_v61, %v2932_v30  ;;  %v2873_v8 = vor.u32 %v3226_v60, %v2870_v63  ;;  %v3264_v30 = vld [vmem:[%s4858_s7 + $0x70] sm:$0xff]  ;;  %v3255_v60 = vld [vmem:[%s4858_s7 + $0x28] sm:$0xff] }
 0x337   :  { %v1599_v33 = vmul.f32 %v4638_v16, %v4638_v16  ;;  %v1600_v34 = vmul.f32 %v4640_v22, %v4640_v22  ;;  %v3263_v63 = vld [vmem:[%s4858_s7 + $0x68] sm:$0xff] }
 0x338   :  { %1836 = vmatpush.bf16.msra.mxu1 %v2933_v0  ;;  %1849 = vmatpush.bf16.msra.mxu2 %v2873_v8  ;;  %v3254_v8 = vld [vmem:[%s4858_s7 + $0x20] sm:$0xff] }
 0x339   :  { %v1601_v15 = vsel %vm1033_vm0, %v1599_v33, 0.0  ;;  %v1602_v18 = vsel %vm1033_vm0, %v1600_v34, 0.0  ;;  %v2849_v33 = vor.u32 %v3220_v7, %v2846_v10  ;;  %v3236_v34 = vld [vmem:[%s4857_s5 + $0x94] sm:$0xf] }
 0x33a   :  { %v1603_v19 = vadd.f32 %v1602_v18, %v1601_v15  ;;  %v2910_v15 = vld [vmem:[%s4857_s5 + $0x98] sm:$0xf0] }
 0x33b   :  { %v2913_v18 = vor.u32 %v3236_v34, %v2910_v15  ;;  %v3268_v15 = vld [vmem:[%s4859_s8] ss:$0 sm:$0xff] }
 0x33c   :  { %1604 = vadd.xlane.f32.xlu1 %v1603_v19  ;;  %1837 = vmatpush.bf16.msra.mxu1 %v2925_v44  ;;  %v2836_v19 = vld [vmem:[%s4857_s5] sm:$0xf] }
 0x33d   :  { %1850 = vmatpush.bf16.msra.mxu2 %v2865_v45  ;;  %1865 = vmatpush.bf16.msra.mxu3 %v2913_v18  ;;  %v2837_v23 = vor.u32 %v3219_v20, %v2836_v19 }
 0x33f   :  { %1827 = vmatpush.bf16.msra.mxu0 %v2837_v23 }
 0x340   :  { %1838 = vmatpush.bf16.msra.mxu1 %v2917_v57 }
 0x341   :  { %1851 = vmatpush.bf16.msra.mxu2 %v2857_v58  ;;  %1866 = vmatpush.bf16.msra.mxu3 %v2905_v31  ;;  %v1657_v58 = vperm.slane %v1654_v51, 1 }
 0x343   :  { %2008 = vmatpush.bf16.msrb.mxu0 %v3257_v13 }
 0x344   :  { %1839 = vmatpush.bf16.msra.mxu1 %v2909_v12 }
 0x345   :  { %1852 = vmatpush.bf16.msra.mxu2 %v2849_v33 }
 0x347   :  { %2009 = vmatpush.bf16.msrb.mxu0 %v3256_v35 }
 0x348   :  { %1840 = vmatpush.bf16.msra.mxu1 %v2901_v27 }
 0x349   :  { %1853 = vmatpush.bf16.msra.mxu2 %v2841_v28 }
 0x34b   :  { %2010 = vmatpush.bf16.msrb.mxu0 %v3255_v60 }
 0x34c   :  { %2021 = vmatpush.bf16.msrb.mxu1 %v3265_v32 }
 0x34f   :  { %2011 = vmatpush.bf16.msrb.mxu0 %v3254_v8 }
 0x350   :  { %2022 = vmatpush.bf16.msrb.mxu1 %v3264_v30 }
 0x353   :  { %2012 = vmatpush.bf16.msrb.mxu0 %v3253_v11 }
 0x354   :  { %2023 = vmatpush.bf16.msrb.mxu1 %v3263_v63 }
 0x357   :  { %2013 = vmatpush.bf16.msrb.mxu0 %v3252_v29 }
 0x35b   :  { %2014 = vmatpush.bf16.msrb.mxu0 %v3251_v48 }
 0x3af   :  { %v1605_v56 = vpop.xlane.xlu1 %1604 }
 0x3b0   :  { %v1606_v61 = vmul.f32 %v1605_v56, %v4635_v9  ;;  %v3262_v9 = vld [vmem:[%s4858_s7 + $0x60] sm:$0xff] }
 0x3b1   :  { %2024 = vmatpush.bf16.msrb.mxu1 %v3262_v9 }
 0x3b2   :  { %v1607_v0 = vadd.f32 1e-05, %v1606_v61 }
 0x3b4   :  { %3275 = vrsqrt.f32 %v1607_v0  ;;  %vm1614_vm7 = vweird.f32 %v1607_v0 }
 0x3b5   :  { %2025 = vmatpush.bf16.msrb.mxu1 %v3261_v47 }
 0x3ba   :  { %v3276_v36 = vpop.eup %3275 }
 0x3bb   :  { %v1609_v37 = vmul.f32 %v3276_v36, %v1607_v0  ;;  %vm1615_vm6 = vweird.f32 %v3276_v36 }
 0x3bc   :  { %vm1616_vm8 = vmor %vm1614_vm7, %vm1615_vm6 }
 0x3bd   :  { %v1610_v38 = vmul.f32 %v3276_v36, %v1609_v37 }
 0x3bf   :  { %v1611_v39 = vmul.f32 0.5, %v1610_v38 }
 0x3c1   :  { %v1612_v40 = vsub.f32 1.5, %v1611_v39 }
 0x3c3   :  { %v1613_v41 = vmul.f32 %v3276_v36, %v1612_v40 }
 0x3c5   :  { %v1617_v42 = vsel %vm1616_vm8, %v3276_v36, %v1613_v41 }
 0x3c6   :  { %v1618_v43 = vmul.f32 %v1617_v42, %v4638_v16  ;;  %v1619_v44 = vmul.f32 %v1617_v42, %v4640_v22  ;;  %v3260_v16 = vld [vmem:[%s4858_s7 + $0x50] sm:$0xff]  ;;  %v3250_v22 = vld [vmem:[%s4858_s7] sm:$0xff] }
 0x3c7   :  { %2026 = vmatpush.bf16.msrb.mxu1 %v3260_v16  ;;  %2015 = vmatpush.bf16.msrb.mxu0 %v3250_v22 }
 0x3c8   :  { %v1620_v45 = vpack.c.bf16 %v1618_v43, %v1618_v43  ;;  %v1621_v46 = vpack.c.bf16 %v1619_v44, %v1619_v44 }
 0x3ca   :  { %1828 = vmatmul.bf16.vlgmr.msra.gmra.mxu0 %v1620_v45  ;;  %1841 = vmatmul.bf16.vlgmr.msra.gmra.mxu1 %v1621_v46 }
 0x3cb   :  { %1854 = vmatmul.bf16.vlgmr.msra.gmra.mxu2 %v1620_v45  ;;  %1867 = vmatmul.bf16.vlgmr.msra.gmra.mxu3 %v1621_v46 }
 0x3cc   :  { %2027 = vmatpush.bf16.msrb.mxu1 %v3259_v49 }
 0x3d0   :  { %2028 = vmatpush.bf16.msrb.mxu1 %v3258_v50 }
 0x447   :  { %v1829_v53 = vpop.f32.mrf.mxu0  ;;  %v1842_v54 = vpop.f32.mrf.mxu1 }
 0x448   :  { %v1830_v55 = vadd.f32 %v1829_v53, %v1656_v52 }
 0x44a   :  { %v1843_v57 = vadd.f32 %v1842_v54, %v1830_v55 }
 0x44c   :  { %v1872_v59 = vmax.f32 %v1843_v57, 0.0 }
 0x44e   :  { %v1874_v62 = vpack.c.bf16 %v1872_v59, %v1872_v59  ;;  %v1855_v1 = vpop.f32.mrf.mxu2  ;;  %v1868_v2 = vpop.f32.mrf.mxu3 }
 0x44f   :  { %v1856_v3 = vadd.f32 %v1855_v1, %v1657_v58  ;;  %v1831_v4 = vpop.f32.mrf.mxu0  ;;  %v1844_v5 = vpop.f32.mrf.mxu1 }
 0x450   :  { %2016 = vmatmul.bf16.vlgmr.msrb.gmra.mxu0 %v1874_v62 }
 0x451   :  { %v1869_v6 = vadd.f32 %v1868_v2, %v1856_v3 }
 0x453   :  { %v1873_v7 = vmax.f32 %v1869_v6, 0.0 }
 0x455   :  { %v1875_v10 = vpack.c.bf16 %v1873_v7, %v1873_v7 }
 0x456   :  { %v1857_v12 = vpop.f32.mrf.mxu2  ;;  %v1870_v33 = vpop.f32.mrf.mxu3 }
 0x457   :  { %2029 = vmatmul.bf16.vlgmr.msrb.gmra.mxu1 %v1875_v10 }
 0x4cd   :  { %v2017_v34 = vpop.f32.mrf.mxu0 }
 0x4ce   :  { %v2018_v18 = vadd.f32 %v3268_v15, %v2017_v34 }
 0x4d4   :  { %v2030_v19 = vpop.f32.mrf.mxu1 }
 0x4d5   :  { %v2031_v20 = vadd.f32 %v2030_v19, %v2018_v18  ;;  %v2019_v21 = vpop.f32.mrf.mxu0 }
 0x4d7   :  { %v2035_v23 = vsel %vm2034_vm9, %v2031_v20, -inf }
 0x4d8   :  { %2036 = vmax.xlane.f32.xlu2 %v2035_v23 }
 0x4dc   :  { %v2032_v24 = vpop.f32.mrf.mxu1 }
 0x54b   :  { %v2037_v25 = vpop.xlane.xlu2 %2036 }
 0x54c   :  { %v2038_v26 = vsub.f32 %v2031_v20, %v2037_v25 }
 0x54e   :  { %v2039_v27 = vmul.f32 1.442695, %v2038_v26 }
 0x550   :  { %3277 = vpow2.f32 %v2039_v27 }
 0x556   :  { %v3278_v28 = vpop.eup %3277 }
 0x557   :  { %v2041_v14 = vsel %vm2034_vm9, %v3278_v28, 0.0 }
 0x558   :  { %2042 = vadd.xlane.f32.xlu2 %v2041_v14 }
 0x5cb   :  { %v2043_v17 = vpop.xlane.xlu2 %2042 }
 0x5cc   :  { %3279 = vrcp.f32 %v2043_v17  ;;  %v2055_v35 = vand.u32 2147483648, %v2043_v17  ;;  %v2053_v56 = vand.u32 2147483647, %v2043_v17  ;;  %vm2049_vm11 = vweird.f32 %v2043_v17 }
 0x5ce   :  { %v2056_v60 = vor.u32 1.1754944e-38, %v2055_v35  ;;  %vm2054_vm13 = vcmp.eq.f32.partialorder %v2053_v56, 8.507059e+37 }
 0x5d2   :  { %v3280_v31 = vpop.eup %3279 }
 0x5d3   :  { %v2045_v13 = vmul.f32 %v3280_v31, %v2043_v17  ;;  %vm2050_vm10 = vweird.f32 %v3280_v31 }
 0x5d4   :  { %vm2051_vm12 = vmor %vm2049_vm11, %vm2050_vm10 }
 0x5d5   :  { %v2046_v32 = vsub.f32 1.0, %v2045_v13 }
 0x5d7   :  { %v2047_v30 = vmul.f32 %v3280_v31, %v2046_v32 }
 0x5d9   :  { %v2048_v61 = vadd.f32 %v3280_v31, %v2047_v30 }
 0x5db   :  { %v2052_v63 = vsel %vm2051_vm12, %v3280_v31, %v2048_v61 }
 0x5dc   :  { %v2057_v0 = vsel %vm2054_vm13, %v2056_v60, %v2052_v63 }
 0x5dd   :  { %v2058_v8 = vmul.f32 %v3278_v28, %v2057_v0 }
 0x5df   :  { %v2060_v9 = vsel %vm2059_vm14, %v2058_v8, %v2031_v20 }
 0x5e0   :  { %2061 = vst [vmem:[%s4861_s9] sm:$0x3] %v2060_v9 }

</bundles_post_ra>
